<compile_context>
chip_gen: v7x
topology: tpu7x:2x2x1
jax: 0.10.0
libtpu: 0.0.40
codegen_flags: <defaults>
</compile_context>

<pallas_src>
import functools

import jax
import jax.numpy as jnp
from jax.experimental import pallas as pl
from jax.experimental.pallas import tpu as pltpu


# ---------------------------------------------------------------------------
# in-kernel helpers (operate on VMEM values)
# ---------------------------------------------------------------------------
def _relu_pool(a):
    # a: (L, C) pre-activation -> ReLU -> MaxPool1d(2) along the length axis (L even).
    L, C = a.shape
    a = jnp.maximum(a, 0.0)
    return jnp.max(a.reshape(L // 2, 2, C), axis=1)


def _conv_im2col_relu_pool(h, w_col, b):
    # 'same' Conv1d (odd K) as a single MXU matmul over stacked shifted views (im2col),
    # then bias + ReLU + MaxPool1d(2).
    # h: (L, C_in) f32, w_col: (K*C_in, C_out) bf16, b: (1, C_out) f32.
    L, C_in = h.shape
    K = w_col.shape[0] // C_in
    pad = (K - 1) // 2
    z = jnp.zeros((pad, C_in), h.dtype)
    hp = jnp.concatenate([z, h, z], axis=0)                               # (L+2*pad, C_in)
    cols = jnp.concatenate([hp[k:k + L, :] for k in range(K)], axis=1)    # (L, K*C_in)
    y = jnp.dot(cols.astype(w_col.dtype), w_col,
                preferred_element_type=jnp.float32) + b                    # (L, C_out)
    return _relu_pool(y)


# ---------------------------------------------------------------------------
# fused forward kernel: one batch sample per grid step
# ---------------------------------------------------------------------------
def attention_cnn_kernel(x_ref, w1_ref, b1_ref, w2_ref, b2_ref, w3_ref, b3_ref,
                         wqkv_ref, bqkv_ref, wo_ref, bo_ref,
                         wfc1_ref, bfc1_ref, wfc2_ref, bfc2_ref,
                         o_ref, *, num_heads, seq_len):
    f32, bf16 = jnp.float32, jnp.bfloat16
    L = seq_len
    E = 128
    D = E // num_heads
    S = L // 8

    # ---- conv1: Conv1d(1 -> 32, K=5, pad=2) + ReLU + MaxPool(2)  (VPU broadcast) ----
    x = x_ref[0].astype(f32)                                    # (L+4, 1), pre-padded
    acc = jnp.zeros((L, 32), f32)
    for t in range(5):
        acc = acc + x[t:t + L, :] * w1_ref[t]                   # (L,1)*(1,32) -> (L,32)
    h = _relu_pool(acc + b1_ref[...])                           # (L/2, 32)

    # ---- conv2 / conv3: im2col MXU matmuls ----
    h = _conv_im2col_relu_pool(h, w2_ref[...], b2_ref[...])     # (L/4, 64)
    h = _conv_im2col_relu_pool(h, w3_ref[...], b3_ref[...])     # (L/8, 128) = (S, E)

    # ---- 16-head self-attention + residual ----
    qkv = jnp.dot(h.astype(bf16), wqkv_ref[...],
                  preferred_element_type=f32) + bqkv_ref[...]    # (S, 3E)
    q = qkv[:, 0:E]
    k = qkv[:, E:2 * E]
    v = qkv[:, 2 * E:3 * E]
    scale = 1.0 / float(D) ** 0.5
    ctx = []
    for hh in range(num_heads):                                 # head_dim = 8: small dots
        lo = hh * D
        qh = q[:, lo:lo + D] * scale
        kh = k[:, lo:lo + D]
        vh = v[:, lo:lo + D]
        sc = jax.lax.dot_general(qh, kh, (((1,), (1,)), ((), ())),
                                 preferred_element_type=f32)     # (S, S)
        p = jnp.exp(sc - jnp.max(sc, axis=-1, keepdims=True))
        p = p * pl.reciprocal(jnp.sum(p, axis=-1, keepdims=True), approx=True)
        ctx.append(jnp.dot(p, vh, preferred_element_type=f32))   # (S, D)
    ctx = jnp.concatenate(ctx, axis=1)                           # (S, E)
    attn_out = jnp.dot(ctx.astype(bf16), wo_ref[...],
                       preferred_element_type=f32) + bo_ref[...]
    y = h + attn_out                                             # residual, (S, E)

    # ---- flatten (seq-major; fc1 weight columns pre-permuted to match) + fc head ----
    flat = jnp.concatenate([y[s:s + 1, :] for s in range(S)], axis=1)      # (1, S*E)
    hfc = jnp.dot(flat.astype(bf16), wfc1_ref[...],
                  preferred_element_type=f32) + bfc1_ref[...]              # (1, 128)
    hfc = jnp.maximum(hfc, 0.0)
    # TODO(synk): Dropout(p=0.4) omitted -- eval/inference identity (no train-mode parity).
    out = jnp.dot(hfc.astype(bf16), wfc2_ref[...],
                  preferred_element_type=f32) + bfc2_ref[...]              # (1, 1)
    o_ref[0] = out.astype(o_ref.dtype)


# ---------------------------------------------------------------------------
# wrapper: parameter repacking (one-time) + pallas_call
# ---------------------------------------------------------------------------
def attention_cnn_forward(x, params, num_heads=16):
    """x: (B, 1, L) NCW like PyTorch. Returns (B, 1)."""
    B, C_in, L = x.shape
    assert C_in == 1 and L % 8 == 0, "expects (B, 1, L) with L a multiple of 8"
    E = 128
    S = L // 8
    f32, bf16 = jnp.float32, jnp.bfloat16

    # channels-last + pre-pad the length for conv1 ('same', K=5 -> pad 2).
    x_pad = jnp.pad(jnp.transpose(x, (0, 2, 1)).astype(f32),
                    ((0, 0), (2, 2), (0, 0)))                               # (B, L+4, 1)

    w1 = jnp.transpose(params["conv1_w"], (2, 1, 0)).astype(f32)            # (5, 1, 32)
    b1 = params["conv1_b"].reshape(1, 32).astype(f32)
    w2 = jnp.transpose(params["conv2_w"], (2, 1, 0)).reshape(96, 64).astype(bf16)
    b2 = params["conv2_b"].reshape(1, 64).astype(f32)
    w3 = jnp.transpose(params["conv3_w"], (2, 1, 0)).reshape(192, 128).astype(bf16)
    b3 = params["conv3_b"].reshape(1, 128).astype(f32)
    wqkv = params["attn_in_w"].T.astype(bf16)                               # (128, 384)
    bqkv = params["attn_in_b"].reshape(1, 3 * E).astype(f32)
    wo = params["attn_out_w"].T.astype(bf16)                                # (128, 128)
    bo = params["attn_out_b"].reshape(1, E).astype(f32)
    # Fold PyTorch's channel-major flatten (index c*S + s) into a one-time column
    # permutation so the kernel can flatten seq-major (index s*E + c) with no transpose.
    wfc1 = jnp.transpose(params["fc1_w"].reshape(128, E, S), (0, 2, 1))
    wfc1 = wfc1.reshape(128, S * E).T.astype(bf16)                          # (S*E, 128)
    bfc1 = params["fc1_b"].reshape(1, 128).astype(f32)
    wfc2 = params["fc2_w"].T.astype(bf16)                                   # (128, 1)
    bfc2 = params["fc2_b"].reshape(1, 1).astype(f32)

    def resident(a):
        nd = a.ndim

        def imap(b):
            return (0,) * nd

        return pl.BlockSpec(a.shape, imap)

    weights = (w1, b1, w2, b2, w3, b3, wqkv, bqkv, wo, bo, wfc1, bfc1, wfc2, bfc2)
    kernel = functools.partial(attention_cnn_kernel, num_heads=num_heads, seq_len=L)
    out = pl.pallas_call(
        kernel,
        out_shape=jax.ShapeDtypeStruct((B, 1, 1), f32),
        grid=(B,),
        in_specs=[pl.BlockSpec((1, L + 4, 1), lambda b: (b, 0, 0))]
                 + [resident(a) for a in weights],
        out_specs=pl.BlockSpec((1, 1, 1), lambda b: (b, 0, 0)),
        compiler_params=pltpu.CompilerParams(
            dimension_semantics=("parallel",),
            vmem_limit_bytes=32 * 1024 * 1024),
    )(x_pad, *weights)
    return out.reshape(B, 1)


# ---------------------------------------------------------------------------
# deterministic params + pure-JAX (f32) reference of the PyTorch forward
# ---------------------------------------------------------------------------
def init_params(key, input_length):
    ks = jax.random.split(key, 14)
    E = 128
    S = input_length // 8

    def rnd(k, shape, fan_in):
        return jax.random.normal(k, shape, dtype=jnp.float32) / jnp.sqrt(float(fan_in))

    return {
        "conv1_w": rnd(ks[0], (32, 1, 5), 1 * 5),
        "conv1_b": rnd(ks[1], (32,), 1 * 5),
        "conv2_w": rnd(ks[2], (64, 32, 3), 32 * 3),
        "conv2_b": rnd(ks[3], (64,), 32 * 3),
        "conv3_w": rnd(ks[4], (128, 64, 3), 64 * 3),
        "conv3_b": rnd(ks[5], (128,), 64 * 3),
        "attn_in_w": rnd(ks[6], (3 * E, E), E),
        "attn_in_b": rnd(ks[7], (3 * E,), E),
        "attn_out_w": rnd(ks[8], (E, E), E),
        "attn_out_b": rnd(ks[9], (E,), E),
        "fc1_w": rnd(ks[10], (E, E * S), E * S),
        "fc1_b": rnd(ks[11], (E,), E * S),
        "fc2_w": rnd(ks[12], (1, E), E),
        "fc2_b": rnd(ks[13], (1,), E),
    }


def reference_forward(x, p, num_heads=16):
    B = x.shape[0]

    def conv1d(h, w, b, pad):
        out = jax.lax.conv_general_dilated(
            h, w, (1,), [(pad, pad)], dimension_numbers=("NCH", "OIH", "NCH"))
        return out + b[None, :, None]

    def pool(h):
        B_, C, L = h.shape
        return jnp.max(h.reshape(B_, C, L // 2, 2), axis=-1)

    h = pool(jax.nn.relu(conv1d(x, p["conv1_w"], p["conv1_b"], 2)))
    h = pool(jax.nn.relu(conv1d(h, p["conv2_w"], p["conv2_b"], 1)))
    h = pool(jax.nn.relu(conv1d(h, p["conv3_w"], p["conv3_b"], 1)))
    xs = jnp.transpose(h, (0, 2, 1))                            # (B, S, E)
    S, E = xs.shape[1], xs.shape[2]
    D = E // num_heads
    qkv = xs @ p["attn_in_w"].T + p["attn_in_b"]
    q, k, v = qkv[..., :E], qkv[..., E:2 * E], qkv[..., 2 * E:]

    def split(t):
        return t.reshape(B, S, num_heads, D).transpose(0, 2, 1, 3)

    qh, kh, vh = split(q), split(k), split(v)
    scores = jnp.einsum("bhsd,bhtd->bhst", qh, kh) / jnp.sqrt(float(D))
    attn = jax.nn.softmax(scores, axis=-1)
    ctx = jnp.einsum("bhst,bhtd->bhsd", attn, vh).transpose(0, 2, 1, 3).reshape(B, S, E)
    y = xs + (ctx @ p["attn_out_w"].T + p["attn_out_b"])
    flat = jnp.transpose(y, (0, 2, 1)).reshape(B, -1)           # channel-major flatten
    h1 = jax.nn.relu(flat @ p["fc1_w"].T + p["fc1_b"])
    return h1 @ p["fc2_w"].T + p["fc2_b"]


if __name__ == "__main__":
    key = jax.random.PRNGKey(0)
    input_length = 64            # small L (PyTorch default is 448); S = L // 8 = 8
    batch = 4
    pkey, xkey = jax.random.split(key)
    params = init_params(pkey, input_length)
    x = jax.random.normal(xkey, (batch, 1, input_length), dtype=jnp.float32)

    fwd = jax.jit(attention_cnn_forward)
    out = jax.block_until_ready(fwd(x, params))
    assert out.shape == (batch, 1), out.shape

    ref = reference_forward(x, params)
    # bf16 matmul operands (f32 accumulation) -> slightly looser tolerance than pure f32.
    assert bool(jnp.allclose(out, ref, rtol=3e-2, atol=3e-2)), (out, ref)
    print("KERNEL_OK")
</pallas_src>

<mosaic_0001>
module attributes {stable_mosaic.version = 11 : i64} {
  func.func @attention_cnn_kernel(%arg0: i32, %arg1: memref<1x68x1xf32, #tpu.memory_space<vmem>>, %arg2: memref<5x1x32xf32, #tpu.memory_space<vmem>>, %arg3: memref<1x32xf32, #tpu.memory_space<vmem>>, %arg4: memref<96x64xbf16, #tpu.memory_space<vmem>>, %arg5: memref<1x64xf32, #tpu.memory_space<vmem>>, %arg6: memref<192x128xbf16, #tpu.memory_space<vmem>>, %arg7: memref<1x128xf32, #tpu.memory_space<vmem>>, %arg8: memref<128x384xbf16, #tpu.memory_space<vmem>>, %arg9: memref<1x384xf32, #tpu.memory_space<vmem>>, %arg10: memref<128x128xbf16, #tpu.memory_space<vmem>>, %arg11: memref<1x128xf32, #tpu.memory_space<vmem>>, %arg12: memref<1024x128xbf16, #tpu.memory_space<vmem>>, %arg13: memref<1x128xf32, #tpu.memory_space<vmem>>, %arg14: memref<128x1xbf16, #tpu.memory_space<vmem>>, %arg15: memref<1x1xf32, #tpu.memory_space<vmem>>, %arg16: memref<1x1x1xf32, #tpu.memory_space<vmem>>) attributes {dimension_semantics = [#tpu.dimension_semantics<parallel>], iteration_bounds = array<i64: 4>, scalar_prefetch = 0 : i64, scratch_operands = 0 : i64, tpu.core_type = #tpu.core_type<tc>, window_params = [{transform_indices = @transform_0, window_bounds = array<i64: 1, 68, 1>}, {pipeline_mode = #tpu.pipeline_mode<synchronous>, transform_indices = @transform_1, window_bounds = array<i64: 5, 1, 32>}, {pipeline_mode = #tpu.pipeline_mode<synchronous>, transform_indices = @transform_2, window_bounds = array<i64: 1, 32>}, {pipeline_mode = #tpu.pipeline_mode<synchronous>, transform_indices = @transform_3, window_bounds = array<i64: 96, 64>}, {pipeline_mode = #tpu.pipeline_mode<synchronous>, transform_indices = @transform_4, window_bounds = array<i64: 1, 64>}, {pipeline_mode = #tpu.pipeline_mode<synchronous>, transform_indices = @transform_5, window_bounds = array<i64: 192, 128>}, {pipeline_mode = #tpu.pipeline_mode<synchronous>, transform_indices = @transform_6, window_bounds = array<i64: 1, 128>}, {pipeline_mode = #tpu.pipeline_mode<synchronous>, transform_indices = @transform_7, window_bounds = array<i64: 128, 384>}, {pipeline_mode = #tpu.pipeline_mode<synchronous>, transform_indices = @transform_8, window_bounds = array<i64: 1, 384>}, {pipeline_mode = #tpu.pipeline_mode<synchronous>, transform_indices = @transform_9, window_bounds = array<i64: 128, 128>}, {pipeline_mode = #tpu.pipeline_mode<synchronous>, transform_indices = @transform_10, window_bounds = array<i64: 1, 128>}, {pipeline_mode = #tpu.pipeline_mode<synchronous>, transform_indices = @transform_11, window_bounds = array<i64: 1024, 128>}, {pipeline_mode = #tpu.pipeline_mode<synchronous>, transform_indices = @transform_12, window_bounds = array<i64: 1, 128>}, {pipeline_mode = #tpu.pipeline_mode<synchronous>, transform_indices = @transform_13, window_bounds = array<i64: 128, 1>}, {pipeline_mode = #tpu.pipeline_mode<synchronous>, transform_indices = @transform_14, window_bounds = array<i64: 1, 1>}, {transform_indices = @transform_15, window_bounds = array<i64: 1, 1, 1>}]} {
    %c0 = arith.constant 0 : index
    %c0_0 = arith.constant 0 : index
    %c0_1 = arith.constant 0 : index
    %0 = vector.load %arg1[%c0, %c0_0, %c0_1] : memref<1x68x1xf32, #tpu.memory_space<vmem>>, vector<1x68x1xf32>
    %1 = vector.shape_cast %0 : vector<1x68x1xf32> to vector<68x1xf32>
    %cst = arith.constant 0.000000e+00 : f32
    %2 = vector.broadcast %cst : f32 to vector<64x32xf32>
    %3 = vector.extract_strided_slice %1 {offsets = [0, 0], sizes = [64, 1], strides = [1, 1]} : vector<68x1xf32> to vector<64x1xf32>
    %c0_2 = arith.constant 0 : index
    %c0_3 = arith.constant 0 : index
    %c0_4 = arith.constant 0 : index
    %4 = vector.load %arg2[%c0_2, %c0_3, %c0_4] : memref<5x1x32xf32, #tpu.memory_space<vmem>>, vector<1x1x32xf32>
    %5 = vector.shape_cast %4 : vector<1x1x32xf32> to vector<1x32xf32>
    %6 = vector.broadcast %3 : vector<64x1xf32> to vector<64x32xf32>
    %7 = vector.broadcast %5 : vector<1x32xf32> to vector<64x32xf32>
    %8 = arith.mulf %6, %7 : vector<64x32xf32>
    %9 = arith.addf %2, %8 : vector<64x32xf32>
    %10 = vector.extract_strided_slice %1 {offsets = [1, 0], sizes = [64, 1], strides = [1, 1]} : vector<68x1xf32> to vector<64x1xf32>
    %c1 = arith.constant 1 : index
    %c0_5 = arith.constant 0 : index
    %c0_6 = arith.constant 0 : index
    %11 = vector.load %arg2[%c1, %c0_5, %c0_6] : memref<5x1x32xf32, #tpu.memory_space<vmem>>, vector<1x1x32xf32>
    %12 = vector.shape_cast %11 : vector<1x1x32xf32> to vector<1x32xf32>
    %13 = vector.broadcast %10 : vector<64x1xf32> to vector<64x32xf32>
    %14 = vector.broadcast %12 : vector<1x32xf32> to vector<64x32xf32>
    %15 = arith.mulf %13, %14 : vector<64x32xf32>
    %16 = arith.addf %9, %15 : vector<64x32xf32>
    %17 = vector.extract_strided_slice %1 {offsets = [2, 0], sizes = [64, 1], strides = [1, 1]} : vector<68x1xf32> to vector<64x1xf32>
    %c2 = arith.constant 2 : index
    %c0_7 = arith.constant 0 : index
    %c0_8 = arith.constant 0 : index
    %18 = vector.load %arg2[%c2, %c0_7, %c0_8] : memref<5x1x32xf32, #tpu.memory_space<vmem>>, vector<1x1x32xf32>
    %19 = vector.shape_cast %18 : vector<1x1x32xf32> to vector<1x32xf32>
    %20 = vector.broadcast %17 : vector<64x1xf32> to vector<64x32xf32>
    %21 = vector.broadcast %19 : vector<1x32xf32> to vector<64x32xf32>
    %22 = arith.mulf %20, %21 : vector<64x32xf32>
    %23 = arith.addf %16, %22 : vector<64x32xf32>
    %24 = vector.extract_strided_slice %1 {offsets = [3, 0], sizes = [64, 1], strides = [1, 1]} : vector<68x1xf32> to vector<64x1xf32>
    %c3 = arith.constant 3 : index
    %c0_9 = arith.constant 0 : index
    %c0_10 = arith.constant 0 : index
    %25 = vector.load %arg2[%c3, %c0_9, %c0_10] : memref<5x1x32xf32, #tpu.memory_space<vmem>>, vector<1x1x32xf32>
    %26 = vector.shape_cast %25 : vector<1x1x32xf32> to vector<1x32xf32>
    %27 = vector.broadcast %24 : vector<64x1xf32> to vector<64x32xf32>
    %28 = vector.broadcast %26 : vector<1x32xf32> to vector<64x32xf32>
    %29 = arith.mulf %27, %28 : vector<64x32xf32>
    %30 = arith.addf %23, %29 : vector<64x32xf32>
    %31 = vector.extract_strided_slice %1 {offsets = [4, 0], sizes = [64, 1], strides = [1, 1]} : vector<68x1xf32> to vector<64x1xf32>
    %c4 = arith.constant 4 : index
    %c0_11 = arith.constant 0 : index
    %c0_12 = arith.constant 0 : index
    %32 = vector.load %arg2[%c4, %c0_11, %c0_12] : memref<5x1x32xf32, #tpu.memory_space<vmem>>, vector<1x1x32xf32>
    %33 = vector.shape_cast %32 : vector<1x1x32xf32> to vector<1x32xf32>
    %34 = vector.broadcast %31 : vector<64x1xf32> to vector<64x32xf32>
    %35 = vector.broadcast %33 : vector<1x32xf32> to vector<64x32xf32>
    %36 = arith.mulf %34, %35 : vector<64x32xf32>
    %37 = arith.addf %30, %36 : vector<64x32xf32>
    %c0_13 = arith.constant 0 : index
    %c0_14 = arith.constant 0 : index
    %38 = vector.load %arg3[%c0_13, %c0_14] : memref<1x32xf32, #tpu.memory_space<vmem>>, vector<1x32xf32>
    %39 = vector.broadcast %38 : vector<1x32xf32> to vector<64x32xf32>
    %40 = arith.addf %37, %39 : vector<64x32xf32>
    %cst_15 = arith.constant 0.000000e+00 : f32
    %41 = vector.broadcast %cst_15 : f32 to vector<64x32xf32>
    %42 = arith.maximumf %40, %41 : vector<64x32xf32>
    %43 = vector.shape_cast %42 : vector<64x32xf32> to vector<32x2x32xf32>
    %cst_16 = arith.constant dense<0xFF800000> : vector<32x32xf32>
    %44 = vector.multi_reduction <maximumf>, %43, %cst_16 [1] : vector<32x2x32xf32> to vector<32x32xf32>
    %c0_17 = arith.constant 0 : index
    %c0_18 = arith.constant 0 : index
    %45 = vector.load %arg4[%c0_17, %c0_18] : memref<96x64xbf16, #tpu.memory_space<vmem>>, vector<96x64xbf16>
    %c0_19 = arith.constant 0 : index
    %c0_20 = arith.constant 0 : index
    %46 = vector.load %arg5[%c0_19, %c0_20] : memref<1x64xf32, #tpu.memory_space<vmem>>, vector<1x64xf32>
    %cst_21 = arith.constant 0.000000e+00 : f32
    %47 = vector.broadcast %cst_21 : f32 to vector<1x32xf32>
    %48 = tpu.concatenate %47, %44, %47 in 0 : vector<1x32xf32>, vector<32x32xf32>, vector<1x32xf32> -> vector<34x32xf32>
    %49 = vector.extract_strided_slice %48 {offsets = [0, 0], sizes = [32, 32], strides = [1, 1]} : vector<34x32xf32> to vector<32x32xf32>
    %50 = vector.extract_strided_slice %48 {offsets = [1, 0], sizes = [32, 32], strides = [1, 1]} : vector<34x32xf32> to vector<32x32xf32>
    %51 = vector.extract_strided_slice %48 {offsets = [2, 0], sizes = [32, 32], strides = [1, 1]} : vector<34x32xf32> to vector<32x32xf32>
    %52 = tpu.concatenate %49, %50, %51 in 1 : vector<32x32xf32>, vector<32x32xf32>, vector<32x32xf32> -> vector<32x96xf32>
    %53 = arith.truncf %52 : vector<32x96xf32> to vector<32x96xbf16>
    %cst_22 = arith.constant dense<0.000000e+00> : vector<32x64xf32>
    %54 = tpu.matmul %53, %45, %cst_22 {dimension_numbers = #tpu.dot_dimension_numbers<[1], [0], [0], [1], [0, 0, 1, 1], [], []>} : vector<32x96xbf16>, vector<96x64xbf16>, vector<32x64xf32> -> vector<32x64xf32>
    %55 = vector.broadcast %46 : vector<1x64xf32> to vector<32x64xf32>
    %56 = arith.addf %54, %55 : vector<32x64xf32>
    %cst_23 = arith.constant 0.000000e+00 : f32
    %57 = vector.broadcast %cst_23 : f32 to vector<32x64xf32>
    %58 = arith.maximumf %56, %57 : vector<32x64xf32>
    %59 = vector.shape_cast %58 : vector<32x64xf32> to vector<16x2x64xf32>
    %cst_24 = arith.constant dense<0xFF800000> : vector<16x64xf32>
    %60 = vector.multi_reduction <maximumf>, %59, %cst_24 [1] : vector<16x2x64xf32> to vector<16x64xf32>
    %c0_25 = arith.constant 0 : index
    %c0_26 = arith.constant 0 : index
    %61 = vector.load %arg6[%c0_25, %c0_26] : memref<192x128xbf16, #tpu.memory_space<vmem>>, vector<192x128xbf16>
    %c0_27 = arith.constant 0 : index
    %c0_28 = arith.constant 0 : index
    %62 = vector.load %arg7[%c0_27, %c0_28] : memref<1x128xf32, #tpu.memory_space<vmem>>, vector<1x128xf32>
    %cst_29 = arith.constant 0.000000e+00 : f32
    %63 = vector.broadcast %cst_29 : f32 to vector<1x64xf32>
    %64 = tpu.concatenate %63, %60, %63 in 0 : vector<1x64xf32>, vector<16x64xf32>, vector<1x64xf32> -> vector<18x64xf32>
    %65 = vector.extract_strided_slice %64 {offsets = [0, 0], sizes = [16, 64], strides = [1, 1]} : vector<18x64xf32> to vector<16x64xf32>
    %66 = vector.extract_strided_slice %64 {offsets = [1, 0], sizes = [16, 64], strides = [1, 1]} : vector<18x64xf32> to vector<16x64xf32>
    %67 = vector.extract_strided_slice %64 {offsets = [2, 0], sizes = [16, 64], strides = [1, 1]} : vector<18x64xf32> to vector<16x64xf32>
    %68 = tpu.concatenate %65, %66, %67 in 1 : vector<16x64xf32>, vector<16x64xf32>, vector<16x64xf32> -> vector<16x192xf32>
    %69 = arith.truncf %68 : vector<16x192xf32> to vector<16x192xbf16>
    %cst_30 = arith.constant dense<0.000000e+00> : vector<16x128xf32>
    %70 = tpu.matmul %69, %61, %cst_30 {dimension_numbers = #tpu.dot_dimension_numbers<[1], [0], [0], [1], [0, 0, 1, 1], [], []>} : vector<16x192xbf16>, vector<192x128xbf16>, vector<16x128xf32> -> vector<16x128xf32>
    %71 = vector.broadcast %62 : vector<1x128xf32> to vector<16x128xf32>
    %72 = arith.addf %70, %71 : vector<16x128xf32>
    %cst_31 = arith.constant 0.000000e+00 : f32
    %73 = vector.broadcast %cst_31 : f32 to vector<16x128xf32>
    %74 = arith.maximumf %72, %73 : vector<16x128xf32>
    %75 = vector.shape_cast %74 : vector<16x128xf32> to vector<8x2x128xf32>
    %cst_32 = arith.constant dense<0xFF800000> : vector<8x128xf32>
    %76 = vector.multi_reduction <maximumf>, %75, %cst_32 [1] : vector<8x2x128xf32> to vector<8x128xf32>
    %77 = arith.truncf %76 : vector<8x128xf32> to vector<8x128xbf16>
    %c0_33 = arith.constant 0 : index
    %c0_34 = arith.constant 0 : index
    %78 = vector.load %arg8[%c0_33, %c0_34] : memref<128x384xbf16, #tpu.memory_space<vmem>>, vector<128x384xbf16>
    %cst_35 = arith.constant dense<0.000000e+00> : vector<8x384xf32>
    %79 = tpu.matmul %77, %78, %cst_35 {dimension_numbers = #tpu.dot_dimension_numbers<[1], [0], [0], [1], [0, 0, 1, 1], [], []>} : vector<8x128xbf16>, vector<128x384xbf16>, vector<8x384xf32> -> vector<8x384xf32>
    %c0_36 = arith.constant 0 : index
    %c0_37 = arith.constant 0 : index
    %80 = vector.load %arg9[%c0_36, %c0_37] : memref<1x384xf32, #tpu.memory_space<vmem>>, vector<1x384xf32>
    %81 = vector.broadcast %80 : vector<1x384xf32> to vector<8x384xf32>
    %82 = arith.addf %79, %81 : vector<8x384xf32>
    %83 = vector.extract_strided_slice %82 {offsets = [0, 0], sizes = [8, 128], strides = [1, 1]} : vector<8x384xf32> to vector<8x128xf32>
    %84 = vector.extract_strided_slice %82 {offsets = [0, 128], sizes = [8, 128], strides = [1, 1]} : vector<8x384xf32> to vector<8x128xf32>
    %85 = vector.extract_strided_slice %82 {offsets = [0, 256], sizes = [8, 128], strides = [1, 1]} : vector<8x384xf32> to vector<8x128xf32>
    %86 = vector.extract_strided_slice %83 {offsets = [0, 0], sizes = [8, 8], strides = [1, 1]} : vector<8x128xf32> to vector<8x8xf32>
    %cst_38 = arith.constant 0.353553385 : f32
    %87 = vector.broadcast %cst_38 : f32 to vector<8x8xf32>
    %88 = arith.mulf %86, %87 : vector<8x8xf32>
    %89 = vector.extract_strided_slice %84 {offsets = [0, 0], sizes = [8, 8], strides = [1, 1]} : vector<8x128xf32> to vector<8x8xf32>
    %90 = vector.extract_strided_slice %85 {offsets = [0, 0], sizes = [8, 8], strides = [1, 1]} : vector<8x128xf32> to vector<8x8xf32>
    %cst_39 = arith.constant dense<0.000000e+00> : vector<8x8xf32>
    %91 = tpu.matmul %88, %89, %cst_39 {dimension_numbers = #tpu.dot_dimension_numbers<[1], [1], [0], [0], [0, 0, 1, 0], [], []>} : vector<8x8xf32>, vector<8x8xf32>, vector<8x8xf32> -> vector<8x8xf32>
    %cst_40 = arith.constant dense<0xFF800000> : vector<8xf32>
    %92 = vector.multi_reduction <maximumf>, %91, %cst_40 [1] : vector<8x8xf32> to vector<8xf32>
    %93 = vector.shape_cast %92 : vector<8xf32> to vector<8x1xf32>
    %94 = vector.broadcast %93 : vector<8x1xf32> to vector<8x8xf32>
    %95 = arith.subf %91, %94 : vector<8x8xf32>
    %96 = math.exp %95 : vector<8x8xf32>
    %cst_41 = arith.constant dense<0.000000e+00> : vector<8xf32>
    %97 = vector.multi_reduction <add>, %96, %cst_41 [1] : vector<8x8xf32> to vector<8xf32>
    %98 = vector.shape_cast %97 : vector<8xf32> to vector<8x1xf32>
    %99 = tpu.reciprocal %98 {approx = true} : vector<8x1xf32> -> vector<8x1xf32>
    %100 = vector.broadcast %99 : vector<8x1xf32> to vector<8x8xf32>
    %101 = arith.mulf %96, %100 : vector<8x8xf32>
    %cst_42 = arith.constant dense<0.000000e+00> : vector<8x8xf32>
    %102 = tpu.matmul %101, %90, %cst_42 {dimension_numbers = #tpu.dot_dimension_numbers<[1], [0], [0], [1], [0, 0, 1, 1], [], []>} : vector<8x8xf32>, vector<8x8xf32>, vector<8x8xf32> -> vector<8x8xf32>
    %103 = vector.extract_strided_slice %83 {offsets = [0, 8], sizes = [8, 8], strides = [1, 1]} : vector<8x128xf32> to vector<8x8xf32>
    %cst_43 = arith.constant 0.353553385 : f32
    %104 = vector.broadcast %cst_43 : f32 to vector<8x8xf32>
    %105 = arith.mulf %103, %104 : vector<8x8xf32>
    %106 = vector.extract_strided_slice %84 {offsets = [0, 8], sizes = [8, 8], strides = [1, 1]} : vector<8x128xf32> to vector<8x8xf32>
    %107 = vector.extract_strided_slice %85 {offsets = [0, 8], sizes = [8, 8], strides = [1, 1]} : vector<8x128xf32> to vector<8x8xf32>
    %cst_44 = arith.constant dense<0.000000e+00> : vector<8x8xf32>
    %108 = tpu.matmul %105, %106, %cst_44 {dimension_numbers = #tpu.dot_dimension_numbers<[1], [1], [0], [0], [0, 0, 1, 0], [], []>} : vector<8x8xf32>, vector<8x8xf32>, vector<8x8xf32> -> vector<8x8xf32>
    %cst_45 = arith.constant dense<0xFF800000> : vector<8xf32>
    %109 = vector.multi_reduction <maximumf>, %108, %cst_45 [1] : vector<8x8xf32> to vector<8xf32>
    %110 = vector.shape_cast %109 : vector<8xf32> to vector<8x1xf32>
    %111 = vector.broadcast %110 : vector<8x1xf32> to vector<8x8xf32>
    %112 = arith.subf %108, %111 : vector<8x8xf32>
    %113 = math.exp %112 : vector<8x8xf32>
    %cst_46 = arith.constant dense<0.000000e+00> : vector<8xf32>
    %114 = vector.multi_reduction <add>, %113, %cst_46 [1] : vector<8x8xf32> to vector<8xf32>
    %115 = vector.shape_cast %114 : vector<8xf32> to vector<8x1xf32>
    %116 = tpu.reciprocal %115 {approx = true} : vector<8x1xf32> -> vector<8x1xf32>
    %117 = vector.broadcast %116 : vector<8x1xf32> to vector<8x8xf32>
    %118 = arith.mulf %113, %117 : vector<8x8xf32>
    %cst_47 = arith.constant dense<0.000000e+00> : vector<8x8xf32>
    %119 = tpu.matmul %118, %107, %cst_47 {dimension_numbers = #tpu.dot_dimension_numbers<[1], [0], [0], [1], [0, 0, 1, 1], [], []>} : vector<8x8xf32>, vector<8x8xf32>, vector<8x8xf32> -> vector<8x8xf32>
    %120 = vector.extract_strided_slice %83 {offsets = [0, 16], sizes = [8, 8], strides = [1, 1]} : vector<8x128xf32> to vector<8x8xf32>
    %cst_48 = arith.constant 0.353553385 : f32
    %121 = vector.broadcast %cst_48 : f32 to vector<8x8xf32>
    %122 = arith.mulf %120, %121 : vector<8x8xf32>
    %123 = vector.extract_strided_slice %84 {offsets = [0, 16], sizes = [8, 8], strides = [1, 1]} : vector<8x128xf32> to vector<8x8xf32>
    %124 = vector.extract_strided_slice %85 {offsets = [0, 16], sizes = [8, 8], strides = [1, 1]} : vector<8x128xf32> to vector<8x8xf32>
    %cst_49 = arith.constant dense<0.000000e+00> : vector<8x8xf32>
    %125 = tpu.matmul %122, %123, %cst_49 {dimension_numbers = #tpu.dot_dimension_numbers<[1], [1], [0], [0], [0, 0, 1, 0], [], []>} : vector<8x8xf32>, vector<8x8xf32>, vector<8x8xf32> -> vector<8x8xf32>
    %cst_50 = arith.constant dense<0xFF800000> : vector<8xf32>
    %126 = vector.multi_reduction <maximumf>, %125, %cst_50 [1] : vector<8x8xf32> to vector<8xf32>
    %127 = vector.shape_cast %126 : vector<8xf32> to vector<8x1xf32>
    %128 = vector.broadcast %127 : vector<8x1xf32> to vector<8x8xf32>
    %129 = arith.subf %125, %128 : vector<8x8xf32>
    %130 = math.exp %129 : vector<8x8xf32>
    %cst_51 = arith.constant dense<0.000000e+00> : vector<8xf32>
    %131 = vector.multi_reduction <add>, %130, %cst_51 [1] : vector<8x8xf32> to vector<8xf32>
    %132 = vector.shape_cast %131 : vector<8xf32> to vector<8x1xf32>
    %133 = tpu.reciprocal %132 {approx = true} : vector<8x1xf32> -> vector<8x1xf32>
    %134 = vector.broadcast %133 : vector<8x1xf32> to vector<8x8xf32>
    %135 = arith.mulf %130, %134 : vector<8x8xf32>
    %cst_52 = arith.constant dense<0.000000e+00> : vector<8x8xf32>
    %136 = tpu.matmul %135, %124, %cst_52 {dimension_numbers = #tpu.dot_dimension_numbers<[1], [0], [0], [1], [0, 0, 1, 1], [], []>} : vector<8x8xf32>, vector<8x8xf32>, vector<8x8xf32> -> vector<8x8xf32>
    %137 = vector.extract_strided_slice %83 {offsets = [0, 24], sizes = [8, 8], strides = [1, 1]} : vector<8x128xf32> to vector<8x8xf32>
    %cst_53 = arith.constant 0.353553385 : f32
    %138 = vector.broadcast %cst_53 : f32 to vector<8x8xf32>
    %139 = arith.mulf %137, %138 : vector<8x8xf32>
    %140 = vector.extract_strided_slice %84 {offsets = [0, 24], sizes = [8, 8], strides = [1, 1]} : vector<8x128xf32> to vector<8x8xf32>
    %141 = vector.extract_strided_slice %85 {offsets = [0, 24], sizes = [8, 8], strides = [1, 1]} : vector<8x128xf32> to vector<8x8xf32>
    %cst_54 = arith.constant dense<0.000000e+00> : vector<8x8xf32>
    %142 = tpu.matmul %139, %140, %cst_54 {dimension_numbers = #tpu.dot_dimension_numbers<[1], [1], [0], [0], [0, 0, 1, 0], [], []>} : vector<8x8xf32>, vector<8x8xf32>, vector<8x8xf32> -> vector<8x8xf32>
    %cst_55 = arith.constant dense<0xFF800000> : vector<8xf32>
    %143 = vector.multi_reduction <maximumf>, %142, %cst_55 [1] : vector<8x8xf32> to vector<8xf32>
    %144 = vector.shape_cast %143 : vector<8xf32> to vector<8x1xf32>
    %145 = vector.broadcast %144 : vector<8x1xf32> to vector<8x8xf32>
    %146 = arith.subf %142, %145 : vector<8x8xf32>
    %147 = math.exp %146 : vector<8x8xf32>
    %cst_56 = arith.constant dense<0.000000e+00> : vector<8xf32>
    %148 = vector.multi_reduction <add>, %147, %cst_56 [1] : vector<8x8xf32> to vector<8xf32>
    %149 = vector.shape_cast %148 : vector<8xf32> to vector<8x1xf32>
    %150 = tpu.reciprocal %149 {approx = true} : vector<8x1xf32> -> vector<8x1xf32>
    %151 = vector.broadcast %150 : vector<8x1xf32> to vector<8x8xf32>
    %152 = arith.mulf %147, %151 : vector<8x8xf32>
    %cst_57 = arith.constant dense<0.000000e+00> : vector<8x8xf32>
    %153 = tpu.matmul %152, %141, %cst_57 {dimension_numbers = #tpu.dot_dimension_numbers<[1], [0], [0], [1], [0, 0, 1, 1], [], []>} : vector<8x8xf32>, vector<8x8xf32>, vector<8x8xf32> -> vector<8x8xf32>
    %154 = vector.extract_strided_slice %83 {offsets = [0, 32], sizes = [8, 8], strides = [1, 1]} : vector<8x128xf32> to vector<8x8xf32>
    %cst_58 = arith.constant 0.353553385 : f32
    %155 = vector.broadcast %cst_58 : f32 to vector<8x8xf32>
    %156 = arith.mulf %154, %155 : vector<8x8xf32>
    %157 = vector.extract_strided_slice %84 {offsets = [0, 32], sizes = [8, 8], strides = [1, 1]} : vector<8x128xf32> to vector<8x8xf32>
    %158 = vector.extract_strided_slice %85 {offsets = [0, 32], sizes = [8, 8], strides = [1, 1]} : vector<8x128xf32> to vector<8x8xf32>
    %cst_59 = arith.constant dense<0.000000e+00> : vector<8x8xf32>
    %159 = tpu.matmul %156, %157, %cst_59 {dimension_numbers = #tpu.dot_dimension_numbers<[1], [1], [0], [0], [0, 0, 1, 0], [], []>} : vector<8x8xf32>, vector<8x8xf32>, vector<8x8xf32> -> vector<8x8xf32>
    %cst_60 = arith.constant dense<0xFF800000> : vector<8xf32>
    %160 = vector.multi_reduction <maximumf>, %159, %cst_60 [1] : vector<8x8xf32> to vector<8xf32>
    %161 = vector.shape_cast %160 : vector<8xf32> to vector<8x1xf32>
    %162 = vector.broadcast %161 : vector<8x1xf32> to vector<8x8xf32>
    %163 = arith.subf %159, %162 : vector<8x8xf32>
    %164 = math.exp %163 : vector<8x8xf32>
    %cst_61 = arith.constant dense<0.000000e+00> : vector<8xf32>
    %165 = vector.multi_reduction <add>, %164, %cst_61 [1] : vector<8x8xf32> to vector<8xf32>
    %166 = vector.shape_cast %165 : vector<8xf32> to vector<8x1xf32>
    %167 = tpu.reciprocal %166 {approx = true} : vector<8x1xf32> -> vector<8x1xf32>
    %168 = vector.broadcast %167 : vector<8x1xf32> to vector<8x8xf32>
    %169 = arith.mulf %164, %168 : vector<8x8xf32>
    %cst_62 = arith.constant dense<0.000000e+00> : vector<8x8xf32>
    %170 = tpu.matmul %169, %158, %cst_62 {dimension_numbers = #tpu.dot_dimension_numbers<[1], [0], [0], [1], [0, 0, 1, 1], [], []>} : vector<8x8xf32>, vector<8x8xf32>, vector<8x8xf32> -> vector<8x8xf32>
    %171 = vector.extract_strided_slice %83 {offsets = [0, 40], sizes = [8, 8], strides = [1, 1]} : vector<8x128xf32> to vector<8x8xf32>
    %cst_63 = arith.constant 0.353553385 : f32
    %172 = vector.broadcast %cst_63 : f32 to vector<8x8xf32>
    %173 = arith.mulf %171, %172 : vector<8x8xf32>
    %174 = vector.extract_strided_slice %84 {offsets = [0, 40], sizes = [8, 8], strides = [1, 1]} : vector<8x128xf32> to vector<8x8xf32>
    %175 = vector.extract_strided_slice %85 {offsets = [0, 40], sizes = [8, 8], strides = [1, 1]} : vector<8x128xf32> to vector<8x8xf32>
    %cst_64 = arith.constant dense<0.000000e+00> : vector<8x8xf32>
    %176 = tpu.matmul %173, %174, %cst_64 {dimension_numbers = #tpu.dot_dimension_numbers<[1], [1], [0], [0], [0, 0, 1, 0], [], []>} : vector<8x8xf32>, vector<8x8xf32>, vector<8x8xf32> -> vector<8x8xf32>
    %cst_65 = arith.constant dense<0xFF800000> : vector<8xf32>
    %177 = vector.multi_reduction <maximumf>, %176, %cst_65 [1] : vector<8x8xf32> to vector<8xf32>
    %178 = vector.shape_cast %177 : vector<8xf32> to vector<8x1xf32>
    %179 = vector.broadcast %178 : vector<8x1xf32> to vector<8x8xf32>
    %180 = arith.subf %176, %179 : vector<8x8xf32>
    %181 = math.exp %180 : vector<8x8xf32>
    %cst_66 = arith.constant dense<0.000000e+00> : vector<8xf32>
    %182 = vector.multi_reduction <add>, %181, %cst_66 [1] : vector<8x8xf32> to vector<8xf32>
    %183 = vector.shape_cast %182 : vector<8xf32> to vector<8x1xf32>
    %184 = tpu.reciprocal %183 {approx = true} : vector<8x1xf32> -> vector<8x1xf32>
    %185 = vector.broadcast %184 : vector<8x1xf32> to vector<8x8xf32>
    %186 = arith.mulf %181, %185 : vector<8x8xf32>
    %cst_67 = arith.constant dense<0.000000e+00> : vector<8x8xf32>
    %187 = tpu.matmul %186, %175, %cst_67 {dimension_numbers = #tpu.dot_dimension_numbers<[1], [0], [0], [1], [0, 0, 1, 1], [], []>} : vector<8x8xf32>, vector<8x8xf32>, vector<8x8xf32> -> vector<8x8xf32>
    %188 = vector.extract_strided_slice %83 {offsets = [0, 48], sizes = [8, 8], strides = [1, 1]} : vector<8x128xf32> to vector<8x8xf32>
    %cst_68 = arith.constant 0.353553385 : f32
    %189 = vector.broadcast %cst_68 : f32 to vector<8x8xf32>
    %190 = arith.mulf %188, %189 : vector<8x8xf32>
    %191 = vector.extract_strided_slice %84 {offsets = [0, 48], sizes = [8, 8], strides = [1, 1]} : vector<8x128xf32> to vector<8x8xf32>
    %192 = vector.extract_strided_slice %85 {offsets = [0, 48], sizes = [8, 8], strides = [1, 1]} : vector<8x128xf32> to vector<8x8xf32>
    %cst_69 = arith.constant dense<0.000000e+00> : vector<8x8xf32>
    %193 = tpu.matmul %190, %191, %cst_69 {dimension_numbers = #tpu.dot_dimension_numbers<[1], [1], [0], [0], [0, 0, 1, 0], [], []>} : vector<8x8xf32>, vector<8x8xf32>, vector<8x8xf32> -> vector<8x8xf32>
    %cst_70 = arith.constant dense<0xFF800000> : vector<8xf32>
    %194 = vector.multi_reduction <maximumf>, %193, %cst_70 [1] : vector<8x8xf32> to vector<8xf32>
    %195 = vector.shape_cast %194 : vector<8xf32> to vector<8x1xf32>
    %196 = vector.broadcast %195 : vector<8x1xf32> to vector<8x8xf32>
    %197 = arith.subf %193, %196 : vector<8x8xf32>
    %198 = math.exp %197 : vector<8x8xf32>
    %cst_71 = arith.constant dense<0.000000e+00> : vector<8xf32>
    %199 = vector.multi_reduction <add>, %198, %cst_71 [1] : vector<8x8xf32> to vector<8xf32>
    %200 = vector.shape_cast %199 : vector<8xf32> to vector<8x1xf32>
    %201 = tpu.reciprocal %200 {approx = true} : vector<8x1xf32> -> vector<8x1xf32>
    %202 = vector.broadcast %201 : vector<8x1xf32> to vector<8x8xf32>
    %203 = arith.mulf %198, %202 : vector<8x8xf32>
    %cst_72 = arith.constant dense<0.000000e+00> : vector<8x8xf32>
    %204 = tpu.matmul %203, %192, %cst_72 {dimension_numbers = #tpu.dot_dimension_numbers<[1], [0], [0], [1], [0, 0, 1, 1], [], []>} : vector<8x8xf32>, vector<8x8xf32>, vector<8x8xf32> -> vector<8x8xf32>
    %205 = vector.extract_strided_slice %83 {offsets = [0, 56], sizes = [8, 8], strides = [1, 1]} : vector<8x128xf32> to vector<8x8xf32>
    %cst_73 = arith.constant 0.353553385 : f32
    %206 = vector.broadcast %cst_73 : f32 to vector<8x8xf32>
    %207 = arith.mulf %205, %206 : vector<8x8xf32>
    %208 = vector.extract_strided_slice %84 {offsets = [0, 56], sizes = [8, 8], strides = [1, 1]} : vector<8x128xf32> to vector<8x8xf32>
    %209 = vector.extract_strided_slice %85 {offsets = [0, 56], sizes = [8, 8], strides = [1, 1]} : vector<8x128xf32> to vector<8x8xf32>
    %cst_74 = arith.constant dense<0.000000e+00> : vector<8x8xf32>
    %210 = tpu.matmul %207, %208, %cst_74 {dimension_numbers = #tpu.dot_dimension_numbers<[1], [1], [0], [0], [0, 0, 1, 0], [], []>} : vector<8x8xf32>, vector<8x8xf32>, vector<8x8xf32> -> vector<8x8xf32>
    %cst_75 = arith.constant dense<0xFF800000> : vector<8xf32>
    %211 = vector.multi_reduction <maximumf>, %210, %cst_75 [1] : vector<8x8xf32> to vector<8xf32>
    %212 = vector.shape_cast %211 : vector<8xf32> to vector<8x1xf32>
    %213 = vector.broadcast %212 : vector<8x1xf32> to vector<8x8xf32>
    %214 = arith.subf %210, %213 : vector<8x8xf32>
    %215 = math.exp %214 : vector<8x8xf32>
    %cst_76 = arith.constant dense<0.000000e+00> : vector<8xf32>
    %216 = vector.multi_reduction <add>, %215, %cst_76 [1] : vector<8x8xf32> to vector<8xf32>
    %217 = vector.shape_cast %216 : vector<8xf32> to vector<8x1xf32>
    %218 = tpu.reciprocal %217 {approx = true} : vector<8x1xf32> -> vector<8x1xf32>
    %219 = vector.broadcast %218 : vector<8x1xf32> to vector<8x8xf32>
    %220 = arith.mulf %215, %219 : vector<8x8xf32>
    %cst_77 = arith.constant dense<0.000000e+00> : vector<8x8xf32>
    %221 = tpu.matmul %220, %209, %cst_77 {dimension_numbers = #tpu.dot_dimension_numbers<[1], [0], [0], [1], [0, 0, 1, 1], [], []>} : vector<8x8xf32>, vector<8x8xf32>, vector<8x8xf32> -> vector<8x8xf32>
    %222 = vector.extract_strided_slice %83 {offsets = [0, 64], sizes = [8, 8], strides = [1, 1]} : vector<8x128xf32> to vector<8x8xf32>
    %cst_78 = arith.constant 0.353553385 : f32
    %223 = vector.broadcast %cst_78 : f32 to vector<8x8xf32>
    %224 = arith.mulf %222, %223 : vector<8x8xf32>
    %225 = vector.extract_strided_slice %84 {offsets = [0, 64], sizes = [8, 8], strides = [1, 1]} : vector<8x128xf32> to vector<8x8xf32>
    %226 = vector.extract_strided_slice %85 {offsets = [0, 64], sizes = [8, 8], strides = [1, 1]} : vector<8x128xf32> to vector<8x8xf32>
    %cst_79 = arith.constant dense<0.000000e+00> : vector<8x8xf32>
    %227 = tpu.matmul %224, %225, %cst_79 {dimension_numbers = #tpu.dot_dimension_numbers<[1], [1], [0], [0], [0, 0, 1, 0], [], []>} : vector<8x8xf32>, vector<8x8xf32>, vector<8x8xf32> -> vector<8x8xf32>
    %cst_80 = arith.constant dense<0xFF800000> : vector<8xf32>
    %228 = vector.multi_reduction <maximumf>, %227, %cst_80 [1] : vector<8x8xf32> to vector<8xf32>
    %229 = vector.shape_cast %228 : vector<8xf32> to vector<8x1xf32>
    %230 = vector.broadcast %229 : vector<8x1xf32> to vector<8x8xf32>
    %231 = arith.subf %227, %230 : vector<8x8xf32>
    %232 = math.exp %231 : vector<8x8xf32>
    %cst_81 = arith.constant dense<0.000000e+00> : vector<8xf32>
    %233 = vector.multi_reduction <add>, %232, %cst_81 [1] : vector<8x8xf32> to vector<8xf32>
    %234 = vector.shape_cast %233 : vector<8xf32> to vector<8x1xf32>
    %235 = tpu.reciprocal %234 {approx = true} : vector<8x1xf32> -> vector<8x1xf32>
    %236 = vector.broadcast %235 : vector<8x1xf32> to vector<8x8xf32>
    %237 = arith.mulf %232, %236 : vector<8x8xf32>
    %cst_82 = arith.constant dense<0.000000e+00> : vector<8x8xf32>
    %238 = tpu.matmul %237, %226, %cst_82 {dimension_numbers = #tpu.dot_dimension_numbers<[1], [0], [0], [1], [0, 0, 1, 1], [], []>} : vector<8x8xf32>, vector<8x8xf32>, vector<8x8xf32> -> vector<8x8xf32>
    %239 = vector.extract_strided_slice %83 {offsets = [0, 72], sizes = [8, 8], strides = [1, 1]} : vector<8x128xf32> to vector<8x8xf32>
    %cst_83 = arith.constant 0.353553385 : f32
    %240 = vector.broadcast %cst_83 : f32 to vector<8x8xf32>
    %241 = arith.mulf %239, %240 : vector<8x8xf32>
    %242 = vector.extract_strided_slice %84 {offsets = [0, 72], sizes = [8, 8], strides = [1, 1]} : vector<8x128xf32> to vector<8x8xf32>
    %243 = vector.extract_strided_slice %85 {offsets = [0, 72], sizes = [8, 8], strides = [1, 1]} : vector<8x128xf32> to vector<8x8xf32>
    %cst_84 = arith.constant dense<0.000000e+00> : vector<8x8xf32>
    %244 = tpu.matmul %241, %242, %cst_84 {dimension_numbers = #tpu.dot_dimension_numbers<[1], [1], [0], [0], [0, 0, 1, 0], [], []>} : vector<8x8xf32>, vector<8x8xf32>, vector<8x8xf32> -> vector<8x8xf32>
    %cst_85 = arith.constant dense<0xFF800000> : vector<8xf32>
    %245 = vector.multi_reduction <maximumf>, %244, %cst_85 [1] : vector<8x8xf32> to vector<8xf32>
    %246 = vector.shape_cast %245 : vector<8xf32> to vector<8x1xf32>
    %247 = vector.broadcast %246 : vector<8x1xf32> to vector<8x8xf32>
    %248 = arith.subf %244, %247 : vector<8x8xf32>
    %249 = math.exp %248 : vector<8x8xf32>
    %cst_86 = arith.constant dense<0.000000e+00> : vector<8xf32>
    %250 = vector.multi_reduction <add>, %249, %cst_86 [1] : vector<8x8xf32> to vector<8xf32>
    %251 = vector.shape_cast %250 : vector<8xf32> to vector<8x1xf32>
    %252 = tpu.reciprocal %251 {approx = true} : vector<8x1xf32> -> vector<8x1xf32>
    %253 = vector.broadcast %252 : vector<8x1xf32> to vector<8x8xf32>
    %254 = arith.mulf %249, %253 : vector<8x8xf32>
    %cst_87 = arith.constant dense<0.000000e+00> : vector<8x8xf32>
    %255 = tpu.matmul %254, %243, %cst_87 {dimension_numbers = #tpu.dot_dimension_numbers<[1], [0], [0], [1], [0, 0, 1, 1], [], []>} : vector<8x8xf32>, vector<8x8xf32>, vector<8x8xf32> -> vector<8x8xf32>
    %256 = vector.extract_strided_slice %83 {offsets = [0, 80], sizes = [8, 8], strides = [1, 1]} : vector<8x128xf32> to vector<8x8xf32>
    %cst_88 = arith.constant 0.353553385 : f32
    %257 = vector.broadcast %cst_88 : f32 to vector<8x8xf32>
    %258 = arith.mulf %256, %257 : vector<8x8xf32>
    %259 = vector.extract_strided_slice %84 {offsets = [0, 80], sizes = [8, 8], strides = [1, 1]} : vector<8x128xf32> to vector<8x8xf32>
    %260 = vector.extract_strided_slice %85 {offsets = [0, 80], sizes = [8, 8], strides = [1, 1]} : vector<8x128xf32> to vector<8x8xf32>
    %cst_89 = arith.constant dense<0.000000e+00> : vector<8x8xf32>
    %261 = tpu.matmul %258, %259, %cst_89 {dimension_numbers = #tpu.dot_dimension_numbers<[1], [1], [0], [0], [0, 0, 1, 0], [], []>} : vector<8x8xf32>, vector<8x8xf32>, vector<8x8xf32> -> vector<8x8xf32>
    %cst_90 = arith.constant dense<0xFF800000> : vector<8xf32>
    %262 = vector.multi_reduction <maximumf>, %261, %cst_90 [1] : vector<8x8xf32> to vector<8xf32>
    %263 = vector.shape_cast %262 : vector<8xf32> to vector<8x1xf32>
    %264 = vector.broadcast %263 : vector<8x1xf32> to vector<8x8xf32>
    %265 = arith.subf %261, %264 : vector<8x8xf32>
    %266 = math.exp %265 : vector<8x8xf32>
    %cst_91 = arith.constant dense<0.000000e+00> : vector<8xf32>
    %267 = vector.multi_reduction <add>, %266, %cst_91 [1] : vector<8x8xf32> to vector<8xf32>
    %268 = vector.shape_cast %267 : vector<8xf32> to vector<8x1xf32>
    %269 = tpu.reciprocal %268 {approx = true} : vector<8x1xf32> -> vector<8x1xf32>
    %270 = vector.broadcast %269 : vector<8x1xf32> to vector<8x8xf32>
    %271 = arith.mulf %266, %270 : vector<8x8xf32>
    %cst_92 = arith.constant dense<0.000000e+00> : vector<8x8xf32>
    %272 = tpu.matmul %271, %260, %cst_92 {dimension_numbers = #tpu.dot_dimension_numbers<[1], [0], [0], [1], [0, 0, 1, 1], [], []>} : vector<8x8xf32>, vector<8x8xf32>, vector<8x8xf32> -> vector<8x8xf32>
    %273 = vector.extract_strided_slice %83 {offsets = [0, 88], sizes = [8, 8], strides = [1, 1]} : vector<8x128xf32> to vector<8x8xf32>
    %cst_93 = arith.constant 0.353553385 : f32
    %274 = vector.broadcast %cst_93 : f32 to vector<8x8xf32>
    %275 = arith.mulf %273, %274 : vector<8x8xf32>
    %276 = vector.extract_strided_slice %84 {offsets = [0, 88], sizes = [8, 8], strides = [1, 1]} : vector<8x128xf32> to vector<8x8xf32>
    %277 = vector.extract_strided_slice %85 {offsets = [0, 88], sizes = [8, 8], strides = [1, 1]} : vector<8x128xf32> to vector<8x8xf32>
    %cst_94 = arith.constant dense<0.000000e+00> : vector<8x8xf32>
    %278 = tpu.matmul %275, %276, %cst_94 {dimension_numbers = #tpu.dot_dimension_numbers<[1], [1], [0], [0], [0, 0, 1, 0], [], []>} : vector<8x8xf32>, vector<8x8xf32>, vector<8x8xf32> -> vector<8x8xf32>
    %cst_95 = arith.constant dense<0xFF800000> : vector<8xf32>
    %279 = vector.multi_reduction <maximumf>, %278, %cst_95 [1] : vector<8x8xf32> to vector<8xf32>
    %280 = vector.shape_cast %279 : vector<8xf32> to vector<8x1xf32>
    %281 = vector.broadcast %280 : vector<8x1xf32> to vector<8x8xf32>
    %282 = arith.subf %278, %281 : vector<8x8xf32>
    %283 = math.exp %282 : vector<8x8xf32>
    %cst_96 = arith.constant dense<0.000000e+00> : vector<8xf32>
    %284 = vector.multi_reduction <add>, %283, %cst_96 [1] : vector<8x8xf32> to vector<8xf32>
    %285 = vector.shape_cast %284 : vector<8xf32> to vector<8x1xf32>
    %286 = tpu.reciprocal %285 {approx = true} : vector<8x1xf32> -> vector<8x1xf32>
    %287 = vector.broadcast %286 : vector<8x1xf32> to vector<8x8xf32>
    %288 = arith.mulf %283, %287 : vector<8x8xf32>
    %cst_97 = arith.constant dense<0.000000e+00> : vector<8x8xf32>
    %289 = tpu.matmul %288, %277, %cst_97 {dimension_numbers = #tpu.dot_dimension_numbers<[1], [0], [0], [1], [0, 0, 1, 1], [], []>} : vector<8x8xf32>, vector<8x8xf32>, vector<8x8xf32> -> vector<8x8xf32>
    %290 = vector.extract_strided_slice %83 {offsets = [0, 96], sizes = [8, 8], strides = [1, 1]} : vector<8x128xf32> to vector<8x8xf32>
    %cst_98 = arith.constant 0.353553385 : f32
    %291 = vector.broadcast %cst_98 : f32 to vector<8x8xf32>
    %292 = arith.mulf %290, %291 : vector<8x8xf32>
    %293 = vector.extract_strided_slice %84 {offsets = [0, 96], sizes = [8, 8], strides = [1, 1]} : vector<8x128xf32> to vector<8x8xf32>
    %294 = vector.extract_strided_slice %85 {offsets = [0, 96], sizes = [8, 8], strides = [1, 1]} : vector<8x128xf32> to vector<8x8xf32>
    %cst_99 = arith.constant dense<0.000000e+00> : vector<8x8xf32>
    %295 = tpu.matmul %292, %293, %cst_99 {dimension_numbers = #tpu.dot_dimension_numbers<[1], [1], [0], [0], [0, 0, 1, 0], [], []>} : vector<8x8xf32>, vector<8x8xf32>, vector<8x8xf32> -> vector<8x8xf32>
    %cst_100 = arith.constant dense<0xFF800000> : vector<8xf32>
    %296 = vector.multi_reduction <maximumf>, %295, %cst_100 [1] : vector<8x8xf32> to vector<8xf32>
    %297 = vector.shape_cast %296 : vector<8xf32> to vector<8x1xf32>
    %298 = vector.broadcast %297 : vector<8x1xf32> to vector<8x8xf32>
    %299 = arith.subf %295, %298 : vector<8x8xf32>
    %300 = math.exp %299 : vector<8x8xf32>
    %cst_101 = arith.constant dense<0.000000e+00> : vector<8xf32>
    %301 = vector.multi_reduction <add>, %300, %cst_101 [1] : vector<8x8xf32> to vector<8xf32>
    %302 = vector.shape_cast %301 : vector<8xf32> to vector<8x1xf32>
    %303 = tpu.reciprocal %302 {approx = true} : vector<8x1xf32> -> vector<8x1xf32>
    %304 = vector.broadcast %303 : vector<8x1xf32> to vector<8x8xf32>
    %305 = arith.mulf %300, %304 : vector<8x8xf32>
    %cst_102 = arith.constant dense<0.000000e+00> : vector<8x8xf32>
    %306 = tpu.matmul %305, %294, %cst_102 {dimension_numbers = #tpu.dot_dimension_numbers<[1], [0], [0], [1], [0, 0, 1, 1], [], []>} : vector<8x8xf32>, vector<8x8xf32>, vector<8x8xf32> -> vector<8x8xf32>
    %307 = vector.extract_strided_slice %83 {offsets = [0, 104], sizes = [8, 8], strides = [1, 1]} : vector<8x128xf32> to vector<8x8xf32>
    %cst_103 = arith.constant 0.353553385 : f32
    %308 = vector.broadcast %cst_103 : f32 to vector<8x8xf32>
    %309 = arith.mulf %307, %308 : vector<8x8xf32>
    %310 = vector.extract_strided_slice %84 {offsets = [0, 104], sizes = [8, 8], strides = [1, 1]} : vector<8x128xf32> to vector<8x8xf32>
    %311 = vector.extract_strided_slice %85 {offsets = [0, 104], sizes = [8, 8], strides = [1, 1]} : vector<8x128xf32> to vector<8x8xf32>
    %cst_104 = arith.constant dense<0.000000e+00> : vector<8x8xf32>
    %312 = tpu.matmul %309, %310, %cst_104 {dimension_numbers = #tpu.dot_dimension_numbers<[1], [1], [0], [0], [0, 0, 1, 0], [], []>} : vector<8x8xf32>, vector<8x8xf32>, vector<8x8xf32> -> vector<8x8xf32>
    %cst_105 = arith.constant dense<0xFF800000> : vector<8xf32>
    %313 = vector.multi_reduction <maximumf>, %312, %cst_105 [1] : vector<8x8xf32> to vector<8xf32>
    %314 = vector.shape_cast %313 : vector<8xf32> to vector<8x1xf32>
    %315 = vector.broadcast %314 : vector<8x1xf32> to vector<8x8xf32>
    %316 = arith.subf %312, %315 : vector<8x8xf32>
    %317 = math.exp %316 : vector<8x8xf32>
    %cst_106 = arith.constant dense<0.000000e+00> : vector<8xf32>
    %318 = vector.multi_reduction <add>, %317, %cst_106 [1] : vector<8x8xf32> to vector<8xf32>
    %319 = vector.shape_cast %318 : vector<8xf32> to vector<8x1xf32>
    %320 = tpu.reciprocal %319 {approx = true} : vector<8x1xf32> -> vector<8x1xf32>
    %321 = vector.broadcast %320 : vector<8x1xf32> to vector<8x8xf32>
    %322 = arith.mulf %317, %321 : vector<8x8xf32>
    %cst_107 = arith.constant dense<0.000000e+00> : vector<8x8xf32>
    %323 = tpu.matmul %322, %311, %cst_107 {dimension_numbers = #tpu.dot_dimension_numbers<[1], [0], [0], [1], [0, 0, 1, 1], [], []>} : vector<8x8xf32>, vector<8x8xf32>, vector<8x8xf32> -> vector<8x8xf32>
    %324 = vector.extract_strided_slice %83 {offsets = [0, 112], sizes = [8, 8], strides = [1, 1]} : vector<8x128xf32> to vector<8x8xf32>
    %cst_108 = arith.constant 0.353553385 : f32
    %325 = vector.broadcast %cst_108 : f32 to vector<8x8xf32>
    %326 = arith.mulf %324, %325 : vector<8x8xf32>
    %327 = vector.extract_strided_slice %84 {offsets = [0, 112], sizes = [8, 8], strides = [1, 1]} : vector<8x128xf32> to vector<8x8xf32>
    %328 = vector.extract_strided_slice %85 {offsets = [0, 112], sizes = [8, 8], strides = [1, 1]} : vector<8x128xf32> to vector<8x8xf32>
    %cst_109 = arith.constant dense<0.000000e+00> : vector<8x8xf32>
    %329 = tpu.matmul %326, %327, %cst_109 {dimension_numbers = #tpu.dot_dimension_numbers<[1], [1], [0], [0], [0, 0, 1, 0], [], []>} : vector<8x8xf32>, vector<8x8xf32>, vector<8x8xf32> -> vector<8x8xf32>
    %cst_110 = arith.constant dense<0xFF800000> : vector<8xf32>
    %330 = vector.multi_reduction <maximumf>, %329, %cst_110 [1] : vector<8x8xf32> to vector<8xf32>
    %331 = vector.shape_cast %330 : vector<8xf32> to vector<8x1xf32>
    %332 = vector.broadcast %331 : vector<8x1xf32> to vector<8x8xf32>
    %333 = arith.subf %329, %332 : vector<8x8xf32>
    %334 = math.exp %333 : vector<8x8xf32>
    %cst_111 = arith.constant dense<0.000000e+00> : vector<8xf32>
    %335 = vector.multi_reduction <add>, %334, %cst_111 [1] : vector<8x8xf32> to vector<8xf32>
    %336 = vector.shape_cast %335 : vector<8xf32> to vector<8x1xf32>
    %337 = tpu.reciprocal %336 {approx = true} : vector<8x1xf32> -> vector<8x1xf32>
    %338 = vector.broadcast %337 : vector<8x1xf32> to vector<8x8xf32>
    %339 = arith.mulf %334, %338 : vector<8x8xf32>
    %cst_112 = arith.constant dense<0.000000e+00> : vector<8x8xf32>
    %340 = tpu.matmul %339, %328, %cst_112 {dimension_numbers = #tpu.dot_dimension_numbers<[1], [0], [0], [1], [0, 0, 1, 1], [], []>} : vector<8x8xf32>, vector<8x8xf32>, vector<8x8xf32> -> vector<8x8xf32>
    %341 = vector.extract_strided_slice %83 {offsets = [0, 120], sizes = [8, 8], strides = [1, 1]} : vector<8x128xf32> to vector<8x8xf32>
    %cst_113 = arith.constant 0.353553385 : f32
    %342 = vector.broadcast %cst_113 : f32 to vector<8x8xf32>
    %343 = arith.mulf %341, %342 : vector<8x8xf32>
    %344 = vector.extract_strided_slice %84 {offsets = [0, 120], sizes = [8, 8], strides = [1, 1]} : vector<8x128xf32> to vector<8x8xf32>
    %345 = vector.extract_strided_slice %85 {offsets = [0, 120], sizes = [8, 8], strides = [1, 1]} : vector<8x128xf32> to vector<8x8xf32>
    %cst_114 = arith.constant dense<0.000000e+00> : vector<8x8xf32>
    %346 = tpu.matmul %343, %344, %cst_114 {dimension_numbers = #tpu.dot_dimension_numbers<[1], [1], [0], [0], [0, 0, 1, 0], [], []>} : vector<8x8xf32>, vector<8x8xf32>, vector<8x8xf32> -> vector<8x8xf32>
    %cst_115 = arith.constant dense<0xFF800000> : vector<8xf32>
    %347 = vector.multi_reduction <maximumf>, %346, %cst_115 [1] : vector<8x8xf32> to vector<8xf32>
    %348 = vector.shape_cast %347 : vector<8xf32> to vector<8x1xf32>
    %349 = vector.broadcast %348 : vector<8x1xf32> to vector<8x8xf32>
    %350 = arith.subf %346, %349 : vector<8x8xf32>
    %351 = math.exp %350 : vector<8x8xf32>
    %cst_116 = arith.constant dense<0.000000e+00> : vector<8xf32>
    %352 = vector.multi_reduction <add>, %351, %cst_116 [1] : vector<8x8xf32> to vector<8xf32>
    %353 = vector.shape_cast %352 : vector<8xf32> to vector<8x1xf32>
    %354 = tpu.reciprocal %353 {approx = true} : vector<8x1xf32> -> vector<8x1xf32>
    %355 = vector.broadcast %354 : vector<8x1xf32> to vector<8x8xf32>
    %356 = arith.mulf %351, %355 : vector<8x8xf32>
    %cst_117 = arith.constant dense<0.000000e+00> : vector<8x8xf32>
    %357 = tpu.matmul %356, %345, %cst_117 {dimension_numbers = #tpu.dot_dimension_numbers<[1], [0], [0], [1], [0, 0, 1, 1], [], []>} : vector<8x8xf32>, vector<8x8xf32>, vector<8x8xf32> -> vector<8x8xf32>
    %358 = tpu.concatenate %102, %119, %136, %153, %170, %187, %204, %221, %238, %255, %272, %289, %306, %323, %340, %357 in 1 : vector<8x8xf32>, vector<8x8xf32>, vector<8x8xf32>, vector<8x8xf32>, vector<8x8xf32>, vector<8x8xf32>, vector<8x8xf32>, vector<8x8xf32>, vector<8x8xf32>, vector<8x8xf32>, vector<8x8xf32>, vector<8x8xf32>, vector<8x8xf32>, vector<8x8xf32>, vector<8x8xf32>, vector<8x8xf32> -> vector<8x128xf32>
    %359 = arith.truncf %358 : vector<8x128xf32> to vector<8x128xbf16>
    %c0_118 = arith.constant 0 : index
    %c0_119 = arith.constant 0 : index
    %360 = vector.load %arg10[%c0_118, %c0_119] : memref<128x128xbf16, #tpu.memory_space<vmem>>, vector<128x128xbf16>
    %cst_120 = arith.constant dense<0.000000e+00> : vector<8x128xf32>
    %361 = tpu.matmul %359, %360, %cst_120 {dimension_numbers = #tpu.dot_dimension_numbers<[1], [0], [0], [1], [0, 0, 1, 1], [], []>} : vector<8x128xbf16>, vector<128x128xbf16>, vector<8x128xf32> -> vector<8x128xf32>
    %c0_121 = arith.constant 0 : index
    %c0_122 = arith.constant 0 : index
    %362 = vector.load %arg11[%c0_121, %c0_122] : memref<1x128xf32, #tpu.memory_space<vmem>>, vector<1x128xf32>
    %363 = vector.broadcast %362 : vector<1x128xf32> to vector<8x128xf32>
    %364 = arith.addf %361, %363 : vector<8x128xf32>
    %365 = arith.addf %76, %364 : vector<8x128xf32>
    %366 = vector.extract_strided_slice %365 {offsets = [0, 0], sizes = [1, 128], strides = [1, 1]} : vector<8x128xf32> to vector<1x128xf32>
    %367 = vector.extract_strided_slice %365 {offsets = [1, 0], sizes = [1, 128], strides = [1, 1]} : vector<8x128xf32> to vector<1x128xf32>
    %368 = vector.extract_strided_slice %365 {offsets = [2, 0], sizes = [1, 128], strides = [1, 1]} : vector<8x128xf32> to vector<1x128xf32>
    %369 = vector.extract_strided_slice %365 {offsets = [3, 0], sizes = [1, 128], strides = [1, 1]} : vector<8x128xf32> to vector<1x128xf32>
    %370 = vector.extract_strided_slice %365 {offsets = [4, 0], sizes = [1, 128], strides = [1, 1]} : vector<8x128xf32> to vector<1x128xf32>
    %371 = vector.extract_strided_slice %365 {offsets = [5, 0], sizes = [1, 128], strides = [1, 1]} : vector<8x128xf32> to vector<1x128xf32>
    %372 = vector.extract_strided_slice %365 {offsets = [6, 0], sizes = [1, 128], strides = [1, 1]} : vector<8x128xf32> to vector<1x128xf32>
    %373 = vector.extract_strided_slice %365 {offsets = [7, 0], sizes = [1, 128], strides = [1, 1]} : vector<8x128xf32> to vector<1x128xf32>
    %374 = tpu.concatenate %366, %367, %368, %369, %370, %371, %372, %373 in 1 : vector<1x128xf32>, vector<1x128xf32>, vector<1x128xf32>, vector<1x128xf32>, vector<1x128xf32>, vector<1x128xf32>, vector<1x128xf32>, vector<1x128xf32> -> vector<1x1024xf32>
    %375 = arith.truncf %374 : vector<1x1024xf32> to vector<1x1024xbf16>
    %c0_123 = arith.constant 0 : index
    %c0_124 = arith.constant 0 : index
    %376 = vector.load %arg12[%c0_123, %c0_124] : memref<1024x128xbf16, #tpu.memory_space<vmem>>, vector<1024x128xbf16>
    %cst_125 = arith.constant dense<0.000000e+00> : vector<1x128xf32>
    %377 = tpu.matmul %375, %376, %cst_125 {dimension_numbers = #tpu.dot_dimension_numbers<[1], [0], [0], [1], [0, 0, 1, 1], [], []>} : vector<1x1024xbf16>, vector<1024x128xbf16>, vector<1x128xf32> -> vector<1x128xf32>
    %c0_126 = arith.constant 0 : index
    %c0_127 = arith.constant 0 : index
    %378 = vector.load %arg13[%c0_126, %c0_127] : memref<1x128xf32, #tpu.memory_space<vmem>>, vector<1x128xf32>
    %379 = arith.addf %377, %378 : vector<1x128xf32>
    %cst_128 = arith.constant 0.000000e+00 : f32
    %380 = vector.broadcast %cst_128 : f32 to vector<1x128xf32>
    %381 = arith.maximumf %379, %380 : vector<1x128xf32>
    %382 = arith.truncf %381 : vector<1x128xf32> to vector<1x128xbf16>
    %c0_129 = arith.constant 0 : index
    %c0_130 = arith.constant 0 : index
    %383 = vector.load %arg14[%c0_129, %c0_130] : memref<128x1xbf16, #tpu.memory_space<vmem>>, vector<128x1xbf16>
    %cst_131 = arith.constant dense<0.000000e+00> : vector<1x1xf32>
    %384 = tpu.matmul %382, %383, %cst_131 {dimension_numbers = #tpu.dot_dimension_numbers<[1], [0], [0], [1], [0, 0, 1, 1], [], []>} : vector<1x128xbf16>, vector<128x1xbf16>, vector<1x1xf32> -> vector<1x1xf32>
    %c0_132 = arith.constant 0 : index
    %c0_133 = arith.constant 0 : index
    %385 = vector.load %arg15[%c0_132, %c0_133] : memref<1x1xf32, #tpu.memory_space<vmem>>, vector<1x1xf32>
    %386 = arith.addf %384, %385 : vector<1x1xf32>
    %c0_134 = arith.constant 0 : index
    %c0_135 = arith.constant 0 : index
    %c0_136 = arith.constant 0 : index
    %387 = vector.load %arg16[%c0_134, %c0_135, %c0_136] : memref<1x1x1xf32, #tpu.memory_space<vmem>>, vector<1x1x1xf32>
    %388 = vector.shape_cast %387 : vector<1x1x1xf32> to vector<1x1xf32>
    %389 = vector.shape_cast %386 : vector<1x1xf32> to vector<1x1x1xf32>
    tpu.vector_store %arg16[%c0_134, %c0_135, %c0_136], %389 {strides = array<i32>} : memref<1x1x1xf32, #tpu.memory_space<vmem>>, vector<1x1x1xf32>,
    return
  }
  func.func @transform_0(%arg0: i32) -> (i32, i32, i32) {
    %c0_i32 = arith.constant 0 : i32
    %c0_i32_0 = arith.constant 0 : i32
    %c0_i32_1 = arith.constant 0 : i32
    return %arg0, %c0_i32, %c0_i32_0 : i32, i32, i32
  }
  func.func @transform_1(%arg0: i32) -> (i32, i32, i32) {
    %c0_i32 = arith.constant 0 : i32
    %c0_i32_0 = arith.constant 0 : i32
    %c0_i32_1 = arith.constant 0 : i32
    %c0_i32_2 = arith.constant 0 : i32
    return %c0_i32, %c0_i32_0, %c0_i32_1 : i32, i32, i32
  }
  func.func @transform_2(%arg0: i32) -> (i32, i32) {
    %c0_i32 = arith.constant 0 : i32
    %c0_i32_0 = arith.constant 0 : i32
    %c0_i32_1 = arith.constant 0 : i32
    return %c0_i32, %c0_i32_0 : i32, i32
  }
  func.func @transform_3(%arg0: i32) -> (i32, i32) {
    %c0_i32 = arith.constant 0 : i32
    %c0_i32_0 = arith.constant 0 : i32
    %c0_i32_1 = arith.constant 0 : i32
    return %c0_i32, %c0_i32_0 : i32, i32
  }
  func.func @transform_4(%arg0: i32) -> (i32, i32) {
    %c0_i32 = arith.constant 0 : i32
    %c0_i32_0 = arith.constant 0 : i32
    %c0_i32_1 = arith.constant 0 : i32
    return %c0_i32, %c0_i32_0 : i32, i32
  }
  func.func @transform_5(%arg0: i32) -> (i32, i32) {
    %c0_i32 = arith.constant 0 : i32
    %c0_i32_0 = arith.constant 0 : i32
    %c0_i32_1 = arith.constant 0 : i32
    return %c0_i32, %c0_i32_0 : i32, i32
  }
  func.func @transform_6(%arg0: i32) -> (i32, i32) {
    %c0_i32 = arith.constant 0 : i32
    %c0_i32_0 = arith.constant 0 : i32
    %c0_i32_1 = arith.constant 0 : i32
    return %c0_i32, %c0_i32_0 : i32, i32
  }
  func.func @transform_7(%arg0: i32) -> (i32, i32) {
    %c0_i32 = arith.constant 0 : i32
    %c0_i32_0 = arith.constant 0 : i32
    %c0_i32_1 = arith.constant 0 : i32
    return %c0_i32, %c0_i32_0 : i32, i32
  }
  func.func @transform_8(%arg0: i32) -> (i32, i32) {
    %c0_i32 = arith.constant 0 : i32
    %c0_i32_0 = arith.constant 0 : i32
    %c0_i32_1 = arith.constant 0 : i32
    return %c0_i32, %c0_i32_0 : i32, i32
  }
  func.func @transform_9(%arg0: i32) -> (i32, i32) {
    %c0_i32 = arith.constant 0 : i32
    %c0_i32_0 = arith.constant 0 : i32
    %c0_i32_1 = arith.constant 0 : i32
    return %c0_i32, %c0_i32_0 : i32, i32
  }
  func.func @transform_10(%arg0: i32) -> (i32, i32) {
    %c0_i32 = arith.constant 0 : i32
    %c0_i32_0 = arith.constant 0 : i32
    %c0_i32_1 = arith.constant 0 : i32
    return %c0_i32, %c0_i32_0 : i32, i32
  }
  func.func @transform_11(%arg0: i32) -> (i32, i32) {
    %c0_i32 = arith.constant 0 : i32
    %c0_i32_0 = arith.constant 0 : i32
    %c0_i32_1 = arith.constant 0 : i32
    return %c0_i32, %c0_i32_0 : i32, i32
  }
  func.func @transform_12(%arg0: i32) -> (i32, i32) {
    %c0_i32 = arith.constant 0 : i32
    %c0_i32_0 = arith.constant 0 : i32
    %c0_i32_1 = arith.constant 0 : i32
    return %c0_i32, %c0_i32_0 : i32, i32
  }
  func.func @transform_13(%arg0: i32) -> (i32, i32) {
    %c0_i32 = arith.constant 0 : i32
    %c0_i32_0 = arith.constant 0 : i32
    %c0_i32_1 = arith.constant 0 : i32
    return %c0_i32, %c0_i32_0 : i32, i32
  }
  func.func @transform_14(%arg0: i32) -> (i32, i32) {
    %c0_i32 = arith.constant 0 : i32
    %c0_i32_0 = arith.constant 0 : i32
    %c0_i32_1 = arith.constant 0 : i32
    return %c0_i32, %c0_i32_0 : i32, i32
  }
  func.func @transform_15(%arg0: i32) -> (i32, i32, i32) {
    %c0_i32 = arith.constant 0 : i32
    %c0_i32_0 = arith.constant 0 : i32
    %c0_i32_1 = arith.constant 0 : i32
    return %arg0, %c0_i32, %c0_i32_0 : i32, i32, i32
  }
}

</mosaic_0001>

<bundles_post_ra>
// kernel: attention_cnn_forward.1
= control target key start
LH: loop header
LB: loop body
LE: loop exit
PB: predicated region body
PF: predicated region fallthrough
CT: control target
= control target key end

     0   :  { %s6953_s20 = smov 0   ;;  %s8514_s0 = inlined_call_operand.vmem [shape: f32[4,68,1], index: 0, kind: input, shape index: {}]   ;;  %s8515_s1 = inlined_call_operand.vmem [shape: f32[5,1,32], index: 1, kind: input, shape index: {}]   ;;  %s8516_s2 = inlined_call_operand.vmem [shape: f32[1,32], index: 2, kind: input, shape index: {}]   ;;  %s8517_s3 = inlined_call_operand.vmem [shape: bf16[96,64], index: 3, kind: input, shape index: {}]   ;;  %s8518_s4 = inlined_call_operand.vmem [shape: f32[1,64], index: 4, kind: input, shape index: {}]   ;;  %s8519_s5 = inlined_call_operand.vmem [shape: bf16[192,128], index: 5, kind: input, shape index: {}]   ;;  %s8520_s6 = inlined_call_operand.vmem [shape: f32[1,128], index: 6, kind: input, shape index: {}]   ;;  %s8521_s7 = inlined_call_operand.vmem [shape: bf16[128,384], index: 7, kind: input, shape index: {}]   ;;  %s8522_s8 = inlined_call_operand.vmem [shape: f32[1,384], index: 8, kind: input, shape index: {}]   ;;  %s8523_s9 = inlined_call_operand.vmem [shape: bf16[128,128], index: 9, kind: input, shape index: {}]   ;;  %s8524_s10 = inlined_call_operand.vmem [shape: f32[1,128], index: 10, kind: input, shape index: {}]   ;;  %s8525_s11 = inlined_call_operand.vmem [shape: bf16[1024,128], index: 11, kind: input, shape index: {}]   ;;  %s8526_s12 = inlined_call_operand.vmem [shape: f32[1,128], index: 12, kind: input, shape index: {}]   ;;  %s8527_s13 = inlined_call_operand.vmem [shape: bf16[128,1], index: 13, kind: input, shape index: {}]   ;;  %s8528_s14 = inlined_call_operand.<no memory space> [shape: f32[1,1], index: 14, kind: input, shape index: {}]   ;;  %s8529_s15 = inlined_call_operand.vmem [shape: f32[4,1,1], index: 15, kind: output, shape index: {}]  }
   0x1   :  { %v20_v0 = vstv %s8528_s14 }
   0x2   :  { %21 = vst [vmem:[#allocation2] sm:$0x1] %v20_v0 }
   0x3 LB: > { %s5977_s21 = sadd.s32 4294967295, %s6849_s20   ;;  %p5981_p0 = scmp.ge.s32.totalorder %s6849_s20, 1  ;;  %s6849_s20 = sphi %s6953_s20, %s27_s20  }
   0x4   : > { %p439_p1 = scmp.lt.s32.totalorder %s6849_s20, 5 }
   0x6   : > { %p440_p2 = pnand %p5981_p0, %p439_p1 }
   0x7   : > { %p485_p3 = scmp.lt.s32.totalorder (!%p440_p2), %s5977_s21, 3  ;;  %v8530_v1 = vmov (!%p440_p2), 0   ;;  %v6852_v11 = vmov (!%p440_p2), 1983009808   ;;  %v846_v13 = vlaneseq (!%p440_p2)  ;;  %v6975_v16 = vld [vmem:[%s8515_s1] ss:$0 sm:$0xff] (!%p440_p2) }
   0x8   : > { %443 = sbr.rel (%p440_p2) target bundleno = 4483 (0x1183), region = 80  ;;  %6623 = vset.pattern.permute.xlu1 (!%p440_p2), %v8530_v1  ;;  %6622 = vset.pattern.permute.xlu0 (!%p440_p2), %v8530_v1  ;;  %v844_v12 = vunpack.c.l.s4 (!%p440_p2), %v6852_v11  ;;  %v6980_v17 = vld [vmem:[%s8515_s1 + $0x1] ss:$0 sm:$0xff] (!%p440_p2)  ;;  %v6985_v18 = vld [vmem:[%s8515_s1 + $0x2] ss:$0 sm:$0xff] (!%p440_p2)  ;;  %vm597_vm0 = vcmask (!%p440_p2), 1046528  }
   0x9   : > { %1845 = vmatprep.subr.bf16.mxu1 (!%p440_p2), %v8530_v1  ;;  %v6970_v15 = vshrl.u32 (!%p440_p2), %v846_v13, 7  ;;  %v6990_v19 = vld [vmem:[%s8515_s1 + $0x3] ss:$0 sm:$0xff] (!%p440_p2)  ;;  %vm657_vm1 = vcmask (!%p440_p2), 1045504   ;;  %vm717_vm2 = vcmask (!%p440_p2), 1044480   ;;  %vm777_vm3 = vcmask (!%p440_p2), 1043456  }
   0xa   : > { %v845_v14 = vunpack.c.0.s8 (!%p440_p2), %v844_v12  ;;  %v6995_v22 = vld [vmem:[%s8515_s1 + $0x4] ss:$0 sm:$0xff] (!%p440_p2)  ;;  %v6650_v35 = vld [vmem:[%s8517_s3 + $0x8] sm:$0xff] (!%p440_p2)   ;;  %v6651_v54 = vld [vmem:[%s8517_s3 + $0x10] sm:$0xff] (!%p440_p2)   ;;  %vm1010_vm4 = vcmask (!%p440_p2), 254976   ;;  %vm1280_vm5 = vcmask (!%p440_p2), 1042434  }
   0xb   : > { %v6649_v34 = vld [vmem:[%s8517_s3] sm:$0xff] (!%p440_p2)   ;;  %vm1292_vm6 = vcmask (!%p440_p2), 1041409   ;;  %vm1282_vm7 = vcmask (!%p440_p2), 1043459   ;;  %vm1284_vm8 = vcmask (!%p440_p2), 1044484   ;;  %vm1286_vm9 = vcmask (!%p440_p2), 1045509   ;;  %s6853_s16 = smov (!%p440_p2), 32  }
   0xc   : > { %v7012_v29 = vsub.s32 (!%p440_p2), %v845_v14, %v6970_v15  ;;  %6358 = vmatprep.subr.bf16.mxu0 (!%p440_p2), %v6649_v34  ;;  %vm1288_vm10 = vcmask (!%p440_p2), 1046534   ;;  %vm1319_vm11 = vcmask (!%p440_p2), 1040384   ;;  %vm1290_vm12 = vcmask (!%p440_p2), 1047559   ;;  %s6854_s19 = smov (!%p440_p2), 64   ;;  %s8533_s29 = smov (!%p440_p2), 120  }
   0xd   : > { %6359 = vmatpush3.bf16.msra.mxu0 (!%p440_p2), %v6649_v34  ;;  %v7098_v34 = vld [vmem:[%s8516_s2] ss:$0 sm:$0xff] (!%p440_p2)  ;;  %vm1366_vm13 = vcmask (!%p440_p2), 261120   ;;  %vm1371_vm14 = vcmask (!%p440_p2), 523264   ;;  %vm1420_vm15 = vcmask (!%p440_p2), 785408   ;;  %s6858_s30 = smov (!%p440_p2), 112  }
   0xe   : > { %6360 = vmatprep.subr.bf16.mxu0 (!%p440_p2), %v6650_v35  ;;  %s6859_s17 = smov (!%p440_p2), 104   ;;  %s6860_s18 = smov (!%p440_p2), 96  }
   0xf   : > { %s8545_s21 = smov (!%p485_p3, %s5977_s21), 3  ;;  %s6862_s22 = smov 80  }
  0x10   : > { %s6594_s14 = smul.u32 72, %s8545_s21  ;;  %s6863_s23 = smov 72  }
  0x11   : > { %6361 = vmatpush3.bf16.msra.mxu0 %v6650_v35  ;;  %s6865_s25 = smov 48   ;;  %s6866_s26 = smov 40  }
  0x12   : > { %s489_s24 = scalar_lea.vmem %s8514_s0, %s6594_s14  ;;  %6362 = vmatprep.subr.bf16.mxu0 %v6651_v54  ;;  %s6861_s14 = smov 88  }
  0x13   : > { %v497_v2 = vld [vmem:[%s489_s24 + $0x18] sm:$0xff]  ;;  %v495_v3 = vld [vmem:[%s489_s24 + $0x8] sm:$0xff]  ;;  %v498_v4 = vld [vmem:[%s489_s24 + $0x20] sm:$0xff]  ;;  %s6867_s27 = smov 24   ;;  %s6868_s28 = smov 16  }
  0x14   : > { %521 = vperm.xlu1 %6623, %v497_v2   ;;  %511 = vperm.xlu0 %6622, %v495_v3   ;;  %v496_v5 = vld [vmem:[%s489_s24 + $0x10] sm:$0xff]  ;;  %v499_v7 = vld [vmem:[%s489_s24 + $0x28] sm:$0xff]  ;;  %v501_v8 = vld [vmem:[%s489_s24 + $0x38] sm:$0xff] }
  0x15   : > { %v500_v6 = vld [vmem:[%s489_s24 + $0x30] sm:$0xff]  ;;  %v494_v9 = vld [vmem:[%s489_s24] sm:$0xff]  ;;  %6363 = vmatpush3.bf16.msra.mxu0 %v6651_v54 }
  0x16   : > { %v502_v10 = vld [vmem:[%s489_s24 + $0x40] sm:$0xf]  ;;  %s6864_s24 = smov 56  }
  0x18   : > { %526 = vperm.xlu1 %6623, %v498_v4   ;;  %516 = vperm.xlu0 %6622, %v496_v5  }
  0x1c   : > { %536 = vperm.xlu1 %6623, %v500_v6   ;;  %531 = vperm.xlu0 %6622, %v499_v7  }
  0x20   : > { %541 = vperm.xlu1 %6623, %v501_v8   ;;  %506 = vperm.xlu0 %6622, %v494_v9   ;;  %v6652_v9 = vld [vmem:[%s8517_s3 + $0x18] sm:$0xff]  }
  0x21   : > { %6364 = vmatprep.subr.bf16.mxu0 %v6652_v9 }
  0x22   : > { %6365 = vmatpush3.bf16.msra.mxu0 %v6652_v9 }
  0x24   : > { %570 = vperm.xlu0 %6622, %v502_v10  }
  0x93   : > { %v522_v20 = vpop.permute.xlu1 %521  ;;  %v512_v21 = vpop.permute.xlu0 %511 }
  0x94   : > { %v582_v23 = vmul.f32 %v6980_v17, %v522_v20  ;;  %v642_v24 = vmul.f32 %v6985_v18, %v522_v20  ;;  %v7000_v25 = vmul.f32 %v6990_v19, %v522_v20  ;;  %v7003_v26 = vmul.f32 %v6995_v22, %v522_v20 }
  0x95   : > { %v7006_v27 = vmul.f32 %v6980_v17, %v512_v21  ;;  %v7009_v28 = vmul.f32 %v6985_v18, %v512_v21  ;;  %v553_v30 = vmul.f32 %v6975_v16, %v522_v20  ;;  %v551_v32 = vmul.f32 %v6975_v16, %v512_v21 }
  0x96   : > { %v603_v31 = vrot.slane %v582_v23, 1  ;;  %v7017_v33 = vmul.f32 %v6990_v19, %v512_v21  ;;  %v663_v36 = vrot.slane %v642_v24, 2  ;;  %v723_v37 = vrot.slane %v7000_v25, 3 }
  0x97   : > { %v783_v38 = vrot.slane %v7003_v26, 4  ;;  %v7028_v39 = vmul.f32 %v6995_v22, %v512_v21  ;;  %v527_v40 = vpop.permute.xlu1 %526  ;;  %v517_v41 = vpop.permute.xlu0 %516  ;;  %v599_v42 = vrot.slane %v7006_v27, 1  ;;  %v659_v43 = vrot.slane %v7009_v28, 2 }
  0x98   : > { %v7033_v44 = vmul.f32 %v6980_v17, %v527_v40  ;;  %v7036_v45 = vmul.f32 %v6985_v18, %v527_v40  ;;  %v719_v46 = vrot.slane %v7017_v33, 3  ;;  %v7040_v47 = vmul.f32 %v6975_v16, %v527_v40 }
  0x99   : > { %v7043_v48 = vmul.f32 %v6990_v19, %v527_v40  ;;  %v7046_v49 = vmul.f32 %v6995_v22, %v527_v40  ;;  %v581_v52 = vmul.f32 %v6980_v17, %v517_v41  ;;  %v641_v53 = vmul.f32 %v6985_v18, %v517_v41 }
  0x9a   : > { %v605_v50 = vrot.slane %v7033_v44, 1  ;;  %v665_v51 = vrot.slane %v7036_v45, 2  ;;  %v779_v55 = vrot.slane %v7028_v39, 4  ;;  %v701_v58 = vmul.f32 %v6990_v19, %v517_v41 }
  0x9b   : > { %v725_v56 = vrot.slane %v7043_v48, 3  ;;  %v785_v57 = vrot.slane %v7046_v49, 4  ;;  %v601_v60 = vrot.slane %v581_v52, 1  ;;  %v661_v61 = vrot.slane %v641_v53, 2  ;;  %v537_v4 = vpop.permute.xlu1 %536 }
  0x9c   : > { %v606_v59 = vsel %vm597_vm0, %v603_v31, %v605_v50  ;;  %v761_v62 = vmul.f32 %v6995_v22, %v517_v41  ;;  %v666_v0 = vsel %vm657_vm1, %v663_v36, %v665_v51  ;;  %v552_v2 = vmul.f32 %v6975_v16, %v517_v41 }
  0x9d   : > { %v626_v63 = vadd.f32 %v606_v59, %v553_v30  ;;  %v721_v3 = vrot.slane %v701_v58, 3  ;;  %v726_v5 = vsel %vm717_vm2, %v723_v37, %v725_v56  ;;  %v786_v6 = vsel %vm777_vm3, %v783_v38, %v785_v57 }
  0x9e   : > { %v602_v7 = vsel %vm597_vm0, %v599_v42, %v601_v60  ;;  %v604_v8 = vsel %vm597_vm0, %v601_v60, %v603_v31  ;;  %v662_v13 = vsel %vm657_vm1, %v659_v43, %v661_v61  ;;  %v664_v14 = vsel %vm657_vm1, %v661_v61, %v663_v36 }
  0x9f   : > { %v686_v10 = vadd.f32 %v666_v0, %v626_v63  ;;  %v624_v11 = vadd.f32 %v602_v7, %v551_v32  ;;  %v625_v12 = vadd.f32 %v604_v8, %v552_v2  ;;  %v722_v20 = vsel %vm717_vm2, %v719_v46, %v721_v3  ;;  %v532_v32 = vpop.permute.xlu0 %531 }
  0xa0   : > { %v781_v21 = vrot.slane %v761_v62, 4  ;;  %v7090_v23 = vmul.f32 %v6980_v17, %v537_v4  ;;  %v7093_v31 = vmul.f32 %v6985_v18, %v537_v4  ;;  %v724_v35 = vsel %vm717_vm2, %v721_v3, %v723_v37 }
  0xa1   : > { %v746_v24 = vadd.f32 %v726_v5, %v686_v10  ;;  %v684_v25 = vadd.f32 %v662_v13, %v624_v11  ;;  %v685_v30 = vadd.f32 %v664_v14, %v625_v12  ;;  %v7105_v40 = vmul.f32 %v6975_v16, %v537_v4 }
  0xa2   : > { %v782_v36 = vsel %vm777_vm3, %v779_v55, %v781_v21  ;;  %v7108_v41 = vmul.f32 %v6990_v19, %v537_v4  ;;  %v784_v58 = vsel %vm777_vm3, %v781_v21, %v783_v38  ;;  %v609_v37 = vrot.slane %v7090_v23, 1 }
  0xa3   : > { %v806_v52 = vadd.f32 %v786_v6, %v746_v24  ;;  %v744_v53 = vadd.f32 %v722_v20, %v684_v25  ;;  %v745_v54 = vadd.f32 %v724_v35, %v685_v30  ;;  %v669_v59 = vrot.slane %v7093_v31, 2 }
  0xa4   : > { %v7116_v60 = vmul.f32 %v6995_v22, %v537_v4  ;;  %v584_v61 = vmul.f32 %v6980_v17, %v532_v32  ;;  %v644_v2 = vmul.f32 %v6985_v18, %v532_v32  ;;  %v729_v26 = vrot.slane %v7108_v41, 3 }
  0xa5   : > { %v821_v62 = vadd.f32 %v7098_v34, %v806_v52  ;;  %v804_v63 = vadd.f32 %v782_v36, %v744_v53  ;;  %v805_v0 = vadd.f32 %v784_v58, %v745_v54  ;;  %v704_v38 = vmul.f32 %v6990_v19, %v532_v32 }
  0xa6   : > { %v607_v3 = vrot.slane %v584_v61, 1  ;;  %v764_v5 = vmul.f32 %v6995_v22, %v532_v32  ;;  %v667_v8 = vrot.slane %v644_v2, 2  ;;  %v789_v10 = vrot.slane %v7116_v60, 4 }
  0xa7   : > { %v7124_v6 = vmax.f32 %v821_v62, 0.0  ;;  %v819_v4 = vadd.f32 %v7098_v34, %v804_v63  ;;  %v820_v7 = vadd.f32 %v7098_v34, %v805_v0  ;;  %v555_v11 = vmul.f32 %v6975_v16, %v532_v32 }
  0xa8   : > { %v608_v9 = vsel %vm597_vm0, %v605_v50, %v607_v3  ;;  %v610_v12 = vsel %vm597_vm0, %v607_v3, %v609_v37  ;;  %v727_v21 = vrot.slane %v704_v38, 3  ;;  %v787_v30 = vrot.slane %v764_v5, 4 }
  0xa9   : > { %v7138_v13 = vrot.slane %v7124_v6, %v7012_v29  ;;  %v7140_v14 = vmax.f32 %v819_v4, 0.0  ;;  %v828_v20 = vmax.f32 %v820_v7, 0.0  ;;  %v893_v24 = vcombine.high %v7124_v6, %v7124_v6  ;;  %v542_v7 = vpop.permute.xlu1 %541 }
  0xaa   : > { %v627_v25 = vadd.f32 %v608_v9, %v7040_v47  ;;  %v628_v44 = vadd.f32 %v610_v12, %v555_v11  ;;  %v668_v35 = vsel %vm657_vm1, %v665_v51, %v667_v8  ;;  %v670_v36 = vsel %vm657_vm1, %v667_v8, %v669_v59 }
  0xab   : > { %v7149_v32 = vrot.slane %v7140_v14, %v7012_v29  ;;  %v7159_v47 = vsel %vm1010_vm4, %v7138_v13, -inf  ;;  %v876_v52 = vcombine.high %v828_v20, %v828_v20  ;;  %v883_v53 = vrot.slane %v828_v20, %v7012_v29 }
  0xac   : > { %v687_v54 = vadd.f32 %v668_v35, %v627_v25  ;;  %v859_v58 = vcombine.high %v7140_v14, %v7140_v14  ;;  %v688_v61 = vadd.f32 %v670_v36, %v628_v44  ;;  %v728_v51 = vsel %vm717_vm2, %v725_v56, %v727_v21 }
  0xad   : > { %v1039_v45 = vsel %vm1010_vm4, %v7149_v32, -inf  ;;  %v7170_v62 = vrot.slane %v876_v52, %v7012_v29  ;;  %v891_v63 = vcombine.high %v883_v53, %v883_v53  ;;  %v1067_v2 = vsel %vm1010_vm4, %v883_v53, -inf }
  0xae   : > { %v1040_v0 = vrot.slane %v1039_v45, 4  ;;  %v1068_v5 = vrot.slane %v1067_v2, 4  ;;  %v747_v4 = vadd.f32 %v728_v51, %v687_v54  ;;  %v730_v56 = vsel %vm717_vm2, %v727_v21, %v729_v26 }
  0xaf   : > { %v1074_v8 = vsel %vm1010_vm4, %v891_v63, -inf  ;;  %v1081_v48 = vsel %vm1010_vm4, %v7170_v62, -inf  ;;  %v788_v11 = vsel %vm777_vm3, %v785_v57, %v787_v30  ;;  %v748_v25 = vadd.f32 %v730_v56, %v688_v61 }
  0xb0   : > { %v1069_v12 = vmax.f32 %v1067_v2, %v1068_v5  ;;  %v1075_v20 = vrot.slane %v1074_v8, 4  ;;  %v7187_v44 = vmax.f32 %v1039_v45, %v1040_v0  ;;  %v790_v35 = vsel %vm777_vm3, %v787_v30, %v789_v10 }
  0xb1   : > { %v807_v36 = vadd.f32 %v788_v11, %v747_v4  ;;  %v7193_v52 = vmul.f32 %v6980_v17, %v542_v7  ;;  %v1082_v53 = vrot.slane %v1081_v48, 4  ;;  %v808_v57 = vadd.f32 %v790_v35, %v748_v25 }
  0xb2   : > { %v1070_v21 = vrot.slane %v1069_v12, 2  ;;  %v1076_v49 = vmax.f32 %v1074_v8, %v1075_v20  ;;  %v7198_v61 = vmul.f32 %v6985_v18, %v542_v7  ;;  %v7201_v45 = vmul.f32 %v6990_v19, %v542_v7 }
  0xb3   : > { %v822_v54 = vadd.f32 %v7098_v34, %v807_v36  ;;  %v611_v51 = vrot.slane %v7193_v52, 1  ;;  %v823_v0 = vadd.f32 %v7098_v34, %v808_v57  ;;  %v7205_v2 = vmul.f32 %v6995_v22, %v542_v7 }
  0xb4   : > { %v1071_v63 = vmax.f32 %v1069_v12, %v1070_v21  ;;  %v1077_v30 = vrot.slane %v1076_v49, 2  ;;  %v671_v8 = vrot.slane %v7198_v61, 2  ;;  %v731_v56 = vrot.slane %v7201_v45, 3 }
  0xb5   : > { %v830_v5 = vmax.f32 %v822_v54, 0.0  ;;  %v612_v4 = vsel %vm597_vm0, %v609_v37, %v611_v51  ;;  %v7214_v20 = vmax.f32 %v823_v0, 0.0  ;;  %v7217_v12 = vmul.f32 %v6975_v16, %v542_v7  ;;  %v507_v37 = vpop.permute.xlu0 %506 }
  0xb6   : > { %v1072_v11 = vrot.slane %v1071_v63, 1  ;;  %v629_v25 = vadd.f32 %v612_v4, %v7105_v40  ;;  %v7220_v35 = vmax.f32 %v1081_v48, %v1082_v53  ;;  %v672_v23 = vsel %vm657_vm1, %v669_v59, %v671_v8 }
  0xb7   : > { %v910_v36 = vcombine.high %v830_v5, %v830_v5  ;;  %v917_v21 = vrot.slane %v830_v5, %v7012_v29  ;;  %v7228_v57 = vmax.f32 %v1076_v49, %v1077_v30  ;;  %v7232_v7 = vrot.slane %v7214_v20, %v7012_v29 }
  0xb8   : > { %v689_v54 = vadd.f32 %v672_v23, %v629_v25  ;;  %v732_v40 = vsel %vm717_vm2, %v729_v26, %v731_v56  ;;  %v8532_v49 = vrot.slane %v7205_v2, 4  ;;  %v7244_v53 = vmax.f32 %v1071_v63, %v1072_v11 }
  0xb9   : > { %v7240_v48 = vrot.slane %v910_v36, %v7012_v29  ;;  %v925_v31 = vcombine.high %v917_v21, %v917_v21  ;;  %v1123_v59 = vsel %vm1010_vm4, %v917_v21, -inf  ;;  %v7255_v25 = vsel %vm1010_vm4, %v7232_v7, -inf  ;;  %v571_v1 = vpop.permute.xlu0 %570 }
  0xba   : > { %v1124_v0 = vrot.slane %v1123_v59, 4  ;;  %v749_v5 = vadd.f32 %v732_v40, %v689_v54  ;;  %v792_v21 = vsel %vm777_vm3, %v789_v10, %v8532_v49  ;;  %v579_v40 = vmul.f32 %v6980_v17, %v507_v37 }
  0xbb   : > { %v1130_v26 = vsel %vm1010_vm4, %v925_v31, -inf  ;;  %v1137_v4 = vsel %vm1010_vm4, %v7240_v48, -inf  ;;  %v639_v31 = vmul.f32 %v6985_v18, %v507_v37  ;;  %v550_v3 = vmul.f32 %v6975_v16, %v507_v37 }
  0xbc   : > { %v1125_v11 = vmax.f32 %v1123_v59, %v1124_v0  ;;  %v1131_v36 = vrot.slane %v1130_v26, 4  ;;  %v1138_v23 = vrot.slane %v1137_v4, 4  ;;  %v809_v54 = vadd.f32 %v792_v21, %v749_v5 }
  0xbd   : > { %v699_v59 = vmul.f32 %v6990_v19, %v507_v37  ;;  %v598_v63 = vrot.slane %v579_v40, 1  ;;  %v658_v9 = vrot.slane %v639_v31, 2  ;;  %v759_v60 = vmul.f32 %v6995_v22, %v507_v37 }
  0xbe   : > { %v1126_v41 = vrot.slane %v1125_v11, 2  ;;  %v1132_v50 = vmax.f32 %v1130_v26, %v1131_v36  ;;  %v824_v0 = vadd.f32 %v7098_v34, %v809_v54  ;;  %v587_v21 = vmul.f32 %v6980_v17, %v571_v1 }
  0xbf   : > { %v718_v5 = vrot.slane %v699_v59, 3  ;;  %v7271_v49 = vmax.f32 %v1137_v4, %v1138_v23  ;;  %v1152_v30 = vrot.slane %v7255_v25, 4  ;;  %v600_v16 = vsel %vm597_vm0, %v598_v63, %v599_v42 }
  0xc0   : > { %v1127_v10 = vmax.f32 %v1125_v11, %v1126_v41  ;;  %v1133_v38 = vrot.slane %v1132_v50, 2  ;;  %v832_v26 = vmax.f32 %v824_v0, 0.0  ;;  %v623_v54 = vadd.f32 %v600_v16, %v550_v3 }
  0xc1   : > { %v660_v37 = vsel %vm657_vm1, %v658_v9, %v659_v43  ;;  %v778_v41 = vrot.slane %v759_v60, 4  ;;  %v613_v4 = vrot.slane %v587_v21, 1  ;;  %v720_v27 = vsel %vm717_vm2, %v718_v5, %v719_v46 }
  0xc2   : > { %v1128_v36 = vrot.slane %v1127_v10, 1  ;;  %v7280_v11 = vmax.f32 %v1132_v50, %v1133_v38  ;;  %v944_v40 = vcombine.high %v832_v26, %v832_v26  ;;  %v951_v17 = vrot.slane %v832_v26, %v7012_v29 }
  0xc3   : > { %v683_v23 = vadd.f32 %v660_v37, %v623_v54  ;;  %v647_v42 = vmul.f32 %v6985_v18, %v571_v1  ;;  %v707_v3 = vmul.f32 %v6990_v19, %v571_v1  ;;  %v614_v38 = vsel %vm597_vm0, %v611_v51, %v613_v4 }
  0xc4   : > { %v7289_v28 = vrot.slane %v944_v40, %v7012_v29  ;;  %v959_v43 = vcombine.high %v951_v17, %v951_v17  ;;  %v1179_v50 = vsel %vm1010_vm4, %v951_v17, -inf  ;;  %v780_v33 = vsel %vm777_vm3, %v778_v41, %v779_v55 }
  0xc5   : > { %v1180_v9 = vrot.slane %v1179_v50, 4  ;;  %v743_v63 = vadd.f32 %v720_v27, %v683_v23  ;;  %v673_v46 = vrot.slane %v647_v42, 2  ;;  %v630_v31 = vadd.f32 %v614_v38, %v7217_v12 }
  0xc6   : > { %v1186_v18 = vsel %vm1010_vm4, %v959_v43, -inf  ;;  %v1193_v19 = vsel %vm1010_vm4, %v7289_v28, -inf  ;;  %v733_v59 = vrot.slane %v707_v3, 3  ;;  %v7302_v51 = vmax.f32 %v1127_v10, %v1128_v36 }
  0xc7   : > { %v1181_v0 = vmax.f32 %v1179_v50, %v1180_v9  ;;  %v1187_v60 = vrot.slane %v1186_v18, 4  ;;  %v1194_v52 = vrot.slane %v1193_v19, 4  ;;  %v803_v5 = vadd.f32 %v780_v33, %v743_v63 }
  0xc8   : > { %v960_v39 = vcombine.high %v7289_v28, %v7289_v28  ;;  %v767_v55 = vmul.f32 %v6995_v22, %v571_v1  ;;  %v7311_v21 = vrot.slane %v859_v58, %v7012_v29  ;;  %v674_v10 = vsel %vm657_vm1, %v671_v8, %v673_v46 }
  0xc9   : > { %v1182_v26 = vrot.slane %v1181_v0, 2  ;;  %v1188_v12 = vmax.f32 %v1186_v18, %v1187_v60  ;;  %v818_v16 = vadd.f32 %v7098_v34, %v803_v5  ;;  %v690_v36 = vadd.f32 %v674_v10, %v630_v31 }
  0xca   : > { %v734_v54 = vsel %vm717_vm2, %v731_v56, %v733_v59  ;;  %v793_v1 = vrot.slane %v767_v55, 4  ;;  %v7324_v22 = vrot.slane %v893_v24, %v7012_v29  ;;  %v7326_v37 = vmax.f32 %v1193_v19, %v1194_v52 }
  0xcb   : > { %v1183_v14 = vmax.f32 %v1181_v0, %v1182_v26  ;;  %v1189_v58 = vrot.slane %v1188_v12, 2  ;;  %v826_v41 = vmax.f32 %v818_v16, 0.0  ;;  %v750_v61 = vadd.f32 %v734_v54, %v690_v36 }
  0xcc   : > { %v875_v8 = vcombine.high %v7311_v21, %v7311_v21  ;;  %v8534_v45 = vcombine.high %v7214_v20, %v7214_v20  ;;  %v1042_v40 = vrot.slane %v7187_v44, 2  ;;  %v8535_v17 = vrot.slane %v7205_v2, 4 }
  0xcd   : > { %v842_v6 = vcombine.high %v826_v41, %v826_v41  ;;  %v849_v24 = vrot.slane %v826_v41, %v7012_v29  ;;  %v909_v23 = vcombine.high %v7324_v22, %v7324_v22  ;;  %v1184_v27 = vrot.slane %v1183_v14, 1 }
  0xce   : > { %v7334_v56 = vrot.slane %v8534_v45, %v7012_v29  ;;  %v794_v4 = vsel %vm777_vm3, %v8535_v17, %v793_v1  ;;  %v7343_v42 = vmax.f32 %v1188_v12, %v1189_v58  ;;  %v8536_v20 = vcombine.high %v7149_v32, %v7149_v32 }
  0xcf   : > { %v810_v3 = vadd.f32 %v794_v4, %v750_v61  ;;  %v856_v50 = vrot.slane %v842_v6, %v7012_v29  ;;  %v857_v38 = vcombine.high %v849_v24, %v849_v24  ;;  %v1011_v9 = vsel %vm1010_vm4, %v849_v24, -inf }
  0xd0   : > { %v1046_v43 = vsel %vm1010_vm4, %v8536_v20, -inf  ;;  %v1043_v2 = vmax.f32 %v7187_v44, %v1042_v40  ;;  %v1012_v63 = vrot.slane %v1011_v9, 4  ;;  %v943_v46 = vcombine.high %v7334_v56, %v7334_v56 }
  0xd1   : > { %v825_v33 = vadd.f32 %v7098_v34, %v810_v3  ;;  %v1047_v18 = vrot.slane %v1046_v43, 4  ;;  %v858_v19 = vcombine.high %v856_v50, %v856_v50  ;;  %v1018_v31 = vsel %vm1010_vm4, %v857_v38, -inf }
  0xd2   : > { %v1025_v32 = vsel %vm1010_vm4, %v856_v50, -inf  ;;  %v1053_v59 = vsel %vm1010_vm4, %v7311_v21, -inf  ;;  %v1013_v0 = vmax.f32 %v1011_v9, %v1012_v63  ;;  %v1019_v60 = vrot.slane %v1018_v31, 4 }
  0xd3   : > { %v1026_v52 = vrot.slane %v1025_v32, 4  ;;  %v833_v5 = vmax.f32 %v825_v33, 0.0  ;;  %v1032_v44 = vsel %vm1010_vm4, %v858_v19, -inf  ;;  %v1044_v55 = vrot.slane %v1043_v2, 1 }
  0xd4   : > { %v1048_v34 = vmax.f32 %v1046_v43, %v1047_v18  ;;  %v1054_v26 = vrot.slane %v1053_v59, 4  ;;  %v1014_v12 = vrot.slane %v1013_v0, 2  ;;  %v1020_v16 = vmax.f32 %v1018_v31, %v1019_v60 }
  0xd5   : > { %v1027_v10 = vmax.f32 %v1025_v32, %v1026_v52  ;;  %v1033_v36 = vrot.slane %v1032_v44, 4  ;;  %v961_v54 = vcombine.high %v833_v5, %v833_v5  ;;  %v968_v1 = vrot.slane %v833_v5, %v7012_v29 }
  0xd6   : > { %v1049_v58 = vrot.slane %v1048_v34, 2  ;;  %v1055_v41 = vmax.f32 %v1053_v59, %v1054_v26  ;;  %v1015_v61 = vmax.f32 %v1013_v0, %v1014_v12  ;;  %v1021_v45 = vrot.slane %v1020_v16, 2 }
  0xd7   : > { %v1028_v40 = vrot.slane %v1027_v10, 2  ;;  %v1034_v6 = vmax.f32 %v1032_v44, %v1033_v36  ;;  %v7362_v24 = vrot.slane %v961_v54, %v7012_v29  ;;  %v976_v17 = vcombine.high %v968_v1, %v968_v1 }
  0xd8   : > { %v1207_v4 = vsel %vm1010_vm4, %v968_v1, -inf  ;;  %v1050_v3 = vmax.f32 %v1048_v34, %v1049_v58  ;;  %v1016_v20 = vrot.slane %v1015_v61, 1  ;;  %v1022_v43 = vmax.f32 %v1020_v16, %v1021_v45 }
  0xd9   : > { %v1208_v50 = vrot.slane %v1207_v4, 4  ;;  %v1029_v38 = vmax.f32 %v1027_v10, %v1028_v40  ;;  %v1214_v9 = vsel %vm1010_vm4, %v976_v17, -inf  ;;  %v7368_v63 = vsel %vm1010_vm4, %v7362_v24, -inf }
  0xda   : > { %v1035_v33 = vrot.slane %v1034_v6, 2  ;;  %v1051_v18 = vrot.slane %v1050_v3, 1  ;;  %v7370_v19 = vmax.f32 %v1183_v14, %v1184_v27  ;;  %v1215_v32 = vrot.slane %v1214_v9, 4 }
  0xdb   : > { %v7372_v31 = vmax.f32 %v1207_v4, %v1208_v50  ;;  %v7374_v59 = vmax.f32 %v1043_v2, %v1044_v55  ;;  %v1222_v0 = vrot.slane %v7368_v63, 4  ;;  %v1023_v60 = vrot.slane %v1022_v43, 1 }
  0xdc   : > { %v1030_v52 = vrot.slane %v1029_v38, 1  ;;  %v1036_v5 = vmax.f32 %v1034_v6, %v1035_v33  ;;  %v7377_v44 = vmax.f32 %v1015_v61, %v1016_v20  ;;  %v7379_v34 = vmax.f32 %v1050_v3, %v1051_v18 }
  0xdd   : > { %v1056_v26 = vrot.slane %v1055_v41, 2  ;;  %v1060_v14 = vsel %vm1010_vm4, %v875_v8, -inf  ;;  %v1210_v27 = vrot.slane %v7372_v31, 2  ;;  %v7386_v12 = vmax.f32 %v1214_v9, %v1215_v32 }
  0xde   : > { %v1037_v2 = vrot.slane %v1036_v5, 1  ;;  %v1061_v55 = vrot.slane %v1060_v14, 4  ;;  %v7388_v16 = vmax.f32 %v1022_v43, %v1023_v60  ;;  %v1079_v36 = vrot.slane %v7228_v57, 1 }
  0xdf   : > { %v1057_v10 = vmax.f32 %v1055_v41, %v1056_v26  ;;  %v1084_v54 = vrot.slane %v7220_v35, 2  ;;  %v7392_v1 = vmax.f32 %v1029_v38, %v1030_v52  ;;  %v8537_v21 = vcombine.high %v7170_v62, %v7170_v62 }
  0xe0   : > { %v1062_v58 = vmax.f32 %v1060_v14, %v1061_v55  ;;  %v8538_v61 = vrot.slane %v7159_v47, 4  ;;  %v7401_v40 = vmax.f32 %v1036_v5, %v1037_v2  ;;  %v8539_v20 = vcombine.high %v7138_v13, %v7138_v13 }
  0xe1   : > { %v1088_v8 = vsel %vm1010_vm4, %v8537_v21, -inf  ;;  %v1058_v6 = vrot.slane %v1057_v10, 1  ;;  %v1085_v41 = vmax.f32 %v7220_v35, %v1084_v54  ;;  %v1109_v62 = vsel %vm1010_vm4, %v7324_v22, -inf }
  0xe2   : > { %v1097_v45 = vmax.f32 %v7159_v47, %v8538_v61  ;;  %v1089_v17 = vrot.slane %v1088_v8, 4  ;;  %v1063_v4 = vrot.slane %v1062_v58, 2  ;;  %v1102_v43 = vsel %vm1010_vm4, %v8539_v20, -inf }
  0xe3   : > { %v7411_v50 = vmax.f32 %v7228_v57, %v1079_v36  ;;  %v1086_v47 = vrot.slane %v1085_v41, 1  ;;  %v1103_v9 = vrot.slane %v1102_v43, 4  ;;  %v1110_v35 = vrot.slane %v1109_v62, 4 }
  0xe4   : > { %v1098_v3 = vrot.slane %v1097_v45, 2  ;;  %v1090_v38 = vmax.f32 %v1088_v8, %v1089_v17  ;;  %v1064_v33 = vmax.f32 %v1062_v58, %v1063_v4  ;;  %v1116_v32 = vsel %vm1010_vm4, %v909_v23, -inf }
  0xe5   : > { %v7417_v13 = vmax.f32 %v1057_v10, %v1058_v6  ;;  %v1104_v52 = vmax.f32 %v1102_v43, %v1103_v9  ;;  %v1117_v5 = vrot.slane %v1116_v32, 4  ;;  %v1111_v57 = vmax.f32 %v1109_v62, %v1110_v35 }
  0xe6   : > { %v1099_v18 = vmax.f32 %v1097_v45, %v1098_v3  ;;  %v1091_v60 = vrot.slane %v1090_v38, 2  ;;  %v1065_v26 = vrot.slane %v1064_v33, 1  ;;  %v1135_v2 = vrot.slane %v7280_v11, 1 }
  0xe7   : > { %v1105_v36 = vrot.slane %v1104_v52, 2  ;;  %v1118_v54 = vmax.f32 %v1116_v32, %v1117_v5  ;;  %v1140_v58 = vrot.slane %v7271_v49, 2  ;;  %v1087_v21 = vmax.f32 %v1085_v41, %v1086_v47 }
  0xe8   : > { %v1100_v14 = vrot.slane %v1099_v18, 1  ;;  %v1092_v55 = vmax.f32 %v1090_v38, %v1091_v60  ;;  %v1066_v22 = vmax.f32 %v1064_v33, %v1065_v26  ;;  %v1112_v10 = vrot.slane %v1111_v57, 2 }
  0xe9   : > { %v1106_v61 = vmax.f32 %v1104_v52, %v1105_v36  ;;  %v1119_v45 = vrot.slane %v1118_v54, 2  ;;  %v1141_v6 = vmax.f32 %v7271_v49, %v1140_v58  ;;  %v8540_v4 = vcombine.high %v7240_v48, %v7240_v48 }
  0xea   : > { %v7421_v23 = vmax.f32 %v1099_v18, %v1100_v14  ;;  %v1093_v8 = vrot.slane %v1092_v55, 1  ;;  %v1113_v17 = vmax.f32 %v1111_v57, %v1112_v10  ;;  %v1153_v20 = vmax.f32 %v7255_v25, %v1152_v30 }
  0xeb   : > { %v1144_v3 = vsel %vm1010_vm4, %v8540_v4, -inf  ;;  %v8541_v41 = vcombine.high %v7232_v7, %v7232_v7  ;;  %v1107_v62 = vrot.slane %v1106_v61, 1  ;;  %v1120_v47 = vmax.f32 %v1118_v54, %v1119_v45 }
  0xec   : > { %v1136_v49 = vmax.f32 %v7280_v11, %v1135_v2  ;;  %v1142_v38 = vrot.slane %v1141_v6, 1  ;;  %v1114_v9 = vrot.slane %v1113_v17, 1  ;;  %v1145_v48 = vrot.slane %v1144_v3, 4 }
  0xed   : > { %v1158_v43 = vsel %vm1010_vm4, %v8541_v41, -inf  ;;  %v1154_v33 = vrot.slane %v1153_v20, 2  ;;  %v1094_v35 = vmax.f32 %v1092_v55, %v1093_v8  ;;  %v1108_v30 = vmax.f32 %v1106_v61, %v1107_v62 }
  0xee   : > { %v1159_v18 = vrot.slane %v1158_v43, 4  ;;  %v1121_v25 = vrot.slane %v1120_v47, 1  ;;  %v1165_v7 = vsel %vm1010_vm4, %v7334_v56, -inf  ;;  %v1143_v32 = vmax.f32 %v1141_v6, %v1142_v38 }
  0xef   : > { %v1146_v60 = vmax.f32 %v1144_v3, %v1145_v48  ;;  %v1155_v52 = vmax.f32 %v1153_v20, %v1154_v33  ;;  %v1166_v26 = vrot.slane %v1165_v7, 4  ;;  %v1172_v14 = vsel %vm1010_vm4, %v943_v46, -inf }
  0xf0   : > { %v1160_v5 = vmax.f32 %v1158_v43, %v1159_v18  ;;  %v1122_v11 = vmax.f32 %v1120_v47, %v1121_v25  ;;  %v1281_v57 = vsel %vm1280_vm5, %v7388_v16, %v7377_v44  ;;  %v1115_v2 = vmax.f32 %v1113_v17, %v1114_v9 }
  0xf1   : > { %v1147_v55 = vrot.slane %v1146_v60, 2  ;;  %v1173_v54 = vrot.slane %v1172_v14, 4  ;;  %v1167_v58 = vmax.f32 %v1165_v7, %v1166_v26  ;;  %v1283_v10 = vsel %vm1282_vm7, %v7392_v1, %v1281_v57 }
  0xf2   : > { %v1161_v36 = vrot.slane %v1160_v5, 2  ;;  %v1293_v8 = vsel %vm1292_vm6, %v7244_v53, %v1066_v22  ;;  %v1300_v56 = vsel %vm1292_vm6, %v7302_v51, %v1122_v11  ;;  %v1156_v46 = vrot.slane %v1155_v52, 1 }
  0xf3   : > { %v1148_v61 = vmax.f32 %v1146_v60, %v1147_v55  ;;  %v1174_v6 = vmax.f32 %v1172_v14, %v1173_v54  ;;  %v1168_v4 = vrot.slane %v1167_v58, 2  ;;  %v1285_v44 = vsel %vm1284_vm8, %v7401_v40, %v1283_v10 }
  0xf4   : > { %v1162_v45 = vmax.f32 %v1160_v5, %v1161_v36  ;;  %v1294_v16 = vsel %vm1280_vm5, %v7411_v50, %v1293_v8  ;;  %v1301_v17 = vsel %vm1280_vm5, %v1136_v49, %v1300_v56  ;;  %v1287_v53 = vsel %vm1286_vm9, %v7374_v59, %v1285_v44 }
  0xf5   : > { %v1149_v1 = vrot.slane %v1148_v61, 1  ;;  %v1175_v20 = vrot.slane %v1174_v6, 2  ;;  %v1169_v51 = vmax.f32 %v1167_v58, %v1168_v4  ;;  %v1289_v22 = vsel %vm1288_vm10, %v7379_v34, %v1287_v53 }
  0xf6   : > { %v1163_v3 = vrot.slane %v1162_v45, 1  ;;  %v1295_v41 = vsel %vm1282_vm7, %v1087_v21, %v1294_v16  ;;  %v1302_v43 = vsel %vm1282_vm7, %v1143_v32, %v1301_v17  ;;  %v1157_v62 = vmax.f32 %v1155_v52, %v1156_v46 }
  0xf7   : > { %v1150_v40 = vmax.f32 %v1148_v61, %v1149_v1  ;;  %v1176_v47 = vmax.f32 %v1174_v6, %v1175_v20  ;;  %v1291_v50 = vsel %vm1290_vm12, %v7417_v13, %v1289_v22  ;;  %v1170_v38 = vrot.slane %v1169_v51, 1 }
  0xf8   : > { %v1164_v49 = vmax.f32 %v1162_v45, %v1163_v3  ;;  %v1296_v9 = vsel %vm1284_vm8, %v1094_v35, %v1295_v41  ;;  %v7466_v59 = vsel %vm1319_vm11, 0.0, %v1291_v50  ;;  %v977_v48 = vcombine.high %v7362_v24, %v7362_v24 }
  0xf9   : > { %v1297_v34 = vsel %vm1286_vm9, %v7421_v23, %v1296_v9  ;;  %v1303_v21 = vsel %vm1284_vm8, %v1150_v40, %v1302_v43  ;;  %v1177_v33 = vrot.slane %v1176_v47, 1  ;;  %v1171_v18 = vmax.f32 %v1169_v51, %v1170_v38  ;;  %v6653_v43 = vld [vmem:[%s8517_s3 + $0x20] sm:$0xff]  }
  0xfa   : > { %v1298_v25 = vsel %vm1288_vm10, %v1108_v30, %v1297_v34  ;;  %v1304_v13 = vsel %vm1286_vm9, %v1157_v62, %v1303_v21  ;;  %v1324_v7 = vrot.slane %v7466_v59, 1  ;;  %v1191_v23 = vrot.slane %v7343_v42, 1  ;;  %6366 = vmatprep.subr.bf16.mxu0 %v6653_v43  ;;  %v6654_v34 = vld [vmem:[%s8517_s3 + $0x28] sm:$0xff]  }
  0xfb   : > { %v7477_v35 = vsel %vm1290_vm12, %v1115_v2, %v1298_v25  ;;  %v1305_v32 = vsel %vm1288_vm10, %v1164_v49, %v1304_v13  ;;  %v1196_v60 = vrot.slane %v7326_v37, 2  ;;  %v1211_v24 = vmax.f32 %v7372_v31, %v1210_v27  ;;  %6367 = vmatpush3.bf16.msra.mxu0 %v6653_v43 }
  0xfc   : > { %v7486_v52 = vsel %vm1290_vm12, %v1171_v18, %v1305_v32  ;;  %v1325_v30 = vrot.slane %v7477_v35, 1  ;;  %v1200_v5 = vsel %vm1010_vm4, %v960_v39, -inf  ;;  %v1178_v26 = vmax.f32 %v1176_v47, %v1177_v33  ;;  %6368 = vmatprep.subr.bf16.mxu0 %v6654_v34 }
  0xfd   : > { %v1327_v11 = vrot.slane %v7486_v52, 1  ;;  %v1197_v14 = vmax.f32 %v7326_v37, %v1196_v60  ;;  %v1201_v57 = vrot.slane %v1200_v5, 4  ;;  %v1217_v31 = vrot.slane %v7386_v12, 2 }
  0xfe   : > { %v1326_v2 = vsel %vm597_vm0, %v1324_v7, %v1325_v30  ;;  %v1223_v27 = vmax.f32 %v7368_v63, %v1222_v0  ;;  %v1228_v55 = vsel %vm1010_vm4, %v977_v48, -inf  ;;  %v1192_v39 = vmax.f32 %v7343_v42, %v1191_v23 }
  0xff   : > { %v1328_v28 = vsel %vm597_vm0, %v1325_v30, %v1327_v11  ;;  %v1198_v36 = vrot.slane %v1197_v14, 1  ;;  %v1202_v54 = vmax.f32 %v1200_v5, %v1201_v57  ;;  %v1218_v37 = vmax.f32 %v7386_v12, %v1217_v31  ;;  %6369 = vmatpush3.bf16.msra.mxu0 %v6654_v34 }
 0x100   : > { %v6624_v58 = vpack.i.bf16 %v1328_v28, %v1326_v2  ;;  %v1224_v10 = vrot.slane %v1223_v27, 2  ;;  %v1229_v8 = vrot.slane %v1228_v55, 4  ;;  %v1212_v61 = vrot.slane %v1211_v24, 1 }
 0x101   : > { %v1203_v56 = vrot.slane %v1202_v54, 2  ;;  %v1307_v46 = vsel %vm1292_vm6, %v7370_v19, %v1178_v26  ;;  %v1345_v63 = vrot.slane %v7466_v59, 2  ;;  %v1199_v0 = vmax.f32 %v1197_v14, %v1198_v36 }
 0x102   : > { %6625 = vrot.lane.b32.xlu1 %v6624_v58, %s6853_s16  ;;  %v1219_v45 = vrot.slane %v1218_v37, 1  ;;  %v1225_v42 = vmax.f32 %v1223_v27, %v1224_v10  ;;  %v1230_v6 = vmax.f32 %v1228_v55, %v1229_v8  ;;  %v1308_v44 = vsel %vm1280_vm5, %v1192_v39, %v1307_v46 }
 0x103   : > { %v1204_v4 = vmax.f32 %v1202_v54, %v1203_v56  ;;  %v1346_v12 = vrot.slane %v7477_v35, 2  ;;  %v1348_v16 = vrot.slane %v7486_v52, 2  ;;  %v1213_v53 = vmax.f32 %v1211_v24, %v1212_v61 }
 0x104   : > { %v1226_v17 = vrot.slane %v1225_v42, 1  ;;  %v1231_v1 = vrot.slane %v1230_v6, 2  ;;  %v1309_v22 = vsel %vm1282_vm7, %v1199_v0, %v1308_v44  ;;  %v1220_v62 = vmax.f32 %v1218_v37, %v1219_v45  ;;  %v6655_v45 = vld [vmem:[%s8519_s5] sm:$0xff]   ;;  %v6660_v44 = vld [vmem:[%s8519_s5 + $0x28] sm:$0xff]  }
 0x105   : > { %v1205_v3 = vrot.slane %v1204_v4, 1  ;;  %v1347_v19 = vsel %vm657_vm1, %v1345_v63, %v1346_v12  ;;  %v1349_v20 = vsel %vm657_vm1, %v1346_v12, %v1348_v16  ;;  %v8542_v0 = vmov 0   ;;  %1846 = vmatpush1.bf16.msra.mxu1 %v6655_v45  ;;  %v6661_v12 = vld [vmem:[%s8519_s5 + $0x30] sm:$0xff]  }
 0x106   : > { %v1232_v51 = vmax.f32 %v1230_v6, %v1231_v1  ;;  %v6634_v41 = vpack.i.bf16 %v1349_v20, %v1347_v19  ;;  %v1227_v47 = vmax.f32 %v1225_v42, %v1226_v17  ;;  %v6656_v42 = vld [vmem:[%s8519_s5 + $0x8] sm:$0xff]   ;;  %1847 = vmatprep.subr.bf16.mxu1 %v8542_v0  ;;  %v6658_v6 = vld [vmem:[%s8519_s5 + $0x18] sm:$0xff]   ;;  %v6663_v17 = vld [vmem:[%s8519_s5 + $0x40] sm:$0xff]   ;;  %vm1568_vm2 = vcmask 517120  }
 0x107   : > { %v1206_v40 = vmax.f32 %v1204_v4, %v1205_v3  ;;  %v6659_v4 = vld [vmem:[%s8519_s5 + $0x20] sm:$0xff]   ;;  %v6664_v1 = vld [vmem:[%s8519_s5 + $0x48] sm:$0xff]   ;;  %v6665_v3 = vld [vmem:[%s8519_s5 + $0x50] sm:$0xff]   ;;  %vm2281_vm3 = vcmask 64512   ;;  %vm4979_vm4 = vcmask 130048  }
 0x108   : > { %v1233_v50 = vrot.slane %v1232_v51, 1  ;;  %6635 = vrot.lane.b32.xlu1 %v6634_v41, %s6854_s19  ;;  %v5993_v19 = vld [vmem:[%s8518_s4] ss:$0 sm:$0xff] }
 0x109   : > { %v1310_v49 = vsel %vm1284_vm8, %v1206_v40, %v1309_v22  ;;  %1848 = vmatpush1.bf16.msra.mxu1 %v6656_v42 }
 0x10a   : > { %v1234_v38 = vmax.f32 %v1232_v51, %v1233_v50  ;;  %v1311_v9 = vsel %vm1286_vm9, %v1213_v53, %v1310_v49  ;;  %1849 = vmatprep.subr.bf16.mxu1 %v8542_v0 }
 0x10b   : > { %v1312_v21 = vsel %vm1288_vm10, %v1220_v62, %v1311_v9 }
 0x10c   : > { %v1313_v48 = vsel %vm1290_vm12, %v1227_v47, %v1312_v21  ;;  %v1321_v33 = vsel %vm1319_vm11, %v1234_v38, 0.0 }
 0x10d   : > { %v1329_v18 = vrot.slane %v1313_v48, 1  ;;  %v1331_v25 = vrot.slane %v1321_v33, 1  ;;  %v1350_v13 = vrot.slane %v1313_v48, 2  ;;  %v1352_v7 = vrot.slane %v1321_v33, 2 }
 0x10f   : > { %v1330_v32 = vsel %vm597_vm0, %v1327_v11, %v1329_v18  ;;  %v1332_v23 = vsel %vm597_vm0, %v1329_v18, %v1331_v25  ;;  %v1351_v24 = vsel %vm657_vm1, %v1348_v16, %v1350_v13  ;;  %v1353_v30 = vsel %vm657_vm1, %v1350_v13, %v1352_v7  ;;  %v6662_v16 = vld [vmem:[%s8519_s5 + $0x38] sm:$0xff]  }
 0x110   : > { %v6629_v60 = vpack.i.bf16 %v1332_v23, %v1330_v32  ;;  %v6639_v5 = vpack.i.bf16 %v1353_v30, %v1351_v24 }
 0x112   : > { %6630 = vrot.lane.b32.xlu0 %v6629_v60, %s6853_s16 }
 0x116   : > { %6640 = vrot.lane.b32.xlu0 %v6639_v5, %s6854_s19 }
 0x174   : > { %v6626_v26 = vpop.permute.xlu1 %6625 }
 0x175   : > { %v6628_v14 = vunpack.i.h.bf16 %v6626_v26  ;;  %v6627_v57 = vunpack.i.l.bf16 %v6626_v26 }
 0x177   : > { %v1367_v27 = vsel %vm1366_vm13, %v7466_v59, %v6627_v57  ;;  %v1368_v55 = vsel %vm1366_vm13, %v7477_v35, %v6628_v14 }
 0x17a   : > { %v6636_v2 = vpop.permute.xlu1 %6635 }
 0x17b   : > { %v6638_v31 = vunpack.i.h.bf16 %v6636_v2  ;;  %v6637_v11 = vunpack.i.l.bf16 %v6636_v2 }
 0x17d   : > { %v1372_v28 = vsel %vm1371_vm14, %v1367_v27, %v6637_v11  ;;  %v1373_v39 = vsel %vm1371_vm14, %v1368_v55, %v6638_v31 }
 0x17e   : > { %v1376_v36 = vpack.c.bf16 %v1373_v39, %v1372_v28 }
 0x180   : > { %6370 = vmatprep.mubr.msk.bf16.mxu0 %vm1420_vm15, %v1376_v36 }
 0x184   : > { %v6631_v54 = vpop.permute.xlu0 %6630 }
 0x185   : > { %v6633_v58 = vunpack.i.h.bf16 %v6631_v54  ;;  %v6632_v37 = vunpack.i.l.bf16 %v6631_v54 }
 0x187   : > { %v1370_v61 = vsel %vm1366_vm13, %v1313_v48, %v6633_v58  ;;  %v1369_v59 = vsel %vm1366_vm13, %v7486_v52, %v6632_v37  ;;  %v6657_v52 = vld [vmem:[%s8519_s5 + $0x10] sm:$0xff]  }
 0x188   : > { %v6641_v10 = vpop.permute.xlu0 %6640  ;;  %1850 = vmatpush1.bf16.msra.mxu1 %v6657_v52 }
 0x189   : > { %v6643_v8 = vunpack.i.h.bf16 %v6641_v10  ;;  %v6642_v56 = vunpack.i.l.bf16 %v6641_v10  ;;  %1851 = vmatprep.subr.bf16.mxu1 %v8542_v0 }
 0x18b   : > { %v1374_v35 = vsel %vm1371_vm14, %v1369_v59, %v6642_v56  ;;  %v1375_v46 = vsel %vm1371_vm14, %v1370_v61, %v6643_v8 }
 0x18c   : > { %v1377_v63 = vpack.c.bf16 %v1375_v46, %v1374_v35  ;;  %1852 = vmatpush1.bf16.msra.mxu1 %v6658_v6 }
 0x18d   : > { %1853 = vmatprep.subr.bf16.mxu1 %v8542_v0 }
 0x18e   : > { %6371 = vmatmul.mubr.msk.bf16.vlgmr.msra.gmra.mrb[0].mxu0 %vm1420_vm15, %v1377_v63 }
 0x18f   : > { %2231 = vmatprep.mubr.bf16.mxu0 %v8542_v0 }
 0x190   : > { %1854 = vmatpush1.bf16.msra.mxu1 %v6659_v4 }
 0x191   : > { %1855 = vmatprep.subr.bf16.mxu1 %v8542_v0 }
 0x194   : > { %1856 = vmatpush1.bf16.msra.mxu1 %v6660_v44 }
 0x195   : > { %1857 = vmatprep.subr.bf16.mxu1 %v8542_v0 }
 0x198   : > { %1858 = vmatpush1.bf16.msra.mxu1 %v6661_v12 }
 0x199   : > { %1859 = vmatprep.subr.bf16.mxu1 %v8542_v0 }
 0x19c   : > { %1860 = vmatpush1.bf16.msra.mxu1 %v6662_v16 }
 0x19d   : > { %1861 = vmatprep.subr.bf16.mxu1 %v8542_v0 }
 0x1a0   : > { %1862 = vmatpush1.bf16.msra.mxu1 %v6663_v17 }
 0x1a1   : > { %1863 = vmatprep.subr.bf16.mxu1 %v8542_v0 }
 0x1a4   : > { %1864 = vmatpush1.bf16.msra.mxu1 %v6664_v1 }
 0x1a5   : > { %1865 = vmatprep.subr.bf16.mxu1 %v8542_v0 }
 0x1a8   : > { %1866 = vmatpush1.bf16.msra.mxu1 %v6665_v3 }
 0x1a9   : > { %1867 = vmatprep.subr.bf16.mxu1 %v8542_v0 }
 0x261   : > { %v6372_v20 = vpop.f32.mrb[0].mxu0 }
 0x262   : > { %v1470_v53 = vadd.f32 %v6372_v20, %v5993_v19  ;;  %v1461_v51 = vpop.f32.mrb[1].mxu0 }
 0x263   : > { %v1462_v22 = vadd.f32 %v5993_v19, %v1461_v51  ;;  %v6373_v41 = vpop.f32.mrb[2].mxu0 }
 0x264   : > { %v1478_v43 = vmax.f32 %v1470_v53, 0.0  ;;  %v1464_v40 = vpop.f32.mrb[3].mxu0  ;;  %v1473_v21 = vadd.f32 %v6373_v41, %v5993_v19 }
 0x265   : > { %v1476_v62 = vmax.f32 %v1462_v22, 0.0  ;;  %v1465_v55 = vadd.f32 %v5993_v19, %v1464_v40 }
 0x266   : > { %v1518_v47 = vcombine.high %v1478_v43, %v1478_v43  ;;  %v1525_v50 = vrot.slane %v1478_v43, %v7012_v29  ;;  %v1479_v14 = vmax.f32 %v1473_v21, 0.0 }
 0x267   : > { %v1484_v49 = vcombine.high %v1476_v62, %v1476_v62  ;;  %v1491_v38 = vrot.slane %v1476_v62, %v7012_v29  ;;  %v1477_v46 = vmax.f32 %v1465_v55, 0.0 }
 0x268   : > { %v1532_v9 = vrot.slane %v1518_v47, %v7012_v29  ;;  %v1533_v34 = vcombine.high %v1525_v50, %v1525_v50  ;;  %v1625_v48 = vsel %vm1568_vm2, %v1525_v50, -inf  ;;  %v1535_v10 = vcombine.high %v1479_v14, %v1479_v14 }
 0x269   : > { %v1498_v33 = vrot.slane %v1484_v49, %v7012_v29  ;;  %v1499_v18 = vcombine.high %v1491_v38, %v1491_v38  ;;  %v1569_v25 = vsel %vm1568_vm2, %v1491_v38, -inf  ;;  %v1626_v23 = vrot.slane %v1625_v48, 4 }
 0x26a   : > { %v1570_v13 = vrot.slane %v1569_v25, 4  ;;  %v1632_v7 = vsel %vm1568_vm2, %v1533_v34, -inf  ;;  %v1534_v5 = vcombine.high %v1532_v9, %v1532_v9  ;;  %v1639_v26 = vsel %vm1568_vm2, %v1532_v9, -inf }
 0x26b   : > { %v1500_v32 = vcombine.high %v1498_v33, %v1498_v33  ;;  %v1576_v24 = vsel %vm1568_vm2, %v1499_v18, -inf  ;;  %v1583_v30 = vsel %vm1568_vm2, %v1498_v33, -inf  ;;  %v1633_v57 = vrot.slane %v1632_v7, 4 }
 0x26c   : > { %v1571_v60 = vmax.f32 %v1569_v25, %v1570_v13  ;;  %v1577_v2 = vrot.slane %v1576_v24, 4  ;;  %v1584_v31 = vrot.slane %v1583_v30, 4  ;;  %v1627_v28 = vmax.f32 %v1625_v48, %v1626_v23 }
 0x26d   : > { %v1590_v11 = vsel %vm1568_vm2, %v1500_v32, -inf  ;;  %v1640_v58 = vrot.slane %v1639_v26, 4  ;;  %v1646_v37 = vsel %vm1568_vm2, %v1534_v5, -inf  ;;  %v1634_v8 = vmax.f32 %v1632_v7, %v1633_v57 }
 0x26e   : > { %v1572_v27 = vrot.slane %v1571_v60, 2  ;;  %v1578_v39 = vmax.f32 %v1576_v24, %v1577_v2  ;;  %v1585_v36 = vmax.f32 %v1583_v30, %v1584_v31  ;;  %v1591_v54 = vrot.slane %v1590_v11, 4 }
 0x26f   : > { %v1628_v63 = vrot.slane %v1627_v28, 2  ;;  %v1641_v45 = vmax.f32 %v1639_v26, %v1640_v58  ;;  %v1647_v42 = vrot.slane %v1646_v37, 4  ;;  %v1542_v52 = vrot.slane %v1479_v14, %v7012_v29 }
 0x270   : > { %v1579_v56 = vrot.slane %v1578_v39, 2  ;;  %v1586_v61 = vrot.slane %v1585_v36, 2  ;;  %v1592_v59 = vmax.f32 %v1590_v11, %v1591_v54  ;;  %v1573_v35 = vmax.f32 %v1571_v60, %v1572_v27 }
 0x271   : > { %v1635_v6 = vrot.slane %v1634_v8, 2  ;;  %v1549_v12 = vrot.slane %v1535_v10, %v7012_v29  ;;  %v1550_v17 = vcombine.high %v1542_v52, %v1542_v52  ;;  %v1501_v1 = vcombine.high %v1477_v46, %v1477_v46 }
 0x272   : > { %v1580_v0 = vmax.f32 %v1578_v39, %v1579_v56  ;;  %v1587_v4 = vmax.f32 %v1585_v36, %v1586_v61  ;;  %v1593_v44 = vrot.slane %v1592_v59, 2  ;;  %v1574_v16 = vrot.slane %v1573_v35, 1 }
 0x273   : > { %v7607_v3 = vmax.f32 %v1627_v28, %v1628_v63  ;;  %v1551_v20 = vcombine.high %v1549_v12, %v1549_v12  ;;  %v1653_v53 = vsel %vm1568_vm2, %v1542_v52, -inf  ;;  %v1642_v51 = vrot.slane %v1641_v45, 2 }
 0x274   : > { %v1581_v19 = vrot.slane %v1580_v0, 1  ;;  %v1648_v22 = vmax.f32 %v1646_v37, %v1647_v42  ;;  %v1660_v41 = vsel %vm1568_vm2, %v1550_v17, -inf  ;;  %v1508_v43 = vrot.slane %v1477_v46, %v7012_v29 }
 0x275   : > { %v7612_v40 = vmax.f32 %v1634_v8, %v1635_v6  ;;  %v1588_v62 = vrot.slane %v1587_v4, 1  ;;  %v1594_v47 = vmax.f32 %v1592_v59, %v1593_v44  ;;  %v1667_v50 = vsel %vm1568_vm2, %v1549_v12, -inf }
 0x276   : > { %v1575_v49 = vmax.f32 %v1573_v35, %v1574_v16  ;;  %v1654_v38 = vrot.slane %v1653_v53, 4  ;;  %v1674_v9 = vsel %vm1568_vm2, %v1551_v20, -inf  ;;  %v1515_v34 = vrot.slane %v1501_v1, %v7012_v29 }
 0x277   : > { %v1582_v21 = vmax.f32 %v1580_v0, %v1581_v19  ;;  %v1661_v48 = vrot.slane %v1660_v41, 4  ;;  %v1675_v33 = vrot.slane %v1674_v9, 4  ;;  %v1516_v18 = vcombine.high %v1508_v43, %v1508_v43 }
 0x278   : > { %v1668_v25 = vrot.slane %v1667_v50, 4  ;;  %v1517_v13 = vcombine.high %v1515_v34, %v1515_v34  ;;  %v1597_v7 = vsel %vm1568_vm2, %v1508_v43, -inf  ;;  %v1611_v32 = vsel %vm1568_vm2, %v1515_v34, -inf }
 0x279   : > { %v1589_v23 = vmax.f32 %v1587_v4, %v1588_v62  ;;  %v1595_v60 = vrot.slane %v1594_v47, 1  ;;  %v1676_v24 = vmax.f32 %v1674_v9, %v1675_v33  ;;  %v1598_v30 = vrot.slane %v1597_v7, 4 }
 0x27a   : > { %v1655_v5 = vmax.f32 %v1653_v53, %v1654_v38  ;;  %v1604_v26 = vsel %vm1568_vm2, %v1516_v18, -inf  ;;  %v1612_v14 = vrot.slane %v1611_v32, 4  ;;  %v1618_v57 = vsel %vm1568_vm2, %v1517_v13, -inf }
 0x27b   : > { %v1722_v2 = vsel %vm1280_vm5, %v1582_v21, %v1575_v49  ;;  %v1662_v31 = vmax.f32 %v1660_v41, %v1661_v48  ;;  %v1677_v11 = vrot.slane %v1676_v24, 2  ;;  %v1599_v27 = vmax.f32 %v1597_v7, %v1598_v30  ;;  %v6666_v7 = vld [vmem:[%s8519_s5 + $0x58] sm:$0xff]  }
 0x27c   : > { %v1669_v55 = vmax.f32 %v1667_v50, %v1668_v25  ;;  %v1605_v28 = vrot.slane %v1604_v26, 4  ;;  %v1613_v39 = vmax.f32 %v1611_v32, %v1612_v14  ;;  %v1619_v36 = vrot.slane %v1618_v57, 4  ;;  %1868 = vmatpush1.bf16.msra.mxu1 %v6666_v7 }
 0x27d   : > { %v1643_v54 = vmax.f32 %v1641_v45, %v1642_v51  ;;  %v1649_v58 = vrot.slane %v1648_v22, 2  ;;  %v1596_v37 = vmax.f32 %v1594_v47, %v1595_v60  ;;  %v1600_v10 = vrot.slane %v1599_v27, 2 }
 0x27e   : > { %v1656_v8 = vrot.slane %v1655_v5, 2  ;;  %v1606_v56 = vmax.f32 %v1604_v26, %v1605_v28  ;;  %v1614_v61 = vrot.slane %v1613_v39, 2  ;;  %v1620_v59 = vmax.f32 %v1618_v57, %v1619_v36 }
 0x27f   : > { %v1723_v35 = vsel %vm1282_vm7, %v1589_v23, %v1722_v2  ;;  %v1663_v46 = vrot.slane %v1662_v31, 2  ;;  %v1601_v63 = vmax.f32 %v1599_v27, %v1600_v10  ;;  %v1678_v0 = vmax.f32 %v1676_v24, %v1677_v11 }
 0x280   : > { %v1670_v42 = vrot.slane %v1669_v55, 2  ;;  %v1607_v52 = vrot.slane %v1606_v56, 2  ;;  %v1615_v6 = vmax.f32 %v1613_v39, %v1614_v61  ;;  %v1621_v4 = vrot.slane %v1620_v59, 2 }
 0x281   : > { %v1630_v44 = vrot.slane %v7607_v3, 1  ;;  %v1637_v45 = vrot.slane %v7612_v40, 1  ;;  %v1650_v12 = vmax.f32 %v1648_v22, %v1649_v58  ;;  %v1602_v16 = vrot.slane %v1601_v63, 1 }
 0x282   : > { %v1657_v17 = vmax.f32 %v1655_v5, %v1656_v8  ;;  %v1608_v1 = vmax.f32 %v1606_v56, %v1607_v52  ;;  %v1622_v19 = vmax.f32 %v1620_v59, %v1621_v4  ;;  %v1724_v20 = vsel %vm1284_vm8, %v1596_v37, %v1723_v35 }
 0x283   : > { %v1664_v53 = vmax.f32 %v1662_v31, %v1663_v46  ;;  %v1603_v51 = vmax.f32 %v1601_v63, %v1602_v16  ;;  %v1616_v41 = vrot.slane %v1615_v6, 1  ;;  %v1679_v43 = vrot.slane %v1678_v0, 1 }
 0x284   : > { %v1644_v62 = vrot.slane %v1643_v54, 1  ;;  %v1671_v47 = vmax.f32 %v1669_v55, %v1670_v42  ;;  %v1609_v50 = vrot.slane %v1608_v1, 1  ;;  %v1623_v49 = vrot.slane %v1622_v19, 1 }
 0x285   : > { %v1651_v38 = vrot.slane %v1650_v12, 1  ;;  %v1725_v9 = vsel %vm1286_vm9, %v1603_v51, %v1724_v20  ;;  %v1631_v34 = vmax.f32 %v7607_v3, %v1630_v44  ;;  %v1658_v22 = vrot.slane %v1657_v17, 1  ;;  %v6669_v44 = vld [vmem:[%s8521_s7 + $0x4] ss:$12 sps:$4 sm:$0xff]   ;;  %v6677_v20 = vld [vmem:[%s8521_s7 + $0x34] ss:$12 sps:$4 sm:$0xff]  }
 0x286   : > { %v1610_v21 = vmax.f32 %v1608_v1, %v1609_v50  ;;  %v1624_v48 = vmax.f32 %v1622_v19, %v1623_v49  ;;  %v1638_v33 = vmax.f32 %v7612_v40, %v1637_v45  ;;  %v1665_v18 = vrot.slane %v1664_v53, 1  ;;  %v6667_v45 = vld [vmem:[%s8521_s7] ss:$12 sps:$4 sm:$0xff]   ;;  %2199 = vmatprep.subr.bf16.mxu0 %v6669_v44  ;;  %v6671_v1 = vld [vmem:[%s8521_s7 + $0x18] ss:$12 sps:$4 sm:$0xff]  }
 0x287   : > { %v1617_v25 = vmax.f32 %v1615_v6, %v1616_v41  ;;  %v1680_v13 = vmax.f32 %v1678_v0, %v1679_v43  ;;  %v1645_v32 = vmax.f32 %v1643_v54, %v1644_v62  ;;  %v1672_v23 = vrot.slane %v1671_v47, 1  ;;  %2200 = vmatpush1.bf16.msra.mxu0 %v6667_v45  ;;  %v6674_v19 = vld [vmem:[%s8521_s7 + $0x20] ss:$12 sps:$4 sm:$0xff]   ;;  %v6678_v51 = vld [vmem:[%s8521_s7 + $0x38] ss:$12 sps:$4 sm:$0xff]  }
 0x288   : > { %v1728_v60 = vsel %vm1292_vm6, %v1631_v34, %v1624_v48  ;;  %v1726_v24 = vsel %vm1288_vm10, %v1610_v21, %v1725_v9  ;;  %v1652_v30 = vmax.f32 %v1650_v12, %v1651_v38  ;;  %v1659_v40 = vmax.f32 %v1657_v17, %v1658_v22  ;;  %v6670_v12 = vld [vmem:[%s8521_s7 + $0x8] ss:$12 sps:$4 sm:$0xff]   ;;  %v6681_v41 = vld [vmem:[%s8521_s7 + $0x4c] ss:$12 sps:$4 sm:$0xff]   ;;  %v6682_v62 = vld [vmem:[%s8521_s7 + $0x50] ss:$12 sps:$4 sm:$0xff]  }
 0x289   : > { %v1727_v3 = vsel %vm1290_vm12, %v1617_v25, %v1726_v24  ;;  %v1729_v5 = vsel %vm1280_vm5, %v1638_v33, %v1728_v60  ;;  %v1666_v14 = vmax.f32 %v1664_v53, %v1665_v18  ;;  %v1739_v2 = vsel %vm1319_vm11, %v1680_v13, 0.0  ;;  %v6673_v17 = vld [vmem:[%s8521_s7 + $0x1c] ss:$12 sps:$4 sm:$0xff]   ;;  %v6683_v50 = vld [vmem:[%s8521_s7 + $0x60] ss:$12 sps:$4 sm:$0xff]  }
 0x28a   : > { %v1730_v26 = vsel %vm1282_vm7, %v1645_v32, %v1729_v5  ;;  %v1673_v31 = vmax.f32 %v1671_v47, %v1672_v23  ;;  %v1738_v27 = vsel %vm1319_vm11, 0.0, %v1727_v3  ;;  %v1745_v39 = vrot.slane %v1739_v2, 1  ;;  %2201 = vmatprep.subr.bf16.mxu0 %v6673_v17  ;;  %v6675_v53 = vld [vmem:[%s8521_s7 + $0x30] ss:$12 sps:$4 sm:$0xff]   ;;  %v6679_v43 = vld [vmem:[%s8521_s7 + $0x48] ss:$12 sps:$4 sm:$0xff]  }
 0x28b   : > { %v1731_v57 = vsel %vm1284_vm8, %v1652_v30, %v1730_v26  ;;  %v1756_v36 = vrot.slane %v1739_v2, 2  ;;  %v1753_v54 = vrot.slane %v1738_v27, 2  ;;  %v1742_v37 = vrot.slane %v1738_v27, 1  ;;  %2202 = vmatpush1.bf16.msra.mxu0 %v6671_v1  ;;  %v6685_v47 = vld [vmem:[%s8521_s7 + $0x64] ss:$12 sps:$4 sm:$0xff]  }
 0x28c   : > { %v1732_v11 = vsel %vm1286_vm9, %v1659_v40, %v1731_v57  ;;  %v6855_v16 = vmov 0.0   ;;  %2203 = vmatprep.subr.bf16.mxu0 %v6677_v20  ;;  %v6686_v49 = vld [vmem:[%s8521_s7 + $0x68] ss:$12 sps:$4 sm:$0xff]   ;;  %v6687_v9 = vld [vmem:[%s8521_s7 + $0x78] ss:$12 sps:$4 sm:$0xff]   ;;  %vm4995_vm11 = vcmask 719872  }
 0x28d   : > { %v1733_v55 = vsel %vm1288_vm10, %v1666_v14, %v1732_v11  ;;  %6374 = vmatprep.subr.bf16.mxu1 %v6855_v16  ;;  %v6689_v38 = vld [vmem:[%s8521_s7 + $0x7c] ss:$12 sps:$4 sm:$0xff]   ;;  %v6690_v34 = vld [vmem:[%s8521_s7 + $0x80] ss:$12 sps:$4 sm:$0xff]   ;;  %v6694_v48 = vld [vmem:[%s8521_s7 + $0x98] ss:$12 sps:$4 sm:$0xff]  }
 0x28e   : > { %v1734_v28 = vsel %vm1290_vm12, %v1673_v31, %v1733_v55  ;;  %v6693_v22 = vld [vmem:[%s8521_s7 + $0x94] ss:$12 sps:$4 sm:$0xff]   ;;  %v6691_v21 = vld [vmem:[%s8521_s7 + $0x90] ss:$12 sps:$4 sm:$0xff]   ;;  %v6697_v33 = vld [vmem:[%s8521_s7 + $0xac] ss:$12 sps:$4 sm:$0xff]  }
 0x28f   : > { %v1754_v58 = vrot.slane %v1734_v28, 2  ;;  %v1743_v10 = vrot.slane %v1734_v28, 1  ;;  %2204 = vmatpush1.bf16.msra.mxu0 %v6675_v53  ;;  %v6695_v18 = vld [vmem:[%s8521_s7 + $0xa8] ss:$12 sps:$4 sm:$0xff]   ;;  %v6698_v25 = vld [vmem:[%s8521_s7 + $0xb0] ss:$12 sps:$4 sm:$0xff]  }
 0x290   : > { %2205 = vmatprep.subr.bf16.mxu0 %v6681_v41  ;;  %v6002_v13 = vld [vmem:[%s8520_s6] ss:$0 sm:$0xff]  ;;  %vm5000_vm2 = vcmask 916480  }
 0x291   : > { %v1755_v8 = vsel %vm657_vm1, %v1753_v54, %v1754_v58  ;;  %v1757_v56 = vsel %vm657_vm1, %v1754_v58, %v1756_v36  ;;  %v1744_v61 = vsel %vm597_vm0, %v1742_v37, %v1743_v10  ;;  %v1746_v59 = vsel %vm597_vm0, %v1743_v10, %v1745_v39 }
 0x292   : > { %v1763_v35 = vpack.c.bf16 %v1757_v56, %v1755_v8  ;;  %v6644_v46 = vpack.i.bf16 %v1746_v59, %v1744_v61  ;;  %vm6856_vm0 = vmmov 0   ;;  %vm1932_vm1 = vcmask 1041408  }
 0x293   : > { %2206 = vmatpush1.bf16.msra.mxu0 %v6679_v43 }
 0x294   : > { %6015 = vmatprep.mubr.msk.bf16.mxu1 %vm1371_vm14, %v1763_v35  ;;  %6645 = vrot.lane.b32.xlu1 %v6644_v46, %s6854_s19 }
 0x295   : > { %2207 = vmatprep.subr.bf16.mxu0 %v6685_v47 }
 0x297   : > { %2208 = vmatpush1.bf16.msra.mxu0 %v6683_v50 }
 0x298   : > { %2209 = vmatprep.subr.bf16.mxu0 %v6689_v38 }
 0x29b   : > { %2210 = vmatpush1.bf16.msra.mxu0 %v6687_v9 }
 0x29c   : > { %2211 = vmatprep.subr.bf16.mxu0 %v6693_v22 }
 0x29f   : > { %2212 = vmatpush1.bf16.msra.mxu0 %v6691_v21 }
 0x2a0   : > { %2213 = vmatprep.subr.bf16.mxu0 %v6697_v33 }
 0x2a3   : > { %2214 = vmatpush1.bf16.msra.mxu0 %v6695_v18 }
 0x2a4   : > { %6394 = vmatprep.subr.mxu0 %v6855_v16 }
 0x306   : > { %v6646_v63 = vpop.permute.xlu1 %6645 }
 0x307   : > { %v6648_v0 = vunpack.i.h.bf16 %v6646_v63  ;;  %v6647_v42 = vunpack.i.l.bf16 %v6646_v63 }
 0x309   : > { %v1760_v52 = vsel %vm1371_vm14, %v1738_v27, %v6647_v42  ;;  %v1761_v6 = vsel %vm1371_vm14, %v1734_v28, %v6648_v0 }
 0x30a   : > { %v1762_v4 = vpack.c.bf16 %v1761_v6, %v1760_v52 }
 0x30c   : > { %1878 = vmatmul.mubr.bf16.vlgmr.msra.gmra.mrb[0].mxu1 %v1762_v4 }
 0x30d   : > { %6375 = vmatpush3.bf16.msra.mxu1 %v6670_v12  ;;  %6390 = vmatprep.mubr.msk.bf16.mxu1 %vm6856_vm0, %v6855_v16 }
 0x30e   : > { %6376 = vmatprep.subr.bf16.mxu1 %v6855_v16 }
 0x311   : > { %6377 = vmatpush3.bf16.msra.mxu1 %v6674_v19 }
 0x312   : > { %6378 = vmatprep.subr.bf16.mxu1 %v6855_v16 }
 0x315   : > { %6379 = vmatpush3.bf16.msra.mxu1 %v6678_v51 }
 0x316   : > { %6380 = vmatprep.subr.bf16.mxu1 %v6855_v16 }
 0x319   : > { %6381 = vmatpush3.bf16.msra.mxu1 %v6682_v62 }
 0x31a   : > { %6382 = vmatprep.subr.bf16.mxu1 %v6855_v16 }
 0x31d   : > { %6383 = vmatpush3.bf16.msra.mxu1 %v6686_v49 }
 0x31e   : > { %6384 = vmatprep.subr.bf16.mxu1 %v6855_v16 }
 0x321   : > { %6385 = vmatpush3.bf16.msra.mxu1 %v6690_v34 }
 0x322   : > { %6386 = vmatprep.subr.bf16.mxu1 %v6855_v16 }
 0x325   : > { %6387 = vmatpush3.bf16.msra.mxu1 %v6694_v48 }
 0x326   : > { %6388 = vmatprep.subr.bf16.mxu1 %v6855_v16 }
 0x329   : > { %6389 = vmatpush3.bf16.msra.mxu1 %v6698_v25 }
 0x32a   : > { %6429 = vmatprep.subr.mxu1 %v6855_v16 }
 0x3df   : > { %v1879_v7 = vpop.f32.mrb[0].mxu1 }
 0x3e0   : > { %v1880_v32 = vadd.f32 %v6002_v13, %v1879_v7  ;;  %v1881_v23 = vpop.f32.mrb[1].mxu1 }
 0x3e1   : > { %v1882_v60 = vpop.f32.mrb[2].mxu1 }
 0x3e2   : > { %v1886_v24 = vmax.f32 %v1880_v32, 0.0  ;;  %v1883_v30 = vadd.f32 %v6002_v13, %v1882_v60  ;;  %v1884_v3 = vpop.f32.mrb[3].mxu1 }
 0x3e4   : > { %v1890_v5 = vcombine.high %v1886_v24, %v1886_v24  ;;  %v1897_v40 = vrot.slane %v1886_v24, %v7012_v29  ;;  %v1887_v26 = vmax.f32 %v1883_v30, 0.0 }
 0x3e6   : > { %v1904_v14 = vrot.slane %v1890_v5, %v7012_v29  ;;  %v1905_v57 = vcombine.high %v1897_v40, %v1897_v40  ;;  %v1933_v2 = vsel %vm1932_vm1, %v1897_v40, -inf  ;;  %v1907_v31 = vcombine.high %v1887_v26, %v1887_v26 }
 0x3e7   : > { %v1934_v11 = vrot.slane %v1933_v2, 4  ;;  %v1914_v27 = vrot.slane %v1887_v26, %v7012_v29 }
 0x3e8   : > { %v1906_v55 = vcombine.high %v1904_v14, %v1904_v14  ;;  %v1940_v28 = vsel %vm1932_vm1, %v1905_v57, -inf  ;;  %v1947_v39 = vsel %vm1932_vm1, %v1904_v14, -inf  ;;  %v1921_v36 = vrot.slane %v1907_v31, %v7012_v29 }
 0x3e9   : > { %v1935_v54 = vmax.f32 %v1933_v2, %v1934_v11  ;;  %v1941_v58 = vrot.slane %v1940_v28, 4  ;;  %v1948_v37 = vrot.slane %v1947_v39, 4  ;;  %v1922_v10 = vcombine.high %v1914_v27, %v1914_v27 }
 0x3ea   : > { %v1954_v8 = vsel %vm1932_vm1, %v1906_v55, -inf  ;;  %v1923_v56 = vcombine.high %v1921_v36, %v1921_v36  ;;  %v1961_v61 = vsel %vm1932_vm1, %v1914_v27, -inf  ;;  %v1975_v59 = vsel %vm1932_vm1, %v1921_v36, -inf }
 0x3eb   : > { %v1936_v35 = vrot.slane %v1935_v54, 2  ;;  %v1942_v46 = vmax.f32 %v1940_v28, %v1941_v58  ;;  %v1949_v63 = vmax.f32 %v1947_v39, %v1948_v37  ;;  %v1955_v0 = vrot.slane %v1954_v8, 4 }
 0x3ec   : > { %v1962_v42 = vrot.slane %v1961_v61, 4  ;;  %v1968_v52 = vsel %vm1932_vm1, %v1922_v10, -inf  ;;  %v1976_v6 = vrot.slane %v1975_v59, 4  ;;  %v1982_v29 = vsel %vm1932_vm1, %v1923_v56, -inf }
 0x3ed   : > { %v1937_v4 = vmax.f32 %v1935_v54, %v1936_v35  ;;  %v1943_v44 = vrot.slane %v1942_v46, 2  ;;  %v1950_v45 = vrot.slane %v1949_v63, 2  ;;  %v1956_v12 = vmax.f32 %v1954_v8, %v1955_v0 }
 0x3ee   : > { %v1963_v17 = vmax.f32 %v1961_v61, %v1962_v42  ;;  %v1969_v1 = vrot.slane %v1968_v52, 4  ;;  %v1977_v19 = vmax.f32 %v1975_v59, %v1976_v6  ;;  %v1983_v20 = vrot.slane %v1982_v29, 4 }
 0x3ef   : > { %v1938_v53 = vrot.slane %v1937_v4, 1  ;;  %v1944_v51 = vmax.f32 %v1942_v46, %v1943_v44  ;;  %v1951_v41 = vmax.f32 %v1949_v63, %v1950_v45  ;;  %v1957_v43 = vrot.slane %v1956_v12, 2  ;;  %v2029_v44 = vld [vmem:[%s8522_s8] sm:$0x7] }
 0x3f0   : > { %v1964_v62 = vrot.slane %v1963_v17, 2  ;;  %v1970_v47 = vmax.f32 %v1968_v52, %v1969_v1  ;;  %v1978_v50 = vrot.slane %v1977_v19, 2  ;;  %v1984_v49 = vmax.f32 %v1982_v29, %v1983_v20 }
 0x3f1   : > { %v7750_v38 = vmax.f32 %v1937_v4, %v1938_v53  ;;  %v1945_v9 = vrot.slane %v1944_v51, 1  ;;  %v1952_v34 = vrot.slane %v1951_v41, 1  ;;  %v1958_v22 = vmax.f32 %v1956_v12, %v1957_v43 }
 0x3f2   : > { %v1965_v21 = vmax.f32 %v1963_v17, %v1964_v62  ;;  %v1971_v48 = vrot.slane %v1970_v47, 2  ;;  %v1979_v33 = vmax.f32 %v1977_v19, %v1978_v50  ;;  %v1985_v18 = vrot.slane %v1984_v49, 2 }
 0x3f3   : > { %v7752_v25 = vmax.f32 %v1944_v51, %v1945_v9  ;;  %v7754_v13 = vmax.f32 %v1951_v41, %v1952_v34  ;;  %v1959_v7 = vrot.slane %v1958_v22, 1  ;;  %v1989_v32 = vpack.c.bf16 %v7750_v38, %v7750_v38 }
 0x3f4   : > { %v1966_v23 = vrot.slane %v1965_v21, 1  ;;  %v1972_v60 = vmax.f32 %v1970_v47, %v1971_v48  ;;  %v1980_v24 = vrot.slane %v1979_v33, 1  ;;  %v1986_v30 = vmax.f32 %v1984_v49, %v1985_v18 }
 0x3f5   : > { %v7758_v3 = vmax.f32 %v1958_v22, %v1959_v7  ;;  %v1990_v5 = vpack.c.bf16 %v7752_v25, %v7752_v25  ;;  %v1991_v40 = vpack.c.bf16 %v7754_v13, %v7754_v13  ;;  %v2054_v11 = vunpack.c.l.b16 %v1989_v32 }
 0x3f6   : > { %v7764_v26 = vmax.f32 %v1965_v21, %v1966_v23  ;;  %v1973_v14 = vrot.slane %v1972_v60, 1  ;;  %v7766_v57 = vmax.f32 %v1979_v33, %v1980_v24  ;;  %v1987_v2 = vrot.slane %v1986_v30, 1 }
 0x3f7   : > { %v1992_v31 = vpack.c.bf16 %v7758_v3, %v7758_v3  ;;  %v2055_v27 = vunpack.c.l.b16 %v1990_v5  ;;  %v2056_v55 = vunpack.c.l.b16 %v1991_v40  ;;  %v2033_v4 = vsub.s32 0, %v6970_v15 }
 0x3f8   : > { %v7770_v28 = vmax.f32 %v1972_v60, %v1973_v14  ;;  %v7772_v39 = vmax.f32 %v1986_v30, %v1987_v2  ;;  %v1993_v36 = vpack.c.bf16 %v7764_v26, %v7764_v26  ;;  %v1995_v37 = vpack.c.bf16 %v7766_v57, %v7766_v57 }
 0x3f9   : > { %v2057_v54 = vunpack.c.l.b16 %v1992_v31  ;;  %v2062_v58 = vsel %vm1292_vm6, %v2055_v27, %v2054_v11  ;;  %v2037_v45 = vsub.s32 1, %v6970_v15  ;;  %v2034_v12 = vrot.slane %v2029_v44, %v2033_v4 }
 0x3fa   : > { %v1994_v10 = vpack.c.bf16 %v7770_v28, %v7770_v28  ;;  %v1996_v8 = vpack.c.bf16 %v7772_v39, %v7772_v39  ;;  %v2058_v56 = vunpack.c.l.b16 %v1993_v36  ;;  %v2063_v61 = vsel %vm1280_vm5, %v2056_v55, %v2062_v58 }
 0x3fb   : > { %v2064_v35 = vsel %vm1282_vm7, %v2057_v54, %v2063_v61  ;;  %v2060_v46 = vunpack.c.l.b16 %v1995_v37  ;;  %v2041_v17 = vsub.s32 2, %v6970_v15  ;;  %v2038_v1 = vrot.slane %v2029_v44, %v2037_v45 }
 0x3fc   : > { %v2059_v59 = vunpack.c.l.b16 %v1994_v10  ;;  %v2065_v63 = vsel %vm1284_vm8, %v2058_v56, %v2064_v35  ;;  %v2061_v0 = vunpack.c.l.b16 %v1996_v8  ;;  %vm4981_vm5 = vcmask 195584  }
 0x3fd   : > { %v2042_v43 = vrot.slane %v2029_v44, %v2041_v17  ;;  %vm4984_vm6 = vcmask 326656   ;;  %vm4986_vm7 = vcmask 392192   ;;  %vm4988_vm8 = vcmask 457728  }
 0x3fe   : > { %v2066_v42 = vsel %vm1286_vm9, %v2059_v59, %v2065_v63  ;;  %vm4991_vm9 = vcmask 588800  }
 0x3ff   : > { %v2067_v52 = vsel %vm1288_vm10, %v2060_v46, %v2066_v42  ;;  %vm4993_vm10 = vcmask 654336  }
 0x400   : > { %v2068_v6 = vsel %vm1290_vm12, %v2061_v0, %v2067_v52  ;;  %vm4998_vm12 = vcmask 850944  }
 0x401   : > { %v2069_v29 = vpack.c.b16 %v2068_v6, %v2068_v6 }
 0x403   : > { %2232 = vmatmul.mubr.bf16.vlgmr.msra.gmra.mrb[4].mxu0 %v2069_v29  ;;  %6391 = vmatmul.mubr.bf16.vlgmr.msra.gmra.mrb[4].mxu1 %v2069_v29 }
 0x404   : > { %6396 = vmatprep.mubr.msk.f32.mxu0 %vm6856_vm0, %v6855_v16  ;;  %6431 = vmatprep.mubr.msk.f32.mxu1 %vm6856_vm0, %v6855_v16 }
 0x4d6   : > { %v2233_v19 = vpop.f32.mrb[4].mxu0  ;;  %v2274_v20 = vpop.f32.mrb[4].mxu1 }
 0x4d7   : > { %v2234_v53 = vadd.f32 %v2233_v19, %v2034_v12  ;;  %v2235_v51 = vpop.f32.mrb[5].mxu0  ;;  %v6392_v41 = vpop.f32.mrb[5].mxu1  ;;  %v7806_v15 = vadd.f32 %v2274_v20, %v2042_v43 }
 0x4d8   : > { %v7799_v62 = vadd.f32 %v2235_v51, %v2038_v1  ;;  %v2237_v47 = vpop.f32.mrb[6].mxu0  ;;  %v2277_v50 = vpop.f32.mrb[6].mxu1 }
 0x4d9   : > { %v2238_v49 = vpop.f32.mrb[7].mxu0  ;;  %v6393_v9 = vpop.f32.mrb[7].mxu1  ;;  %v7803_v34 = vmul.f32 0.35355338, %v2234_v53 }
 0x4da   : > { %6395 = vmatpush3.xpose.msk.msra.mxu0 %vm2281_vm3, %v7799_v62 }
 0x4db   : > { %6399 = vmatprep.subr.mxu0 %v6855_v16 }
 0x4dd   : > { %6397 = vmatmul.mubr.msk.f32.vlgmr.msra.gmra.mrb[8].mxu0 %vm2281_vm3, %v7803_v34 }
 0x4de   : > { %6400 = vmatpush3.msra.mxu0 %v7806_v15  ;;  %6401 = vmatprep.mubr.msk.f32.mxu0 %vm6856_vm0, %v6855_v16 }
 0x4df   : > { %6404 = vmatprep.subr.mxu0 %v6855_v16 }
 0x5b0   : > { %v2354_v22 = vpop.f32.mrb[8].mxu0 }
 0x5b1   : > { %v6398_v21 = vpop.f32.mrb[9].mxu0  ;;  %v2358_v48 = vsel %vm2281_vm3, %v2354_v22, -inf }
 0x5b2   : > { %2359 = vmax.xlane.f32.xlu0 %v2358_v48 }
 0x5c8   : > { %2444 = vrot.lane.b32.xlu0 %v7799_v62, %s8533_s29 }
 0x63f   : > { %v2360_v33 = vpop.xlane.xlu0 %2359 }
 0x640   : > { %v2361_v18 = vsub.f32 %v2354_v22, %v2360_v33 }
 0x642   : > { %v2362_v7 = vmul.f32 1.442695, %v2361_v18 }
 0x643   : > { %v2445_v5 = vpop.permute.xlu0 %2444 }
 0x644   : > { %6779 = vpow2.f32 %v2362_v7 }
 0x64e   : > { %v6780_v32 = vpop.eup %6779 }
 0x64f   : > { %v2364_v23 = vsel %vm2281_vm3, %v6780_v32, 0.0 }
 0x650   : > { %2365 = vadd.xlane.f32.xlu1 %v2364_v23 }
 0x661   : > { %2442 = vrot.lane.b32.xlu1 %v7803_v34, %s8533_s29 }
 0x6dd   : > { %v2366_v60 = vpop.xlane.xlu1 %2365 }
 0x6de   : > { %6781 = vrcp.f32 %v2366_v60 }
 0x6e1   : > { %v2443_v40 = vpop.permute.xlu1 %2442 }
 0x6e8   : > { %v6782_v24 = vpop.eup %6781 }
 0x6e9   : > { %v2368_v30 = vmul.f32 %v6782_v24, %v6780_v32 }
 0x6eb   : > { %6402 = vmatmul.mubr.msk.f32.vlgmr.msra.gmra.mrb[10].mxu0 %vm2281_vm3, %v2368_v30 }
 0x6ec   : > { %6405 = vmatpush3.xpose.msk.msra.mxu0 %vm2281_vm3, %v2445_v5  ;;  %6406 = vmatprep.mubr.msk.f32.mxu0 %vm6856_vm0, %v6855_v16 }
 0x6ed   : > { %6409 = vmatprep.subr.mxu0 %v6855_v16 }
 0x6ef   : > { %6407 = vmatmul.mubr.msk.f32.vlgmr.msra.gmra.mrb[12].mxu0 %vm2281_vm3, %v2443_v40 }
 0x6f0   : > { %6411 = vmatprep.mubr.msk.f32.mxu0 %vm6856_vm0, %v6855_v16 }
 0x7be   : > { %v7828_v14 = vpop.f32.mrb[10].mxu0 }
 0x7bf   : > { %v6403_v2 = vpop.f32.mrb[11].mxu0 }
 0x7c2   : > { %v2516_v31 = vpop.f32.mrb[12].mxu0 }
 0x7c3   : > { %v6408_v11 = vpop.f32.mrb[13].mxu0  ;;  %v2520_v27 = vsel %vm2281_vm3, %v2516_v31, -inf }
 0x7c4   : > { %2521 = vmax.xlane.f32.xlu0 %v2520_v27 }
 0x7da   : > { %2532 = vrot.lane.b32.xlu0 %v7806_v15, %s8533_s29  ;;  %s6869_s29 = smov 8  }
 0x7de   : > { %2608 = vrot.lane.b32.xlu0 %v7803_v34, %s6858_s30 }
 0x851   : > { %v2522_v55 = vpop.xlane.xlu0 %2521 }
 0x852   : > { %v2523_v36 = vsub.f32 %v2516_v31, %v2522_v55 }
 0x854   : > { %v2524_v54 = vmul.f32 1.442695, %v2523_v36 }
 0x855   : > { %v2533_v58 = vpop.permute.xlu0 %2532 }
 0x856   : > { %6783 = vpow2.f32 %v2524_v54  ;;  %6410 = vmatpush3.msra.mxu0 %v2533_v58 }
 0x857   : > { %6414 = vmatprep.subr.mxu0 %v6855_v16 }
 0x859   : > { %v2609_v35 = vpop.permute.xlu0 %2608 }
 0x860   : > { %v6784_v37 = vpop.eup %6783 }
 0x861   : > { %v2526_v10 = vsel %vm2281_vm3, %v6784_v37, 0.0 }
 0x862   : > { %2527 = vadd.xlane.f32.xlu1 %v2526_v10 }
 0x873   : > { %2610 = vrot.lane.b32.xlu1 %v7799_v62, %s6858_s30 }
 0x8ef   : > { %v2528_v8 = vpop.xlane.xlu1 %2527 }
 0x8f0   : > { %6785 = vrcp.f32 %v2528_v8 }
 0x8f3   : > { %v2611_v59 = vpop.permute.xlu1 %2610 }
 0x8fa   : > { %v6786_v56 = vpop.eup %6785 }
 0x8fb   : > { %v2530_v61 = vmul.f32 %v6786_v56, %v6784_v37 }
 0x8fd   : > { %6412 = vmatmul.mubr.msk.f32.vlgmr.msra.gmra.mrb[14].mxu0 %vm2281_vm3, %v2530_v61 }
 0x8fe   : > { %6415 = vmatpush3.xpose.msk.msra.mxu0 %vm2281_vm3, %v2611_v59  ;;  %6416 = vmatprep.mubr.msk.f32.mxu0 %vm6856_vm0, %v6855_v16 }
 0x8ff   : > { %6419 = vmatprep.subr.mxu0 %v6855_v16 }
 0x901   : > { %6417 = vmatmul.mubr.msk.f32.vlgmr.msra.gmra.mrb[16].mxu0 %vm2281_vm3, %v2609_v35 }
 0x902   : > { %6421 = vmatprep.mubr.msk.f32.mxu0 %vm6856_vm0, %v6855_v16 }
 0x9d0   : > { %v7847_v46 = vpop.f32.mrb[14].mxu0 }
 0x9d1   : > { %v6413_v63 = vpop.f32.mrb[15].mxu0 }
 0x9d4   : > { %v2682_v0 = vpop.f32.mrb[16].mxu0 }
 0x9d5   : > { %v6418_v42 = vpop.f32.mrb[17].mxu0  ;;  %v2686_v52 = vsel %vm2281_vm3, %v2682_v0, -inf }
 0x9d6   : > { %2687 = vmax.xlane.f32.xlu1 %v2686_v52 }
 0x9e7   : > { %2775 = vrot.lane.b32.xlu1 %v7799_v62, %s6859_s17 }
 0x9eb   : > { %2773 = vrot.lane.b32.xlu1 %v7803_v34, %s6859_s17 }
 0x9ef   : > { %2938 = vrot.lane.b32.xlu1 %v7803_v34, %s6860_s18 }
 0x9f3   : > { %3103 = vrot.lane.b32.xlu1 %v7803_v34, %s6861_s14 }
 0x9f7   : > { %3268 = vrot.lane.b32.xlu1 %v7803_v34, %s6862_s22 }
 0x9fb   : > { %3433 = vrot.lane.b32.xlu1 %v7803_v34, %s6863_s23 }
 0x9ff   : > { %3598 = vrot.lane.b32.xlu1 %v7803_v34, %s6854_s19 }
 0xa03   : > { %3763 = vrot.lane.b32.xlu1 %v7803_v34, %s6864_s24 }
 0xa07   : > { %3928 = vrot.lane.b32.xlu1 %v7803_v34, %s6865_s25 }
 0xa0b   : > { %4093 = vrot.lane.b32.xlu1 %v7803_v34, %s6866_s26 }
 0xa0f   : > { %4258 = vrot.lane.b32.xlu1 %v7803_v34, %s6853_s16 }
 0xa13   : > { %4423 = vrot.lane.b32.xlu1 %v7803_v34, %s6867_s27 }
 0xa17   : > { %4588 = vrot.lane.b32.xlu1 %v7803_v34, %s6868_s28 }
 0xa1b   : > { %4753 = vrot.lane.b32.xlu1 %v7803_v34, %s6869_s29 }
 0xa1f   : > { %2862 = vrot.lane.b32.xlu1 %v7806_v15, %s6859_s17 }
 0xa23   : > { %3357 = vrot.lane.b32.xlu1 %v7806_v15, %s6862_s22 }
 0xa63   : > { %v2688_v6 = vpop.xlane.xlu1 %2687 }
 0xa64   : > { %v2689_v29 = vsub.f32 %v2682_v0, %v2688_v6 }
 0xa66   : > { %v2690_v4 = vmul.f32 1.442695, %v2689_v29 }
 0xa67   : > { %v2776_v44 = vpop.permute.xlu1 %2775 }
 0xa68   : > { %6787 = vpow2.f32 %v2690_v4 }
 0xa6b   : > { %v2774_v45 = vpop.permute.xlu1 %2773 }
 0xa6f   : > { %v2939_v12 = vpop.permute.xlu1 %2938 }
 0xa72   : > { %v6788_v17 = vpop.eup %6787 }
 0xa73   : > { %v3104_v1 = vpop.permute.xlu1 %3103  ;;  %v2692_v19 = vsel %vm2281_vm3, %v6788_v17, 0.0 }
 0xa74   : > { %2693 = vadd.xlane.f32.xlu0 %v2692_v19 }
 0xa77   : > { %v3269_v20 = vpop.permute.xlu1 %3268 }
 0xa7b   : > { %v3434_v53 = vpop.permute.xlu1 %3433 }
 0xa7f   : > { %v7883_v51 = vpop.permute.xlu1 %3598 }
 0xa83   : > { %v7885_v41 = vpop.permute.xlu1 %3763 }
 0xa87   : > { %v7887_v43 = vpop.permute.xlu1 %3928 }
 0xa8a   : > { %2697 = vrot.lane.b32.xlu0 %v7806_v15, %s6858_s30 }
 0xa8b   : > { %v7891_v47 = vpop.permute.xlu1 %4093 }
 0xa8e   : > { %2940 = vrot.lane.b32.xlu0 %v7799_v62, %s6860_s18 }
 0xa8f   : > { %v7895_v50 = vpop.permute.xlu1 %4258 }
 0xa92   : > { %3105 = vrot.lane.b32.xlu0 %v7799_v62, %s6861_s14 }
 0xa93   : > { %v7899_v49 = vpop.permute.xlu1 %4423 }
 0xa96   : > { %3270 = vrot.lane.b32.xlu0 %v7799_v62, %s6862_s22 }
 0xa97   : > { %v7903_v9 = vpop.permute.xlu1 %4588 }
 0xa9a   : > { %3435 = vrot.lane.b32.xlu0 %v7799_v62, %s6863_s23 }
 0xa9b   : > { %v7907_v34 = vpop.permute.xlu1 %4753 }
 0xa9e   : > { %3600 = vrot.lane.b32.xlu0 %v7799_v62, %s6854_s19 }
 0xa9f   : > { %v2863_v22 = vpop.permute.xlu1 %2862 }
 0xaa0   : > { %6430 = vmatpush3.msra.mxu1 %v2863_v22 }
 0xaa1   : > { %6439 = vmatprep.subr.mxu1 %v6855_v16 }
 0xaa2   : > { %3765 = vrot.lane.b32.xlu0 %v7799_v62, %s6864_s24 }
 0xaa6   : > { %3930 = vrot.lane.b32.xlu0 %v7799_v62, %s6865_s25 }
 0xaaa   : > { %4095 = vrot.lane.b32.xlu0 %v7799_v62, %s6866_s26 }
 0xaae   : > { %4260 = vrot.lane.b32.xlu0 %v7799_v62, %s6853_s16 }
 0xab2   : > { %4425 = vrot.lane.b32.xlu0 %v7799_v62, %s6867_s27 }
 0xab6   : > { %4590 = vrot.lane.b32.xlu0 %v7799_v62, %s6868_s28 }
 0xaba   : > { %4755 = vrot.lane.b32.xlu0 %v7799_v62, %s6869_s29 }
 0xabe   : > { %3027 = vrot.lane.b32.xlu0 %v7806_v15, %s6860_s18 }
 0xac2   : > { %3192 = vrot.lane.b32.xlu0 %v7806_v15, %s6861_s14 }
 0xb01   : > { %v2694_v21 = vpop.xlane.xlu0 %2693 }
 0xb02   : > { %6789 = vrcp.f32 %v2694_v21 }
 0xb05   : > { %v2698_v48 = vpop.permute.xlu0 %2697 }
 0xb06   : > { %6420 = vmatpush3.msra.mxu0 %v2698_v48 }
 0xb07   : > { %6424 = vmatprep.subr.mxu0 %v6855_v16 }
 0xb09   : > { %v2941_v33 = vpop.permute.xlu0 %2940 }
 0xb0c   : > { %v6790_v18 = vpop.eup %6789 }
 0xb0d   : > { %v2696_v7 = vmul.f32 %v6790_v18, %v6788_v17  ;;  %v3106_v32 = vpop.permute.xlu0 %3105 }
 0xb0f   : > { %6422 = vmatmul.mubr.msk.f32.vlgmr.msra.gmra.mrb[18].mxu0 %vm2281_vm3, %v2696_v7 }
 0xb10   : > { %6425 = vmatpush3.xpose.msk.msra.mxu0 %vm2281_vm3, %v2776_v44  ;;  %6426 = vmatprep.mubr.msk.f32.mxu0 %vm6856_vm0, %v6855_v16 }
 0xb11   : > { %v3271_v62 = vpop.permute.xlu0 %3270  ;;  %6434 = vmatprep.subr.mxu0 %v6855_v16 }
 0xb13   : > { %6427 = vmatmul.mubr.msk.f32.vlgmr.msra.gmra.mrb[20].mxu0 %vm2281_vm3, %v2774_v45 }
 0xb14   : > { %6435 = vmatpush3.xpose.msk.msra.mxu0 %vm2281_vm3, %v2941_v33  ;;  %6436 = vmatprep.mubr.msk.f32.mxu0 %vm6856_vm0, %v6855_v16 }
 0xb15   : > { %v3436_v23 = vpop.permute.xlu0 %3435  ;;  %6444 = vmatprep.subr.mxu0 %v6855_v16 }
 0xb17   : > { %6437 = vmatmul.mubr.msk.f32.vlgmr.msra.gmra.mrb[22].mxu0 %vm2281_vm3, %v2939_v12 }
 0xb18   : > { %6445 = vmatpush3.xpose.msk.msra.mxu0 %vm2281_vm3, %v3106_v32  ;;  %6446 = vmatprep.mubr.msk.f32.mxu0 %vm6856_vm0, %v6855_v16 }
 0xb19   : > { %v3601_v60 = vpop.permute.xlu0 %3600  ;;  %6454 = vmatprep.subr.mxu0 %v6855_v16 }
 0xb1b   : > { %6447 = vmatmul.mubr.msk.f32.vlgmr.msra.gmra.mrb[24].mxu0 %vm2281_vm3, %v3104_v1 }
 0xb1c   : > { %6455 = vmatpush3.xpose.msk.msra.mxu0 %vm2281_vm3, %v3271_v62  ;;  %6456 = vmatprep.mubr.msk.f32.mxu0 %vm6856_vm0, %v6855_v16 }
 0xb1d   : > { %v3766_v24 = vpop.permute.xlu0 %3765  ;;  %6464 = vmatprep.subr.mxu0 %v6855_v16 }
 0xb1f   : > { %6457 = vmatmul.mubr.msk.f32.vlgmr.msra.gmra.mrb[26].mxu0 %vm2281_vm3, %v3269_v20 }
 0xb20   : > { %6465 = vmatpush3.xpose.msk.msra.mxu0 %vm2281_vm3, %v3436_v23  ;;  %6466 = vmatprep.mubr.msk.f32.mxu0 %vm6856_vm0, %v6855_v16  ;;  %v8059_v23 = vpop.permute.xlu1 %3357 }
 0xb21   : > { %v3931_v30 = vpop.permute.xlu0 %3930  ;;  %6474 = vmatprep.subr.mxu0 %v6855_v16 }
 0xb23   : > { %6467 = vmatmul.mubr.msk.f32.vlgmr.msra.gmra.mrb[28].mxu0 %vm2281_vm3, %v3434_v53 }
 0xb24   : > { %6475 = vmatpush3.xpose.msk.msra.mxu0 %vm2281_vm3, %v3601_v60  ;;  %6476 = vmatprep.mubr.msk.f32.mxu0 %vm6856_vm0, %v6855_v16 }
 0xb25   : > { %6484 = vmatprep.subr.mxu0 %v6855_v16  ;;  %v4096_v5 = vpop.permute.xlu0 %4095 }
 0xb27   : > { %6477 = vmatmul.mubr.msk.f32.vlgmr.msra.gmra.mrb[30].mxu0 %vm2281_vm3, %v7883_v51 }
 0xb28   : > { %6485 = vmatpush3.xpose.msk.msra.mxu0 %vm2281_vm3, %v3766_v24  ;;  %6486 = vmatprep.mubr.msk.f32.mxu0 %vm6856_vm0, %v6855_v16 }
 0xb29   : > { %6494 = vmatprep.subr.mxu0 %v6855_v16  ;;  %v4261_v40 = vpop.permute.xlu0 %4260 }
 0xb2b   : > { %6487 = vmatmul.mubr.msk.f32.vlgmr.msra.gmra.mrb[32].mxu0 %vm2281_vm3, %v7885_v41 }
 0xb2c   : > { %6495 = vmatpush3.xpose.msk.msra.mxu0 %vm2281_vm3, %v3931_v30  ;;  %6496 = vmatprep.mubr.msk.f32.mxu0 %vm6856_vm0, %v6855_v16 }
 0xb2d   : > { %6504 = vmatprep.subr.mxu0 %v6855_v16  ;;  %v4426_v2 = vpop.permute.xlu0 %4425 }
 0xb2f   : > { %6497 = vmatmul.mubr.msk.f32.vlgmr.msra.gmra.mrb[34].mxu0 %vm2281_vm3, %v7887_v43 }
 0xb30   : > { %6505 = vmatpush3.xpose.msk.msra.mxu0 %vm2281_vm3, %v4096_v5  ;;  %6506 = vmatprep.mubr.msk.f32.mxu0 %vm6856_vm0, %v6855_v16 }
 0xb31   : > { %6514 = vmatprep.subr.mxu0 %v6855_v16  ;;  %v4591_v31 = vpop.permute.xlu0 %4590 }
 0xb33   : > { %6507 = vmatmul.mubr.msk.f32.vlgmr.msra.gmra.mrb[36].mxu0 %vm2281_vm3, %v7891_v47 }
 0xb34   : > { %6515 = vmatpush3.xpose.msk.msra.mxu0 %vm2281_vm3, %v4261_v40  ;;  %6516 = vmatprep.mubr.msk.f32.mxu0 %vm6856_vm0, %v6855_v16 }
 0xb35   : > { %6524 = vmatprep.subr.mxu0 %v6855_v16  ;;  %v4756_v11 = vpop.permute.xlu0 %4755 }
 0xb37   : > { %6517 = vmatmul.mubr.msk.f32.vlgmr.msra.gmra.mrb[38].mxu0 %vm2281_vm3, %v7895_v50 }
 0xb38   : > { %6525 = vmatpush3.xpose.msk.msra.mxu0 %vm2281_vm3, %v4426_v2  ;;  %6526 = vmatprep.mubr.msk.f32.mxu0 %vm6856_vm0, %v6855_v16 }
 0xb39   : > { %6534 = vmatprep.subr.mxu0 %v6855_v16  ;;  %v8055_v32 = vpop.permute.xlu0 %3027 }
 0xb3b   : > { %6527 = vmatmul.mubr.msk.f32.vlgmr.msra.gmra.mrb[40].mxu0 %vm2281_vm3, %v7899_v49 }
 0xb3c   : > { %6535 = vmatpush3.xpose.msk.msra.mxu0 %vm2281_vm3, %v4591_v31  ;;  %6536 = vmatprep.mubr.msk.f32.mxu0 %vm6856_vm0, %v6855_v16 }
 0xb3d   : > { %6544 = vmatprep.subr.mxu0 %v6855_v16  ;;  %v8057_v62 = vpop.permute.xlu0 %3192 }
 0xb3f   : > { %6537 = vmatmul.mubr.msk.f32.vlgmr.msra.gmra.mrb[42].mxu0 %vm2281_vm3, %v7903_v9 }
 0xb40   : > { %6545 = vmatpush3.xpose.msk.msra.mxu0 %vm2281_vm3, %v4756_v11  ;;  %6546 = vmatprep.mubr.msk.f32.mxu0 %vm6856_vm0, %v6855_v16 }
 0xb41   : > { %6554 = vmatprep.subr.bf16.mxu0 %v6855_v16 }
 0xb43   : > { %6547 = vmatmul.mubr.msk.f32.vlgmr.msra.gmra.mrb[44].mxu0 %vm2281_vm3, %v7907_v34 }
 0xb44   : > { %6570 = vmatprep.mubr.msk.bf16.mxu0 %vm6856_vm0, %v6855_v16 }
 0xbe2   : > { %v8007_v27 = vpop.f32.mrb[18].mxu0 }
 0xbe3   : > { %v6423_v55 = vpop.f32.mrb[19].mxu0 }
 0xbe6   : > { %v2847_v36 = vpop.f32.mrb[20].mxu0 }
 0xbe7   : > { %v6428_v54 = vpop.f32.mrb[21].mxu0  ;;  %v2851_v58 = vsel %vm2281_vm3, %v2847_v36, -inf }
 0xbe8   : > { %2852 = vmax.xlane.f32.xlu0 %v2851_v58 }
 0xbea   : > { %v3012_v37 = vpop.f32.mrb[22].mxu0 }
 0xbeb   : > { %v6438_v10 = vpop.f32.mrb[23].mxu0  ;;  %v3016_v8 = vsel %vm2281_vm3, %v3012_v37, -inf }
 0xbec   : > { %3017 = vmax.xlane.f32.xlu1 %v3016_v8 }
 0xbee   : > { %v3177_v56 = vpop.f32.mrb[24].mxu0 }
 0xbef   : > { %v6448_v61 = vpop.f32.mrb[25].mxu0  ;;  %v3181_v59 = vsel %vm2281_vm3, %v3177_v56, -inf }
 0xbf0   : > { %3182 = vmax.xlane.f32.xlu0 %v3181_v59 }
 0xbf2   : > { %v3342_v35 = vpop.f32.mrb[26].mxu0 }
 0xbf3   : > { %v6458_v63 = vpop.f32.mrb[27].mxu0  ;;  %v3346_v0 = vsel %vm2281_vm3, %v3342_v35, -inf }
 0xbf4   : > { %3347 = vmax.xlane.f32.xlu0 %v3346_v0 }
 0xbf6   : > { %v8013_v42 = vpop.f32.mrb[28].mxu0 }
 0xbf7   : > { %v6468_v52 = vpop.f32.mrb[29].mxu0  ;;  %v3511_v6 = vsel %vm2281_vm3, %v8013_v42, -inf }
 0xbf8   : > { %3512 = vmax.xlane.f32.xlu1 %v3511_v6 }
 0xbfa   : > { %v8017_v29 = vpop.f32.mrb[30].mxu0 }
 0xbfb   : > { %v6478_v4 = vpop.f32.mrb[31].mxu0  ;;  %v3676_v44 = vsel %vm2281_vm3, %v8017_v29, -inf }
 0xbfc   : > { %3677 = vmax.xlane.f32.xlu0 %v3676_v44 }
 0xbfe   : > { %v8021_v45 = vpop.f32.mrb[32].mxu0 }
 0xbff   : > { %v6488_v12 = vpop.f32.mrb[33].mxu0  ;;  %v3841_v17 = vsel %vm2281_vm3, %v8021_v45, -inf }
 0xc00   : > { %3842 = vmax.xlane.f32.xlu1 %v3841_v17 }
 0xc02   : > { %v8025_v1 = vpop.f32.mrb[34].mxu0 }
 0xc03   : > { %v6498_v19 = vpop.f32.mrb[35].mxu0  ;;  %v4006_v48 = vsel %vm2281_vm3, %v8025_v1, -inf }
 0xc06   : > { %v8027_v20 = vpop.f32.mrb[36].mxu0 }
 0xc07   : > { %v6508_v53 = vpop.f32.mrb[37].mxu0  ;;  %v4171_v51 = vsel %vm2281_vm3, %v8027_v20, -inf }
 0xc08   : > { %4172 = vmax.xlane.f32.xlu1 %v4171_v51 }
 0xc0a   : > { %v8031_v41 = vpop.f32.mrb[38].mxu0 }
 0xc0b   : > { %v6518_v43 = vpop.f32.mrb[39].mxu0  ;;  %v4336_v33 = vsel %vm2281_vm3, %v8031_v41, -inf }
 0xc0e   : > { %v8033_v47 = vpop.f32.mrb[40].mxu0 }
 0xc0f   : > { %v6528_v50 = vpop.f32.mrb[41].mxu0  ;;  %v4501_v49 = vsel %vm2281_vm3, %v8033_v47, -inf }
 0xc10   : > { %4502 = vmax.xlane.f32.xlu1 %v4501_v49 }
 0xc12   : > { %3522 = vrot.lane.b32.xlu0 %v7806_v15, %s6863_s23  ;;  %v8039_v9 = vpop.f32.mrb[42].mxu0 }
 0xc13   : > { %v6538_v34 = vpop.f32.mrb[43].mxu0  ;;  %v4666_v18 = vsel %vm2281_vm3, %v8039_v9, -inf }
 0xc16   : > { %v8041_v22 = vpop.f32.mrb[44].mxu0 }
 0xc17   : > { %v6548_v21 = vpop.f32.mrb[45].mxu0  ;;  %v4831_v7 = vsel %vm2281_vm3, %v8041_v22, -inf }
 0xc21   : > { %3852 = vrot.lane.b32.xlu1 %v7806_v15, %s6864_s24 }
 0xc31   : > { %4007 = vmax.xlane.f32.xlu0 %v4006_v48 }
 0xc35   : > { %4337 = vmax.xlane.f32.xlu0 %v4336_v33 }
 0xc39   : > { %4667 = vmax.xlane.f32.xlu0 %v4666_v18 }
 0xc45   : > { %4832 = vmax.xlane.f32.xlu1 %v4831_v7 }
 0xc4f   : > { %3687 = vrot.lane.b32.xlu0 %v7806_v15, %s6854_s19 }
 0xc75   : > { %v2853_v60 = vpop.xlane.xlu0 %2852 }
 0xc76   : > { %v2854_v24 = vsub.f32 %v2847_v36, %v2853_v60 }
 0xc78   : > { %v2855_v30 = vmul.f32 1.442695, %v2854_v24 }
 0xc79   : > { %v3018_v5 = vpop.xlane.xlu1 %3017 }
 0xc7a   : > { %6791 = vpow2.f32 %v2855_v30  ;;  %v3019_v40 = vsub.f32 %v3012_v37, %v3018_v5 }
 0xc7c   : > { %v3020_v2 = vmul.f32 1.442695, %v3019_v40 }
 0xc7d   : > { %v3183_v31 = vpop.xlane.xlu0 %3182 }
 0xc7e   : > { %6793 = vpow2.f32 %v3020_v2  ;;  %v3184_v11 = vsub.f32 %v3177_v56, %v3183_v31 }
 0xc80   : > { %v3185_v55 = vmul.f32 1.442695, %v3184_v11 }
 0xc81   : > { %v3348_v54 = vpop.xlane.xlu0 %3347 }
 0xc82   : > { %6795 = vpow2.f32 %v3185_v55  ;;  %v3349_v58 = vsub.f32 %v3342_v35, %v3348_v54 }
 0xc84   : > { %v8061_v10 = vpop.eup %6791  ;;  %v3350_v8 = vmul.f32 1.442695, %v3349_v58 }
 0xc85   : > { %v3513_v61 = vpop.xlane.xlu1 %3512  ;;  %v2857_v59 = vsel %vm2281_vm3, %v8061_v10, 0.0 }
 0xc86   : > { %6797 = vpow2.f32 %v3350_v8  ;;  %v3514_v36 = vsub.f32 %v8013_v42, %v3513_v61  ;;  %2858 = vadd.xlane.f32.xlu0 %v2857_v59 }
 0xc88   : > { %v8066_v37 = vpop.eup %6793  ;;  %v3515_v63 = vmul.f32 1.442695, %v3514_v36 }
 0xc89   : > { %v3022_v56 = vsel %vm2281_vm3, %v8066_v37, 0.0  ;;  %v3678_v53 = vpop.xlane.xlu0 %3677 }
 0xc8a   : > { %6799 = vpow2.f32 %v3515_v63  ;;  %3023 = vadd.xlane.f32.xlu1 %v3022_v56  ;;  %v3679_v51 = vsub.f32 %v8017_v29, %v3678_v53 }
 0xc8c   : > { %v8070_v35 = vpop.eup %6795  ;;  %v3680_v50 = vmul.f32 1.442695, %v3679_v51 }
 0xc8d   : > { %v3843_v0 = vpop.xlane.xlu1 %3842  ;;  %v3187_v52 = vsel %vm2281_vm3, %v8070_v35, 0.0  ;;  %v8091_v21 = vpop.permute.xlu0 %3522 }
 0xc8e   : > { %v3844_v6 = vsub.f32 %v8021_v45, %v3843_v0  ;;  %3188 = vadd.xlane.f32.xlu0 %v3187_v52 }
 0xc90   : > { %v8075_v4 = vpop.eup %6797  ;;  %v3845_v42 = vmul.f32 1.442695, %v3844_v6 }
 0xc91   : > { %v3352_v44 = vsel %vm2281_vm3, %v8075_v4, 0.0 }
 0xc92   : > { %6801 = vpow2.f32 %v3845_v42  ;;  %3353 = vadd.xlane.f32.xlu1 %v3352_v44 }
 0xc93   : > { %6803 = vpow2.f32 %v3680_v50 }
 0xc94   : > { %v8079_v12 = vpop.eup %6799 }
 0xc95   : > { %v3517_v17 = vsel %vm2281_vm3, %v8079_v12, 0.0  ;;  %v4173_v43 = vpop.xlane.xlu1 %4172 }
 0xc96   : > { %3518 = vadd.xlane.f32.xlu0 %v3517_v17  ;;  %v4174_v49 = vsub.f32 %v8027_v20, %v4173_v43 }
 0xc98   : > { %v4175_v34 = vmul.f32 1.442695, %v4174_v49 }
 0xc9a   : > { %6805 = vpow2.f32 %v4175_v34 }
 0xc9c   : > { %v8083_v19 = vpop.eup %6801 }
 0xc9d   : > { %v3847_v45 = vsel %vm2281_vm3, %v8083_v19, 0.0  ;;  %v4503_v48 = vpop.xlane.xlu1 %4502  ;;  %v8095_v30 = vpop.eup %6803 }
 0xc9e   : > { %3848 = vadd.xlane.f32.xlu0 %v3847_v45  ;;  %v4504_v7 = vsub.f32 %v8033_v47, %v4503_v48  ;;  %v3682_v2 = vsel %vm2281_vm3, %v8095_v30, 0.0 }
 0xca0   : > { %v4505_v5 = vmul.f32 1.442695, %v4504_v7 }
 0xca1   : > { %v8107_v55 = vpop.permute.xlu1 %3852 }
 0xca3   : > { %4017 = vrot.lane.b32.xlu1 %v7806_v15, %s6865_s25 }
 0xca4   : > { %v8100_v31 = vpop.eup %6805 }
 0xca5   : > { %v4177_v11 = vsel %vm2281_vm3, %v8100_v31, 0.0 }
 0xcbe   : > { %v4008_v33 = vpop.xlane.xlu0 %4007 }
 0xcbf   : > { %v4009_v18 = vsub.f32 %v8025_v1, %v4008_v33 }
 0xcc1   : > { %v4010_v60 = vmul.f32 1.442695, %v4009_v18 }
 0xcc2   : > { %v4338_v24 = vpop.xlane.xlu0 %4337 }
 0xcc3   : > { %6807 = vpow2.f32 %v4010_v60  ;;  %v4339_v29 = vsub.f32 %v8031_v41, %v4338_v24 }
 0xcc5   : > { %v4340_v20 = vmul.f32 1.442695, %v4339_v29 }
 0xcc6   : > { %v4668_v40 = vpop.xlane.xlu0 %4667 }
 0xcc7   : > { %6809 = vpow2.f32 %v4340_v20  ;;  %v4669_v1 = vsub.f32 %v8039_v9, %v4668_v40  ;;  %3683 = vadd.xlane.f32.xlu1 %v3682_v2 }
 0xcc8   : > { %6811 = vpow2.f32 %v4505_v5 }
 0xcc9   : > { %v4670_v47 = vmul.f32 1.442695, %v4669_v1 }
 0xccb   : > { %6813 = vpow2.f32 %v4670_v47  ;;  %4178 = vadd.xlane.f32.xlu1 %v4177_v11 }
 0xccd   : > { %v8105_v41 = vpop.eup %6807 }
 0xcce   : > { %v4012_v54 = vsel %vm2281_vm3, %v8105_v41, 0.0 }
 0xccf   : > { %4013 = vadd.xlane.f32.xlu0 %v4012_v54 }
 0xcd1   : > { %v8111_v58 = vpop.eup %6809 }
 0xcd2   : > { %v4833_v8 = vpop.xlane.xlu1 %4832  ;;  %v4342_v9 = vsel %vm2281_vm3, %v8111_v58, 0.0  ;;  %v8115_v61 = vpop.eup %6811 }
 0xcd3   : > { %v4834_v59 = vsub.f32 %v8041_v22, %v4833_v8  ;;  %4343 = vadd.xlane.f32.xlu0 %v4342_v9  ;;  %v4507_v56 = vsel %vm2281_vm3, %v8115_v61, 0.0  ;;  %v3688_v22 = vpop.permute.xlu0 %3687 }
 0xcd5   : > { %v8118_v36 = vpop.eup %6813  ;;  %v4835_v63 = vmul.f32 1.442695, %v4834_v59 }
 0xcd6   : > { %v4672_v0 = vsel %vm2281_vm3, %v8118_v36, 0.0 }
 0xcd7   : > { %6815 = vpow2.f32 %v4835_v63  ;;  %4508 = vadd.xlane.f32.xlu0 %v4507_v56  ;;  %4673 = vadd.xlane.f32.xlu1 %v4672_v0 }
 0xce1   : > { %v8124_v52 = vpop.eup %6815 }
 0xce2   : > { %v4837_v6 = vsel %vm2281_vm3, %v8124_v52, 0.0 }
 0xce3   : > { %4838 = vadd.xlane.f32.xlu0 %v4837_v6 }
 0xce8   : > { %4347 = vrot.lane.b32.xlu1 %v7806_v15, %s6853_s16 }
 0xcec   : > { %4512 = vrot.lane.b32.xlu1 %v7806_v15, %s6867_s27 }
 0xcf0   : > { %4677 = vrot.lane.b32.xlu1 %v7806_v15, %s6868_s28 }
 0xcf4   : > { %4842 = vrot.lane.b32.xlu1 %v7806_v15, %s6869_s29 }
 0xcf8   : > { %4919 = vrot.lane.b32.xlu1 %v7847_v46, %s6869_s29 }
 0xcf9   : > { %4182 = vrot.lane.b32.xlu0 %v7806_v15, %s6866_s26 }
 0xcfd   : > { %4923 = vrot.lane.b32.xlu0 %v8007_v27, %s6868_s28  ;;  %s8543_s28 = smov 120  }
 0xd13   : > { %v2859_v42 = vpop.xlane.xlu0 %2858 }
 0xd14   : > { %6817 = vrcp.f32 %v2859_v42 }
 0xd17   : > { %v3024_v44 = vpop.xlane.xlu1 %3023 }
 0xd18   : > { %6819 = vrcp.f32 %v3024_v44  ;;  %v6699_v44 = vld [vmem:[%s8523_s9] sm:$0xff]  }
 0xd19   : > { %6555 = vmatpush3.bf16.msra.mxu0 %v6699_v44 }
 0xd1a   : > { %6556 = vmatprep.subr.bf16.mxu0 %v6855_v16 }
 0xd1b   : > { %v3189_v17 = vpop.xlane.xlu0 %3188 }
 0xd1c   : > { %6821 = vrcp.f32 %v3189_v17  ;;  %v6700_v17 = vld [vmem:[%s8523_s9 + $0x8] sm:$0xff]  }
 0xd1d   : > { %6557 = vmatpush3.bf16.msra.mxu0 %v6700_v17 }
 0xd1e   : > { %v6818_v45 = vpop.eup %6817  ;;  %6558 = vmatprep.subr.bf16.mxu0 %v6855_v16 }
 0xd1f   : > { %v2861_v53 = vmul.f32 %v6818_v45, %v8061_v10  ;;  %v3354_v51 = vpop.xlane.xlu1 %3353 }
 0xd20   : > { %6823 = vrcp.f32 %v3354_v51  ;;  %v6701_v51 = vld [vmem:[%s8523_s9 + $0x10] sm:$0xff]  }
 0xd21   : > { %6432 = vmatmul.mubr.msk.f32.vlgmr.msra.gmra.mrb[8].mxu1 %vm2281_vm3, %v2861_v53  ;;  %6559 = vmatpush3.bf16.msra.mxu0 %v6701_v51 }
 0xd22   : > { %v6820_v46 = vpop.eup %6819  ;;  %6440 = vmatpush3.msra.mxu1 %v8055_v32  ;;  %6441 = vmatprep.mubr.msk.f32.mxu1 %vm6856_vm0, %v6855_v16 }
 0xd23   : > { %v3026_v15 = vmul.f32 %v6820_v46, %v8066_v37  ;;  %v3519_v27 = vpop.xlane.xlu0 %3518  ;;  %6449 = vmatprep.subr.mxu1 %v6855_v16  ;;  %6560 = vmatprep.subr.bf16.mxu0 %v6855_v16 }
 0xd24   : > { %6825 = vrcp.f32 %v3519_v27 }
 0xd25   : > { %6442 = vmatmul.mubr.msk.f32.vlgmr.msra.gmra.mrb[10].mxu1 %vm2281_vm3, %v3026_v15 }
 0xd26   : > { %v6822_v43 = vpop.eup %6821  ;;  %6450 = vmatpush3.msra.mxu1 %v8057_v62  ;;  %6451 = vmatprep.mubr.msk.f32.mxu1 %vm6856_vm0, %v6855_v16 }
 0xd27   : > { %v3191_v10 = vmul.f32 %v6822_v43, %v8070_v35  ;;  %6459 = vmatprep.subr.mxu1 %v6855_v16  ;;  %v6702_v43 = vld [vmem:[%s8523_s9 + $0x18] sm:$0xff]  }
 0xd28   : > { %6561 = vmatpush3.bf16.msra.mxu0 %v6702_v43 }
 0xd29   : > { %6452 = vmatmul.mubr.msk.f32.vlgmr.msra.gmra.mrb[12].mxu1 %vm2281_vm3, %v3191_v10  ;;  %6562 = vmatprep.subr.bf16.mxu0 %v6855_v16 }
 0xd2a   : > { %v6824_v32 = vpop.eup %6823  ;;  %6460 = vmatpush3.msra.mxu1 %v8059_v23  ;;  %6461 = vmatprep.mubr.msk.f32.mxu1 %vm6856_vm0, %v6855_v16  ;;  %v4018_v23 = vpop.permute.xlu1 %4017 }
 0xd2b   : > { %v3356_v37 = vmul.f32 %v6824_v32, %v8075_v4  ;;  %6469 = vmatprep.subr.mxu1 %v6855_v16  ;;  %v3849_v4 = vpop.xlane.xlu0 %3848  ;;  %v6703_v32 = vld [vmem:[%s8523_s9 + $0x20] sm:$0xff]  }
 0xd2c   : > { %6563 = vmatpush3.bf16.msra.mxu0 %v6703_v32 }
 0xd2d   : > { %6462 = vmatmul.mubr.msk.f32.vlgmr.msra.gmra.mrb[14].mxu1 %vm2281_vm3, %v3356_v37  ;;  %6564 = vmatprep.subr.bf16.mxu0 %v6855_v16  ;;  %v6704_v37 = vld [vmem:[%s8523_s9 + $0x28] sm:$0xff]  }
 0xd2e   : > { %v6826_v62 = vpop.eup %6825  ;;  %6470 = vmatpush3.msra.mxu1 %v8091_v21  ;;  %6471 = vmatprep.mubr.msk.f32.mxu1 %vm6856_vm0, %v6855_v16 }
 0xd2f   : > { %v3521_v35 = vmul.f32 %v6826_v62, %v8079_v12  ;;  %6479 = vmatprep.subr.mxu1 %v6855_v16 }
 0xd30   : > { %6565 = vmatpush3.bf16.msra.mxu0 %v6704_v37 }
 0xd31   : > { %6472 = vmatmul.mubr.msk.f32.vlgmr.msra.gmra.mrb[16].mxu1 %vm2281_vm3, %v3521_v35  ;;  %6566 = vmatprep.subr.bf16.mxu0 %v6855_v16  ;;  %v6705_v35 = vld [vmem:[%s8523_s9 + $0x30] sm:$0xff]  }
 0xd32   : > { %6480 = vmatpush3.msra.mxu1 %v3688_v22  ;;  %6481 = vmatprep.mubr.msk.f32.mxu1 %vm6856_vm0, %v6855_v16 }
 0xd33   : > { %6489 = vmatprep.subr.mxu1 %v6855_v16 }
 0xd34   : > { %6567 = vmatpush3.bf16.msra.mxu0 %v6705_v35 }
 0xd35   : > { %6568 = vmatprep.subr.bf16.mxu0 %v6855_v16 }
 0xd54   : > { %v3684_v50 = vpop.xlane.xlu1 %3683 }
 0xd55   : > { %6827 = vrcp.f32 %v3684_v50  ;;  %v6706_v50 = vld [vmem:[%s8523_s9 + $0x38] sm:$0xff]  }
 0xd56   : > { %6829 = vrcp.f32 %v3849_v4  ;;  %6569 = vmatpush3.bf16.msra.mxu0 %v6706_v50  ;;  %v6716_v50 = vld [vmem:[%s8525_s11 + $0xd0] sm:$0xff]  }
 0xd58   : > { %v4179_v33 = vpop.xlane.xlu1 %4178 }
 0xd5c   : > { %v4014_v49 = vpop.xlane.xlu0 %4013 }
 0xd5d   : > { %6831 = vrcp.f32 %v4014_v49 }
 0xd5e   : > { %6833 = vrcp.f32 %v4179_v33  ;;  %v6711_v33 = vld [vmem:[%s8525_s11 + $0x48] sm:$0xff]  }
 0xd5f   : > { %v6828_v34 = vpop.eup %6827 }
 0xd60   : > { %v3686_v12 = vmul.f32 %v6828_v34, %v8095_v30  ;;  %v6830_v21 = vpop.eup %6829  ;;  %v4344_v18 = vpop.xlane.xlu0 %4343  ;;  %v6707_v34 = vld [vmem:[%s8525_s11 + $0x40] sm:$0xff]  }
 0xd61   : > { %v3851_v48 = vmul.f32 %v6830_v21, %v8083_v19  ;;  %6835 = vrcp.f32 %v4344_v18  ;;  %v6709_v21 = vld [vmem:[%s8525_s11] sm:$0xff]  }
 0xd62   : > { %6482 = vmatmul.mubr.msk.f32.vlgmr.msra.gmra.mrb[18].mxu1 %vm2281_vm3, %v3686_v12  ;;  %v6708_v12 = vld [vmem:[%s8525_s11 + $0xc0] sm:$0xff]  }
 0xd63   : > { %6490 = vmatpush3.msra.mxu1 %v8107_v55  ;;  %6491 = vmatprep.mubr.msk.f32.mxu1 %vm6856_vm0, %v6855_v16 }
 0xd64   : > { %6499 = vmatprep.subr.mxu1 %v6855_v16  ;;  %v4674_v24 = vpop.xlane.xlu1 %4673  ;;  %v4509_v19 = vpop.xlane.xlu0 %4508  ;;  %6283 = vmatprep.subr.bf16.mxu0 %v6708_v12  ;;  %v6722_v12 = vld [vmem:[%s8525_s11 + $0x98] sm:$0xff]  }
 0xd65   : > { %6837 = vrcp.f32 %v4509_v19 }
 0xd66   : > { %6492 = vmatmul.mubr.msk.f32.vlgmr.msra.gmra.mrb[20].mxu1 %vm2281_vm3, %v3851_v48  ;;  %6839 = vrcp.f32 %v4674_v24  ;;  %v6715_v24 = vld [vmem:[%s8525_s11 + $0x50] sm:$0xff]  }
 0xd67   : > { %v6832_v7 = vpop.eup %6831  ;;  %6500 = vmatpush3.msra.mxu1 %v4018_v23  ;;  %6501 = vmatprep.mubr.msk.f32.mxu1 %vm6856_vm0, %v6855_v16 }
 0xd68   : > { %v4016_v60 = vmul.f32 %v6832_v7, %v8105_v41  ;;  %6509 = vmatprep.subr.mxu1 %v6855_v16  ;;  %v4348_v30 = vpop.permute.xlu1 %4347  ;;  %v6834_v5 = vpop.eup %6833  ;;  %v6713_v7 = vld [vmem:[%s8525_s11 + $0x8] sm:$0xff]  }
 0xd69   : > { %v4181_v20 = vmul.f32 %v6834_v5, %v8100_v31  ;;  %v6719_v5 = vld [vmem:[%s8525_s11 + $0x58] sm:$0xff]  }
 0xd6a   : > { %6502 = vmatmul.mubr.msk.f32.vlgmr.msra.gmra.mrb[22].mxu1 %vm2281_vm3, %v4016_v60 }
 0xd6b   : > { %6511 = vmatprep.mubr.msk.f32.mxu1 %vm6856_vm0, %v6855_v16  ;;  %v6836_v2 = vpop.eup %6835 }
 0xd6c   : > { %v4513_v1 = vpop.permute.xlu1 %4512  ;;  %v4346_v47 = vmul.f32 %v6836_v2, %v8111_v58  ;;  %v6723_v2 = vld [vmem:[%s8525_s11 + $0x60] sm:$0xff]  }
 0xd6f   : > { %v6838_v11 = vpop.eup %6837 }
 0xd70   : > { %v4839_v29 = vpop.xlane.xlu0 %4838  ;;  %v4511_v31 = vmul.f32 %v6838_v11, %v8115_v61  ;;  %v4678_v41 = vpop.permute.xlu1 %4677  ;;  %v6729_v11 = vld [vmem:[%s8525_s11 + $0x28] sm:$0xff]  }
 0xd71   : > { %6841 = vrcp.f32 %v4839_v29  ;;  %v6840_v55 = vpop.eup %6839 }
 0xd72   : > { %v4676_v54 = vmul.f32 %v6840_v55, %v8118_v36 }
 0xd74   : > { %v4183_v40 = vpop.permute.xlu0 %4182  ;;  %v4843_v8 = vpop.permute.xlu1 %4842 }
 0xd75   : > { %6510 = vmatpush3.msra.mxu1 %v4183_v40  ;;  %v6721_v40 = vld [vmem:[%s8525_s11 + $0x18] sm:$0xff]  }
 0xd76   : > { %6512 = vmatmul.mubr.msk.f32.vlgmr.msra.gmra.mrb[24].mxu1 %vm2281_vm3, %v4181_v20  ;;  %6519 = vmatprep.subr.mxu1 %v6855_v16 }
 0xd77   : > { %6520 = vmatpush3.msra.mxu1 %v4348_v30  ;;  %6521 = vmatprep.mubr.msk.f32.mxu1 %vm6856_vm0, %v6855_v16  ;;  %v6717_v30 = vld [vmem:[%s8525_s11 + $0x10] sm:$0xff]  }
 0xd78   : > { %6529 = vmatprep.subr.mxu1 %v6855_v16 }
 0xd7a   : > { %6522 = vmatmul.mubr.msk.f32.vlgmr.msra.gmra.mrb[26].mxu1 %vm2281_vm3, %v4346_v47  ;;  %v6727_v47 = vld [vmem:[%s8525_s11 + $0x68] sm:$0xff]  }
 0xd7b   : > { %6530 = vmatpush3.msra.mxu1 %v4513_v1  ;;  %6531 = vmatprep.mubr.msk.f32.mxu1 %vm6856_vm0, %v6855_v16  ;;  %v6842_v58 = vpop.eup %6841  ;;  %v6725_v1 = vld [vmem:[%s8525_s11 + $0x20] sm:$0xff]  }
 0xd7c   : > { %6539 = vmatprep.subr.mxu1 %v6855_v16  ;;  %v4841_v9 = vmul.f32 %v6842_v58, %v8124_v52 }
 0xd7e   : > { %6532 = vmatmul.mubr.msk.f32.vlgmr.msra.gmra.mrb[28].mxu1 %vm2281_vm3, %v4511_v31  ;;  %v4920_v31 = vpop.permute.xlu1 %4919 }
 0xd7f   : > { %6540 = vmatpush3.msra.mxu1 %v4678_v41  ;;  %6541 = vmatprep.mubr.msk.f32.mxu1 %vm6856_vm0, %v6855_v16  ;;  %v4924_v41 = vpop.permute.xlu0 %4923 }
 0xd80   : > { %6549 = vmatprep.subr.mxu1 %v6855_v16 }
 0xd82   : > { %6542 = vmatmul.mubr.msk.f32.vlgmr.msra.gmra.mrb[30].mxu1 %vm2281_vm3, %v4676_v54 }
 0xd83   : > { %6550 = vmatpush3.msra.mxu1 %v4843_v8  ;;  %6551 = vmatprep.mubr.msk.f32.mxu1 %vm6856_vm0, %v6855_v16 }
 0xd84   : > { %6261 = vmatprep.subr.bf16.mxu1 %v6707_v34  ;;  %v6720_v34 = vld [vmem:[%s8525_s11 + $0xd8] sm:$0xff]  }
 0xd86   : > { %6552 = vmatmul.mubr.msk.f32.vlgmr.msra.gmra.mrb[32].mxu1 %vm2281_vm3, %v4841_v9 }
 0xd87   : > { %6262 = vmatpush3.bf16.msra.mxu1 %v6709_v21  ;;  %v6724_v21 = vld [vmem:[%s8525_s11 + $0xe0] sm:$0xff]  }
 0xd88   : > { %6263 = vmatprep.subr.bf16.mxu1 %v6711_v33  ;;  %v6728_v33 = vld [vmem:[%s8525_s11 + $0xe8] sm:$0xff]  }
 0xd8b   : > { %6264 = vmatpush3.bf16.msra.mxu1 %v6713_v7  ;;  %v6731_v7 = vld [vmem:[%s8525_s11 + $0x70] sm:$0xff]  }
 0xd8c   : > { %6265 = vmatprep.subr.bf16.mxu1 %v6715_v24  ;;  %v6733_v24 = vld [vmem:[%s8525_s11 + $0x30] sm:$0xff]  }
 0xd8f   : > { %6266 = vmatpush3.bf16.msra.mxu1 %v6717_v30  ;;  %v6735_v30 = vld [vmem:[%s8525_s11 + $0x78] sm:$0xff]  }
 0xd90   : > { %6267 = vmatprep.subr.bf16.mxu1 %v6719_v5  ;;  %v6737_v5 = vld [vmem:[%s8525_s11 + $0x38] sm:$0xff]  }
 0xd93   : > { %6268 = vmatpush3.bf16.msra.mxu1 %v6721_v40  ;;  %v6739_v40 = vld [vmem:[%s8525_s11 + $0x140] sm:$0xff]  }
 0xd94   : > { %6269 = vmatprep.subr.bf16.mxu1 %v6723_v2  ;;  %v6740_v2 = vld [vmem:[%s8525_s11 + $0x1c0] sm:$0xff]  }
 0xd97   : > { %6270 = vmatpush3.bf16.msra.mxu1 %v6725_v1  ;;  %v6088_v1 = vld [vmem:[%s8524_s10] ss:$0 sm:$0xff] }
 0xd98   : > { %6271 = vmatprep.subr.bf16.mxu1 %v6727_v47 }
 0xd9b   : > { %6272 = vmatpush3.bf16.msra.mxu1 %v6729_v11 }
 0xd9c   : > { %6273 = vmatprep.subr.bf16.mxu1 %v6731_v7 }
 0xd9f   : > { %6274 = vmatpush3.bf16.msra.mxu1 %v6733_v24  ;;  %v6769_v24 = vld [vmem:[%s8525_s11 + $0x138] sm:$0xff]  }
 0xda0   : > { %6275 = vmatprep.subr.bf16.mxu1 %v6735_v30 }
 0xda3   : > { %6276 = vmatpush3.bf16.msra.mxu1 %v6737_v5 }
 0xda4   : > { %6305 = vmatprep.subr.bf16.mxu1 %v6739_v40  ;;  %v6771_v40 = vld [vmem:[%s8527_s13] sm:$0xff]  }
 0xdf4   : > { %v2934_v61 = vpop.f32.mrb[8].mxu1 }
 0xdf5   : > { %v6433_v59 = vpop.f32.mrb[9].mxu1  ;;  %4927 = vrot.lane.b32.xlu1 %v2934_v61, %s6867_s27  ;;  %v4978_v61 = vsel %vm2281_vm3, %v7828_v14, %v4920_v31 }
 0xdf8   : > { %v3099_v63 = vpop.f32.mrb[10].mxu1 }
 0xdf9   : > { %4931 = vrot.lane.b32.xlu0 %v3099_v63, %s6853_s16  ;;  %v6443_v36 = vpop.f32.mrb[11].mxu1  ;;  %v4980_v63 = vsel %vm4979_vm4, %v4978_v61, %v4924_v41 }
 0xdfc   : > { %v3264_v56 = vpop.f32.mrb[12].mxu1 }
 0xdfd   : > { %4935 = vrot.lane.b32.xlu1 %v3264_v56, %s6866_s26  ;;  %v6453_v0 = vpop.f32.mrb[13].mxu1  ;;  %s492_s26 = scalar_lea.vmem %s8529_s15, %s8545_s21 }
 0xe00   : > { %v3429_v6 = vpop.f32.mrb[14].mxu1 }
 0xe01   : > { %4939 = vrot.lane.b32.xlu0 %v3429_v6, %s6865_s25  ;;  %v6463_v22 = vpop.f32.mrb[15].mxu1 }
 0xe04   : > { %v3594_v42 = vpop.f32.mrb[16].mxu1 }
 0xe05   : > { %4943 = vrot.lane.b32.xlu1 %v3594_v42, %s6864_s24  ;;  %v6473_v52 = vpop.f32.mrb[17].mxu1 }
 0xe35   : > { %v3759_v45 = vpop.f32.mrb[18].mxu1 }
 0xe36   : > { %4947 = vrot.lane.b32.xlu0 %v3759_v45, %s6854_s19  ;;  %v6483_v53 = vpop.f32.mrb[19].mxu1 }
 0xe39   : > { %v3924_v46 = vpop.f32.mrb[20].mxu1 }
 0xe3a   : > { %4951 = vrot.lane.b32.xlu1 %v3924_v46, %s6863_s23  ;;  %v6493_v15 = vpop.f32.mrb[21].mxu1 }
 0xe3d   : > { %v4089_v27 = vpop.f32.mrb[22].mxu1 }
 0xe3e   : > { %4955 = vrot.lane.b32.xlu0 %v4089_v27, %s6862_s22  ;;  %v6503_v10 = vpop.f32.mrb[23].mxu1 }
 0xe49   : > { %v4254_v62 = vpop.f32.mrb[24].mxu1 }
 0xe4a   : > { %4959 = vrot.lane.b32.xlu1 %v4254_v62, %s6861_s14  ;;  %v6513_v23 = vpop.f32.mrb[25].mxu1  ;;  %v6710_v62 = vld [vmem:[%s8525_s11 + $0x80] sm:$0xff]  }
 0xe4b   : > { %v6712_v23 = vld [vmem:[%s8525_s11 + $0xc8] sm:$0xff]  }
 0xe4d   : > { %v4419_v4 = vpop.f32.mrb[26].mxu1 }
 0xe4e   : > { %4963 = vrot.lane.b32.xlu0 %v4419_v4, %s6860_s18  ;;  %v6523_v49 = vpop.f32.mrb[27].mxu1  ;;  %v6714_v4 = vld [vmem:[%s8525_s11 + $0x88] sm:$0xff]  }
 0xe4f   : > { %v6718_v49 = vld [vmem:[%s8525_s11 + $0x90] sm:$0xff]  }
 0xe51   : > { %v4584_v48 = vpop.f32.mrb[28].mxu1 }
 0xe52   : > { %4967 = vrot.lane.b32.xlu1 %v4584_v48, %s6859_s17  ;;  %v6533_v18 = vpop.f32.mrb[29].mxu1  ;;  %v6726_v48 = vld [vmem:[%s8525_s11 + $0xa0] sm:$0xff]  }
 0xe53   : > { %v6730_v18 = vld [vmem:[%s8525_s11 + $0xa8] sm:$0xff]  }
 0xe55   : > { %v4749_v60 = vpop.f32.mrb[30].mxu1 }
 0xe56   : > { %4971 = vrot.lane.b32.xlu0 %v4749_v60, %s6858_s30  ;;  %v6543_v19 = vpop.f32.mrb[31].mxu1  ;;  %v6732_v60 = vld [vmem:[%s8525_s11 + $0xf0] sm:$0xff]  }
 0xe57   : > { %v6734_v19 = vld [vmem:[%s8525_s11 + $0xb0] sm:$0xff]  }
 0xe59   : > { %v4914_v29 = vpop.f32.mrb[32].mxu1 }
 0xe5a   : > { %4975 = vrot.lane.b32.xlu1 %v4914_v29, %s8543_s28  ;;  %v6553_v20 = vpop.f32.mrb[33].mxu1  ;;  %v6736_v29 = vld [vmem:[%s8525_s11 + $0xf8] sm:$0xff]  }
 0xe5b   : > { %v6738_v20 = vld [vmem:[%s8525_s11 + $0xb8] sm:$0xff]  }
 0xe67   : > { %v4928_v55 = vpop.permute.xlu1 %4927 }
 0xe68   : > { %v4982_v56 = vsel %vm4981_vm5, %v4980_v63, %v4928_v55 }
 0xe6b   : > { %v4932_v54 = vpop.permute.xlu0 %4931 }
 0xe6c   : > { %v4983_v6 = vsel %vm1366_vm13, %v4982_v56, %v4932_v54  ;;  %vm5002_vm13 = vcmask 982016  }
 0xe6f   : > { %v4936_v58 = vpop.permute.xlu1 %4935 }
 0xe70   : > { %v4985_v22 = vsel %vm4984_vm6, %v4983_v6, %v4936_v58 }
 0xe73   : > { %v4940_v8 = vpop.permute.xlu0 %4939 }
 0xe74   : > { %v4987_v42 = vsel %vm4986_vm7, %v4985_v22, %v4940_v8 }
 0xe77   : > { %v4944_v9 = vpop.permute.xlu1 %4943 }
 0xe78   : > { %v4989_v44 = vsel %vm4988_vm8, %v4987_v42, %v4944_v9 }
 0xea8   : > { %v4948_v59 = vpop.permute.xlu0 %4947 }
 0xea9   : > { %v4990_v14 = vsel %vm1371_vm14, %v4989_v44, %v4948_v59  ;;  %v6742_v44 = vld [vmem:[%s8525_s11 + $0x180] sm:$0xff]   ;;  %vm5928_vm14 = vcmask 0  }
 0xeac   : > { %v4952_v36 = vpop.permute.xlu1 %4951 }
 0xead   : > { %v4992_v45 = vsel %vm4991_vm9, %v4990_v14, %v4952_v36  ;;  %v6746_v14 = vld [vmem:[%s8525_s11 + $0x188] sm:$0xff]  }
 0xeb0   : > { %v4956_v0 = vpop.permute.xlu0 %4955 }
 0xeb1   : > { %v4994_v53 = vsel %vm4993_vm10, %v4992_v45, %v4956_v0  ;;  %v6747_v45 = vld [vmem:[%s8525_s11 + $0x150] sm:$0xff]  }
 0xebc   : > { %v4960_v52 = vpop.permute.xlu1 %4959 }
 0xebd   : > { %v4996_v46 = vsel %vm4995_vm11, %v4994_v53, %v4960_v52  ;;  %v6748_v53 = vld [vmem:[%s8525_s11 + $0x1d0] sm:$0xff]  }
 0xec0   : > { %v4964_v17 = vpop.permute.xlu0 %4963 }
 0xec1   : > { %v4997_v27 = vsel %vm1420_vm15, %v4996_v46, %v4964_v17  ;;  %v6745_v17 = vld [vmem:[%s8525_s11 + $0x108] sm:$0xff]   ;;  %v6750_v46 = vld [vmem:[%s8525_s11 + $0x190] sm:$0xff]  }
 0xec4   : > { %v4968_v51 = vpop.permute.xlu1 %4967 }
 0xec5   : > { %v4999_v43 = vsel %vm4998_vm12, %v4997_v27, %v4968_v51  ;;  %v6749_v51 = vld [vmem:[%s8525_s11 + $0x110] sm:$0xff]   ;;  %v6752_v27 = vld [vmem:[%s8525_s11 + $0x1d8] sm:$0xff]  }
 0xec8   : > { %v4972_v15 = vpop.permute.xlu0 %4971 }
 0xec9   : > { %v5001_v10 = vsel %vm5000_vm2, %v4999_v43, %v4972_v15  ;;  %v6751_v15 = vld [vmem:[%s8525_s11 + $0x158] sm:$0xff]  }
 0xeca   : > { %v6753_v43 = vld [vmem:[%s8525_s11 + $0x118] sm:$0xff]  }
 0xecc   : > { %v4976_v32 = vpop.permute.xlu1 %4975 }
 0xecd   : > { %v5003_v37 = vsel %vm5002_vm13, %v5001_v10, %v4976_v32  ;;  %v6754_v10 = vld [vmem:[%s8525_s11 + $0x198] sm:$0xff]   ;;  %v6755_v32 = vld [vmem:[%s8525_s11 + $0x160] sm:$0xff]  }
 0xece   : > { %v5004_v35 = vpack.c.bf16 %v5003_v37, %v5003_v37  ;;  %v6756_v37 = vld [vmem:[%s8525_s11 + $0x1e0] sm:$0xff]  }
 0xed0   : > { %6571 = vmatmul.mubr.bf16.vlgmr.msra.gmra.mrb[48].mxu0 %v5004_v35  ;;  %v6758_v35 = vld [vmem:[%s8525_s11 + $0x1a0] sm:$0xff]  }
 0xed1   : > { %6284 = vmatpush3.bf16.msra.mxu0 %v6710_v62  ;;  %v6757_v62 = vld [vmem:[%s8525_s11 + $0x120] sm:$0xff]  }
 0xed2   : > { %6285 = vmatprep.subr.bf16.mxu0 %v6712_v23  ;;  %v6759_v23 = vld [vmem:[%s8525_s11 + $0x168] sm:$0xff]  }
 0xed5   : > { %6286 = vmatpush3.bf16.msra.mxu0 %v6714_v4  ;;  %v6760_v4 = vld [vmem:[%s8525_s11 + $0x1e8] sm:$0xff]  }
 0xed6   : > { %6287 = vmatprep.subr.bf16.mxu0 %v6716_v50  ;;  %v6761_v50 = vld [vmem:[%s8525_s11 + $0x128] sm:$0xff]  }
 0xed9   : > { %6288 = vmatpush3.bf16.msra.mxu0 %v6718_v49  ;;  %v6762_v49 = vld [vmem:[%s8525_s11 + $0x1a8] sm:$0xff]  }
 0xeda   : > { %6289 = vmatprep.subr.bf16.mxu0 %v6720_v34  ;;  %v6763_v34 = vld [vmem:[%s8525_s11 + $0x170] sm:$0xff]  }
 0xedd   : > { %6290 = vmatpush3.bf16.msra.mxu0 %v6722_v12  ;;  %v6764_v12 = vld [vmem:[%s8525_s11 + $0x1f0] sm:$0xff]  }
 0xede   : > { %6291 = vmatprep.subr.bf16.mxu0 %v6724_v21  ;;  %v6765_v21 = vld [vmem:[%s8525_s11 + $0x130] sm:$0xff]  }
 0xee1   : > { %6292 = vmatpush3.bf16.msra.mxu0 %v6726_v48  ;;  %v6766_v48 = vld [vmem:[%s8525_s11 + $0x1b0] sm:$0xff]  }
 0xee2   : > { %6293 = vmatprep.subr.bf16.mxu0 %v6728_v33  ;;  %v6767_v33 = vld [vmem:[%s8525_s11 + $0x178] sm:$0xff]  }
 0xee5   : > { %6294 = vmatpush3.bf16.msra.mxu0 %v6730_v18  ;;  %v6768_v18 = vld [vmem:[%s8525_s11 + $0x1f8] sm:$0xff]  }
 0xee6   : > { %6295 = vmatprep.subr.bf16.mxu0 %v6732_v60 }
 0xee9   : > { %6296 = vmatpush3.bf16.msra.mxu0 %v6734_v19  ;;  %v6770_v19 = vld [vmem:[%s8525_s11 + $0x1b8] sm:$0xff]  }
 0xeea   : > { %6297 = vmatprep.subr.bf16.mxu0 %v6736_v29 }
 0xeed   : > { %6298 = vmatpush3.bf16.msra.mxu0 %v6738_v20 }
 0xeee   : > { %6327 = vmatprep.subr.bf16.mxu0 %v6740_v2  ;;  %v6774_v2 = vld [vmem:[%s8527_s13 + $0x18] sm:$0xff]  }
 0xfa3   : > { %v5110_v47 = vpop.f32.mrb[48].mxu0 }
 0xfa4   : > { %v8362_v11 = vadd.f32 %v6088_v1, %v5110_v47  ;;  %v6572_v31 = vpop.f32.mrb[49].mxu0  ;;  %v6775_v1 = vld [vmem:[%s8527_s13 + $0x20] sm:$0xff]   ;;  %v6776_v47 = vld [vmem:[%s8527_s13 + $0x28] sm:$0xff]  }
 0xfa5   : > { %v5113_v41 = vpop.f32.mrb[50].mxu0  ;;  %v6778_v31 = vld [vmem:[%s8527_s13 + $0x38] sm:$0xff]  }
 0xfa6   : > { %v6573_v55 = vpop.f32.mrb[51].mxu0  ;;  %v5117_v54 = vrot.slane %v8362_v11, 1  ;;  %v5119_v58 = vrot.slane %v8362_v11, 3  ;;  %v5118_v8 = vrot.slane %v8362_v11, 2  ;;  %v5132_v9 = vadd.f32 %v8362_v11, %v7750_v38  ;;  %v6741_v38 = vld [vmem:[%s8525_s11 + $0x100] sm:$0xff]  }
 0xfa7   : > { %v5121_v61 = vrot.slane %v8362_v11, 5  ;;  %v5123_v59 = vrot.slane %v8362_v11, 7  ;;  %v5120_v7 = vrot.slane %v8362_v11, 4  ;;  %v5122_v60 = vrot.slane %v8362_v11, 6  ;;  %v6777_v11 = vld [vmem:[%s8527_s13 + $0x30] sm:$0xff]  }
 0xfa8   : > { %v5133_v63 = vadd.f32 %v5117_v54, %v7752_v25  ;;  %v5135_v36 = vadd.f32 %v5119_v58, %v7758_v3  ;;  %v5134_v56 = vadd.f32 %v5118_v8, %v7754_v13  ;;  %v5140_v25 = vpack.c.bf16 %v5132_v9, %v5132_v9  ;;  %v6743_v13 = vld [vmem:[%s8525_s11 + $0x148] sm:$0xff]   ;;  %v5276_v54 = vld [vmem:[%s8526_s12] sm:$0x1] }
 0xfa9   : > { %v5137_v0 = vadd.f32 %v5121_v61, %v7770_v28  ;;  %v5139_v6 = vadd.f32 %v5123_v59, %v7772_v39  ;;  %v6744_v3 = vld [vmem:[%s8525_s11 + $0x1c8] sm:$0xff]   ;;  %v5136_v30 = vadd.f32 %v5120_v7, %v7764_v26  ;;  %v5138_v29 = vadd.f32 %v5122_v60, %v7766_v57  ;;  %v6773_v57 = vld [vmem:[%s8527_s13 + $0x10] sm:$0xff]  }
 0xfaa   : > { %v5141_v22 = vpack.c.bf16 %v5133_v63, %v5133_v63  ;;  %v5143_v42 = vpack.c.bf16 %v5135_v36, %v5135_v36  ;;  %v5142_v52 = vpack.c.bf16 %v5134_v56, %v5134_v56  ;;  %v6772_v26 = vld [vmem:[%s8527_s13 + $0x8] sm:$0xff]  }
 0xfab   : > { %v5145_v28 = vpack.c.bf16 %v5137_v0, %v5137_v0  ;;  %v5147_v39 = vpack.c.bf16 %v5139_v6, %v5139_v6  ;;  %v5144_v5 = vpack.c.bf16 %v5136_v30, %v5136_v30  ;;  %v5146_v20 = vpack.c.bf16 %v5138_v29, %v5138_v29 }
 0xfac   : > { %5693 = vmatprep.mubr.bf16.mxu1 %v5141_v22  ;;  %5733 = vmatprep.mubr.bf16.mxu0 %v5143_v42 }
 0xfad   : > { %5694 = vmatmul.mubr.bf16.vlgmr.msra.gmra.mrb[36].mxu1 %v5140_v25  ;;  %5734 = vmatmul.mubr.bf16.vlgmr.msra.gmra.mrb[52].mxu0 %v5142_v52 }
 0xfae   : > { %6306 = vmatpush3.bf16.msra.mxu1 %v6741_v38  ;;  %6328 = vmatpush3.bf16.msra.mxu0 %v6742_v44 }
 0xfaf   : > { %5773 = vmatprep.mubr.bf16.mxu1 %v5145_v28  ;;  %5813 = vmatprep.mubr.bf16.mxu0 %v5147_v39 }
 0xfb0   : > { %6307 = vmatprep.subr.bf16.mxu1 %v6743_v13  ;;  %6329 = vmatprep.subr.bf16.mxu0 %v6744_v3 }
 0xfb2   : > { %6308 = vmatpush3.bf16.msra.mxu1 %v6745_v17  ;;  %6330 = vmatpush3.bf16.msra.mxu0 %v6746_v14 }
 0xfb3   : > { %6309 = vmatprep.subr.bf16.mxu1 %v6747_v45  ;;  %6331 = vmatprep.subr.bf16.mxu0 %v6748_v53  ;;  %v5839_v53 = vld [vmem:[#allocation2] sm:$0x1] }
 0xfb6   : > { %6310 = vmatpush3.bf16.msra.mxu1 %v6749_v51  ;;  %6332 = vmatpush3.bf16.msra.mxu0 %v6750_v46 }
 0xfb7   : > { %6311 = vmatprep.subr.bf16.mxu1 %v6751_v15  ;;  %6333 = vmatprep.subr.bf16.mxu0 %v6752_v27 }
 0xfba   : > { %6312 = vmatpush3.bf16.msra.mxu1 %v6753_v43  ;;  %6334 = vmatpush3.bf16.msra.mxu0 %v6754_v10 }
 0xfbb   : > { %6313 = vmatprep.subr.bf16.mxu1 %v6755_v32  ;;  %6335 = vmatprep.subr.bf16.mxu0 %v6756_v37 }
 0xfbe   : > { %6314 = vmatpush3.bf16.msra.mxu1 %v6757_v62  ;;  %6336 = vmatpush3.bf16.msra.mxu0 %v6758_v35 }
 0xfbf   : > { %6315 = vmatprep.subr.bf16.mxu1 %v6759_v23  ;;  %6337 = vmatprep.subr.bf16.mxu0 %v6760_v4 }
 0xfc2   : > { %6316 = vmatpush3.bf16.msra.mxu1 %v6761_v50  ;;  %6338 = vmatpush3.bf16.msra.mxu0 %v6762_v49 }
 0xfc3   : > { %6317 = vmatprep.subr.bf16.mxu1 %v6763_v34  ;;  %6339 = vmatprep.subr.bf16.mxu0 %v6764_v12 }
 0xfc6   : > { %6318 = vmatpush3.bf16.msra.mxu1 %v6765_v21  ;;  %6340 = vmatpush3.bf16.msra.mxu0 %v6766_v48 }
 0xfc7   : > { %6319 = vmatprep.subr.bf16.mxu1 %v6767_v33  ;;  %6341 = vmatprep.subr.bf16.mxu0 %v6768_v18 }
 0xfca   : > { %6320 = vmatpush3.bf16.msra.mxu1 %v6769_v24  ;;  %6342 = vmatpush3.bf16.msra.mxu0 %v6770_v19 }
 0xfcb   : > { %6574 = vmatprep.subr.bf16.mxu1 %v6855_v16 }
 0xfcd   : > { %5774 = vmatmul.mubr.bf16.vlgmr.msra.gmra.mrb[40].mxu1 %v5144_v5  ;;  %5814 = vmatmul.mubr.bf16.vlgmr.msra.gmra.mrb[56].mxu0 %v5146_v20 }
 0xfce   : > { %6590 = vmatprep.mubr.msk.bf16.mxu1 %vm6856_vm0, %v6855_v16  ;;  %6575 = vmatpush3.bf16.msra.mxu1 %v6771_v40 }
 0xfcf   : > { %6576 = vmatprep.subr.bf16.mxu1 %v6855_v16 }
 0xfd2   : > { %6577 = vmatpush3.bf16.msra.mxu1 %v6772_v26 }
 0xfd3   : > { %6578 = vmatprep.subr.bf16.mxu1 %v6855_v16 }
 0xfd6   : > { %6579 = vmatpush3.bf16.msra.mxu1 %v6773_v57 }
 0xfd7   : > { %6580 = vmatprep.subr.bf16.mxu1 %v6855_v16 }
 0xfda   : > { %6581 = vmatpush3.bf16.msra.mxu1 %v6774_v2 }
 0xfdb   : > { %6582 = vmatprep.subr.bf16.mxu1 %v6855_v16 }
 0xfde   : > { %6583 = vmatpush3.bf16.msra.mxu1 %v6775_v1 }
 0xfdf   : > { %6584 = vmatprep.subr.bf16.mxu1 %v6855_v16 }
 0xfe2   : > { %6585 = vmatpush3.bf16.msra.mxu1 %v6776_v47 }
 0xfe3   : > { %6586 = vmatprep.subr.bf16.mxu1 %v6855_v16 }
 0xfe6   : > { %6587 = vmatpush3.bf16.msra.mxu1 %v6777_v11 }
 0xfe7   : > { %6588 = vmatprep.subr.bf16.mxu1 %v6855_v16 }
 0xfea   : > { %6589 = vmatpush3.bf16.msra.mxu1 %v6778_v31 }
0x1080   : > { %v6277_v41 = vpop.f32.mrb[36].mxu1  ;;  %v6299_v55 = vpop.f32.mrb[52].mxu0 }
0x1081   : > { %v6278_v58 = vpop.f32.mrb[37].mxu1  ;;  %v6300_v8 = vpop.f32.mrb[53].mxu0 }
0x1082   : > { %v6279_v9 = vadd.f32 %v6278_v58, %v6277_v41  ;;  %v6301_v61 = vadd.f32 %v6300_v8, %v6299_v55  ;;  %v6280_v59 = vpop.f32.mrb[38].mxu1  ;;  %v6302_v63 = vpop.f32.mrb[54].mxu0 }
0x1083   : > { %v6281_v36 = vpop.f32.mrb[39].mxu1  ;;  %v6303_v56 = vpop.f32.mrb[55].mxu0 }
0x1084   : > { %v5696_v16 = vadd.f32 %v6279_v9, %v5276_v54 }
0x1086   : > { %v5736_v0 = vadd.f32 %v6301_v61, %v5696_v16 }
0x10a0   : > { %v6321_v6 = vpop.f32.mrb[40].mxu1  ;;  %v6343_v22 = vpop.f32.mrb[56].mxu0 }
0x10a1   : > { %v6322_v42 = vpop.f32.mrb[41].mxu1  ;;  %v6344_v52 = vpop.f32.mrb[57].mxu0 }
0x10a2   : > { %v6323_v38 = vadd.f32 %v6322_v42, %v6321_v6  ;;  %v6345_v44 = vadd.f32 %v6344_v52, %v6343_v22  ;;  %v6324_v25 = vpop.f32.mrb[42].mxu1  ;;  %v6346_v13 = vpop.f32.mrb[58].mxu0 }
0x10a3   : > { %v6325_v3 = vpop.f32.mrb[43].mxu1  ;;  %v6347_v28 = vpop.f32.mrb[59].mxu0 }
0x10a4   : > { %v5776_v39 = vadd.f32 %v6323_v38, %v5736_v0 }
0x10a6   : > { %v5816_v17 = vadd.f32 %v6345_v44, %v5776_v39 }
0x10a8   : > { %v5821_v14 = vmax.f32 %v5816_v17, 0.0 }
0x10aa   : > { %v5822_v45 = vpack.c.bf16 %v5821_v14, %v5821_v14 }
0x10ac   : > { %6591 = vmatmul.mubr.bf16.vlgmr.msra.gmra.mrb[44].mxu1 %v5822_v45 }
0x117f   : > { %v5922_v51 = vpop.f32.mrb[44].mxu1 }
0x1180   : > { %v5923_v46 = vadd.f32 %v5922_v51, %v5839_v53  ;;  %v6592_v15 = vpop.f32.mrb[45].mxu1 }
0x1181   : > { %v5925_v27 = vpop.f32.mrb[46].mxu1 }
0x1182   : > { %5929 = vst.msk [vmem:[%s492_s26] sm:$0x1] %vm5928_vm14, %v5923_v46  ;;  %v6593_v43 = vpop.f32.mrb[47].mxu1 }
0x1183 PF: > { %s27_s20 = sadd.s32 1, %s6849_s20  }
0x1184   : > { %p24_p4 = scmp.ge.s32.totalorder %s27_s20, 6  }
0x1186   :  { %26 = sbr.rel (!%p24_p4) target bundleno = 3 (0x3), region = 114 }

</bundles_post_ra>
